<compile_context>
chip_gen: v7x
topology: tpu7x:2x2x1
jax: 0.10.0
libtpu: 0.0.40
codegen_flags: <defaults>
</compile_context>

<pallas_src>
import functools
import math

import jax
import jax.numpy as jnp
from jax.experimental import pallas as pl
from jax.experimental.pallas import tpu as pltpu

# Plain Python float so it stays a weak-typed literal inside the kernel trace
# (a jnp/np scalar would become a captured f32[] constant, which pallas_call rejects).
NEG_INF = -1e30  # stands in for float('-inf'); exp() of masked scores is exactly 0


# ---------------------------------------------------------------------------
# Helpers
# ---------------------------------------------------------------------------
def _layer_norm(x, w, b, eps=1e-5):
    mu = jnp.mean(x, axis=-1, keepdims=True)
    xc = x - mu
    var = jnp.mean(xc * xc, axis=-1, keepdims=True)
    return xc * jax.lax.rsqrt(var + eps) * w + b


# ---------------------------------------------------------------------------
# Fused forward kernel (input Linear + nlayers encoder layers + output Linear)
# ---------------------------------------------------------------------------
def _transformer_forward_kernel(
        lengths_ref,                       # SMEM scalar prefetch: (B,) int32
        x_ref,                             # (Bb*S, ninp)
        win_ref, bin_ref,                  # (ninp, D), (1, D)
        wqkv_ref, bqkv_ref,                # (L, D, 3D), (L, 1, 3D)   (q part pre-scaled)
        wo_ref, bo_ref,                    # (L, D, D), (L, 1, D)
        ln1w_ref, ln1b_ref,                # (L, 1, D)
        w1_ref, b1_ref, w2_ref, b2_ref,    # feed-forward (dim_feedforward == D)
        ln2w_ref, ln2b_ref,                # (L, 1, D)
        wout_ref, bout_ref,                # (D, ninp), (1, ninp)
        out_ref, hid_ref,                  # (Bb*S, ninp), (Bb*S, D)
        *, nlayers, nhead, seq_len, batch_block, compute_dtype):
    S, Bb, H = seq_len, batch_block, nhead
    D = win_ref.shape[1]
    hd = D // H
    g = pl.program_id(0)

    def mm(a, b):  # MXU matmul with f32 accumulation (optionally bf16 operands)
        return jnp.dot(a.astype(compute_dtype), b.astype(compute_dtype),
                       preferred_element_type=jnp.float32)

    def bmm(spec, a, b):  # batched einsum on the MXU, f32 accumulation
        return jnp.einsum(spec, a.astype(compute_dtype), b.astype(compute_dtype),
                          preferred_element_type=jnp.float32)

    # ---- additive attention bias, built once per grid step (hoisted out of layers) ----
    # causal: 0 where key <= query else -inf; keypad: 0 where key < length else -inf
    q_idx = jax.lax.broadcasted_iota(jnp.int32, (S, S), 0)
    k_idx = jax.lax.broadcasted_iota(jnp.int32, (S, S), 1)
    causal = jnp.where(k_idx <= q_idx, 0.0, NEG_INF)                        # (S, S)
    k_row = jax.lax.broadcasted_iota(jnp.int32, (1, S), 1)
    pad_rows = [jnp.where(k_row < lengths_ref[g * Bb + bb], 0.0, NEG_INF)
                for bb in range(Bb)]                                        # Bb x (1, S)
    keypad = pad_rows[0] if Bb == 1 else jnp.concatenate(pad_rows, axis=0)  # (Bb, S)
    # (Bb, 1, S, S): broadcast over heads (and queries) in the score add;
    # the bias is never replicated H times.
    bias = causal[None, None, :, :] + keypad[:, None, None, :]

    def split_heads(x2d):   # (Bb*S, D) -> (Bb*H, S, hd), Bb-major batch
        x4 = x2d.reshape(Bb, S, H, hd)
        return jnp.transpose(x4, (0, 2, 1, 3)).reshape(Bb * H, S, hd)

    # ---- input linear: (Bb*S, ninp) -> (Bb*S, D) ----
    h = mm(x_ref[...], win_ref[...]) + bin_ref[...]

    # ---- encoder layers (post-LN, relu FFN, dropout = identity in eval) ----
    for l in range(nlayers):
        qkv = mm(h, wqkv_ref[l]) + bqkv_ref[l]                              # (Bb*S, 3D)
        q = split_heads(qkv[:, 0 * D:1 * D])                                # (Bb*H, S, hd)
        k = split_heads(qkv[:, 1 * D:2 * D])
        v = split_heads(qkv[:, 2 * D:3 * D])

        # scores in f32 with broadcast bias (q-scale already folded into Wq/bq)
        s = bmm('bqe,bke->bqk', q, k).reshape(Bb, H, S, S) + bias           # (Bb, H, S, S)
        s = s - jnp.max(s, axis=-1, keepdims=True)
        p = jnp.exp(s)
        denom = jnp.sum(p, axis=-1, keepdims=True)                          # (Bb, H, S, 1)

        o = bmm('bqk,bke->bqe', p.reshape(Bb * H, S, S), v)                 # (Bb*H, S, hd)
        # deferred softmax normalization on the hd-wide output (exact; EUP reciprocal path)
        o = o / denom.reshape(Bb * H, S, 1)

        # merge heads back to (Bb*S, D) with a single reshape + transpose (lane-dense)
        attn = jnp.transpose(o.reshape(Bb, H, S, hd), (0, 2, 1, 3)).reshape(Bb * S, D)

        attn = mm(attn, wo_ref[l]) + bo_ref[l]
        h = _layer_norm(h + attn, ln1w_ref[l], ln1b_ref[l])                 # residual + LN1

        ff = jnp.maximum(mm(h, w1_ref[l]) + b1_ref[l], 0.0)                 # relu FFN
        ff = mm(ff, w2_ref[l]) + b2_ref[l]
        h = _layer_norm(h + ff, ln2w_ref[l], ln2b_ref[l])                   # residual + LN2

    hid_ref[...] = h
    out_ref[...] = mm(h, wout_ref[...]) + bout_ref[...]                     # output linear


# ---------------------------------------------------------------------------
# pallas_call wrapper
# ---------------------------------------------------------------------------
_WEIGHT_MAT_KEYS = ('win_t', 'wqkv_t', 'wo_t', 'w1_t', 'w2_t', 'wout_t')
_WEIGHT_ORDER = ('win_t', 'bin', 'wqkv_t', 'bqkv', 'wo_t', 'bo',
                 'ln1w', 'ln1b', 'w1_t', 'b1', 'w2_t', 'b2',
                 'ln2w', 'ln2b', 'wout_t', 'bout')


def _auto_batch_block(batch, seq_len, target_rows=256):
    """Biggest divisor of `batch` whose block stays under ~target_rows MXU rows; if that
    leaves a single grid step, prefer >=2 steps (v7x megacore) while keeping >=128 rows."""
    divisors = [d for d in range(1, batch + 1) if batch % d == 0]
    fitting = [d for d in divisors if d * seq_len <= max(target_rows, seq_len)]
    best = max(fitting) if fitting else 1
    if batch // best < 2:
        smaller = [d for d in divisors if d < best and d * seq_len >= 128]
        if smaller:
            best = max(smaller)
    return best


def _fused_pallas_forward(params, x2d, lengths, *, nhead, nlayers, seq_len, batch,
                          batch_block, compute_dtype):
    BS, ninp = x2d.shape
    D = params['win_t'].shape[1]
    assert batch % batch_block == 0
    grid = (batch // batch_block,)
    rows = batch_block * seq_len

    # Weight matrices are fed at compute dtype (bf16 on v6e/v7x halves resident-weight
    # VMEM / DMA and removes per-layer casts); biases / LN params stay f32.
    p = dict(params)
    if compute_dtype != jnp.float32:
        for key in _WEIGHT_MAT_KEYS:
            p[key] = p[key].astype(compute_dtype)
    weight_args = [p[k] for k in _WEIGHT_ORDER]

    kernel = functools.partial(
        _transformer_forward_kernel, nlayers=nlayers, nhead=nhead, seq_len=seq_len,
        batch_block=batch_block, compute_dtype=compute_dtype)

    rows_map = lambda g, lens: (g, 0)            # activations: blocked over batch rows
    const2 = lambda g, lens: (0, 0)              # weights: full-array block, grid-invariant
    const3 = lambda g, lens: (0, 0, 0)
    # NOTE: these grid-invariant weight specs could be single-buffered
    # (pipeline_mode=pl.Buffered(1)) to halve their VMEM footprint on v7x.
    full_spec = lambda a: pl.BlockSpec(a.shape, const2 if a.ndim == 2 else const3)

    in_specs = [pl.BlockSpec((rows, ninp), rows_map)] + [full_spec(a) for a in weight_args]
    out_specs = (
        pl.BlockSpec((rows, ninp), rows_map),
        pl.BlockSpec((rows, D), rows_map),
    )
    out_shape = (
        jax.ShapeDtypeStruct((BS, ninp), jnp.float32),
        jax.ShapeDtypeStruct((BS, D), jnp.float32),
    )

    # Explicit scoped-VMEM budget: resident (double-buffered) weights + scores + activation
    # temporaries, with headroom.  The 16/32 MiB defaults are easily exceeded once
    # nhid / nlayers grow.
    weight_bytes = sum(int(a.size) * a.dtype.itemsize for a in weight_args)
    act_bytes = 4 * rows * (ninp + 8 * D)
    score_bytes = 4 * batch_block * nhead * seq_len * seq_len * 3
    needed = 2 * weight_bytes + 2 * (act_bytes + score_bytes) + (8 << 20)
    vmem_limit = int(min(100 << 20, max(32 << 20, needed)))

    grid_spec = pltpu.PrefetchScalarGridSpec(
        num_scalar_prefetch=1, grid=grid, in_specs=in_specs, out_specs=out_specs)

    return pl.pallas_call(
        kernel, out_shape=out_shape, grid_spec=grid_spec,
        compiler_params=pltpu.CompilerParams(
            dimension_semantics=("parallel",), vmem_limit_bytes=vmem_limit),
    )(lengths, x2d, *weight_args)


# ---------------------------------------------------------------------------
# Forward pass (mirrors TransformerEncoder.forward(src, lengths, device))
# ---------------------------------------------------------------------------
def transformer_encoder_forward(params, src, lengths, *, nhead, batch_block=None,
                                compute_dtype=jnp.float32):
    """src: (S, B, ninp) seq-major float32 (PyTorch layout); lengths: (B,) ints with
    lengths.max() == S.  Returns (output (S, B, ninp), hidden (S, B, nhid))."""
    S, B, ninp = src.shape
    nhid = params['win_t'].shape[1]
    nlayers = params['wqkv_t'].shape[0]
    if batch_block is None:
        batch_block = _auto_batch_block(B, S)

    # glue: transpose to batch-major once and keep activations 2-D inside the kernel
    x2d = jnp.transpose(src, (1, 0, 2)).reshape(B * S, ninp)
    out2d, hid2d = _fused_pallas_forward(
        params, x2d, lengths.astype(jnp.int32), nhead=nhead, nlayers=nlayers,
        seq_len=S, batch=B, batch_block=batch_block, compute_dtype=compute_dtype)

    output = jnp.transpose(out2d.reshape(B, S, ninp), (1, 0, 2))
    hidden = jnp.transpose(hid2d.reshape(B, S, nhid), (1, 0, 2))
    return output, hidden


# ---------------------------------------------------------------------------
# Pure-JAX reference (same folded parameters) for a correctness check
# ---------------------------------------------------------------------------
def reference_forward(params, src, lengths, *, nhead):
    S, B, ninp = src.shape
    D = params['win_t'].shape[1]
    nlayers = params['wqkv_t'].shape[0]
    H, hd = nhead, D // nhead

    x = jnp.transpose(src, (1, 0, 2))                                     # (B,S,ninp)
    h = x @ params['win_t'] + params['bin']

    causal = jnp.where(jnp.arange(S)[None, :] <= jnp.arange(S)[:, None], 0.0, NEG_INF)
    keypad = jnp.where(jnp.arange(S)[None, :] < lengths[:, None], 0.0, NEG_INF)
    bias = causal[None, None] + keypad[:, None, None, :]                  # (B,1,S,S)

    for l in range(nlayers):
        qkv = h @ params['wqkv_t'][l] + params['bqkv'][l]
        q = qkv[..., 0 * D:1 * D].reshape(B, S, H, hd).transpose(0, 2, 1, 3)
        k = qkv[..., 1 * D:2 * D].reshape(B, S, H, hd).transpose(0, 2, 1, 3)
        v = qkv[..., 2 * D:3 * D].reshape(B, S, H, hd).transpose(0, 2, 1, 3)
        s = jnp.einsum('bhqe,bhke->bhqk', q, k) + bias
        p = jax.nn.softmax(s, axis=-1)
        o = jnp.einsum('bhqk,bhke->bhqe', p, v).transpose(0, 2, 1, 3).reshape(B, S, D)
        attn = o @ params['wo_t'][l] + params['bo'][l]
        h = _layer_norm(h + attn, params['ln1w'][l], params['ln1b'][l])
        ff = jax.nn.relu(h @ params['w1_t'][l] + params['b1'][l]) @ params['w2_t'][l] + params['b2'][l]
        h = _layer_norm(h + ff, params['ln2w'][l], params['ln2b'][l])

    out = h @ params['wout_t'] + params['bout']
    return jnp.transpose(out, (1, 0, 2)), jnp.transpose(h, (1, 0, 2))


# ---------------------------------------------------------------------------
# Deterministic parameter initialization (shapes match the PyTorch module)
# ---------------------------------------------------------------------------
def _xavier_uniform(key, shape):
    fan_out, fan_in = shape  # PyTorch Linear weight layout (out, in)
    limit = math.sqrt(6.0 / (fan_in + fan_out))
    return jax.random.uniform(key, shape, jnp.float32, -limit, limit)


def init_params(key, ninp, nhead, nhid, nlayers):
    hd = nhid // nhead
    scale = 1.0 / math.sqrt(hd)          # folded into Wq / bq (attention q-scale)
    keys = iter(jax.random.split(key, 4 + 8 * nlayers))

    def bias(k, n):
        return jax.random.uniform(k, (1, n), jnp.float32, -0.05, 0.05)

    win_t = _xavier_uniform(next(keys), (nhid, ninp)).T                    # (ninp, nhid)
    bin_ = bias(next(keys), nhid)
    wout_t = _xavier_uniform(next(keys), (ninp, nhid)).T                   # (nhid, ninp)
    bout = bias(next(keys), ninp)

    wqkv_l, bqkv_l, wo_l, bo_l = [], [], [], []
    w1_l, b1_l, w2_l, b2_l = [], [], [], []
    ln1w_l, ln1b_l, ln2w_l, ln2b_l = [], [], [], []
    for _ in range(nlayers):
        in_proj = _xavier_uniform(next(keys), (3 * nhid, nhid))            # PyTorch (3D, D)
        in_bias = jax.random.uniform(next(keys), (1, 3 * nhid), jnp.float32, -0.05, 0.05)
        wq_t = in_proj[0 * nhid:1 * nhid].T * scale
        wk_t = in_proj[1 * nhid:2 * nhid].T
        wv_t = in_proj[2 * nhid:3 * nhid].T
        bq = in_bias[:, 0 * nhid:1 * nhid] * scale
        bk = in_bias[:, 1 * nhid:2 * nhid]
        bv = in_bias[:, 2 * nhid:3 * nhid]
        wqkv_l.append(jnp.concatenate([wq_t, wk_t, wv_t], axis=1))         # (D, 3D)
        bqkv_l.append(jnp.concatenate([bq, bk, bv], axis=1))               # (1, 3D)
        wo_l.append(_xavier_uniform(next(keys), (nhid, nhid)).T)
        bo_l.append(bias(next(keys), nhid))
        w1_l.append(_xavier_uniform(next(keys), (nhid, nhid)).T)           # dim_ff == nhid
        b1_l.append(bias(next(keys), nhid))
        w2_l.append(_xavier_uniform(next(keys), (nhid, nhid)).T)
        b2_l.append(bias(next(keys), nhid))
        ln1w_l.append(jnp.ones((1, nhid), jnp.float32))
        ln1b_l.append(jnp.zeros((1, nhid), jnp.float32))
        ln2w_l.append(jnp.ones((1, nhid), jnp.float32))
        ln2b_l.append(jnp.zeros((1, nhid), jnp.float32))

    stack = lambda xs: jnp.stack(xs, axis=0)
    return {
        'win_t': win_t, 'bin': bin_, 'wout_t': wout_t, 'bout': bout,
        'wqkv_t': stack(wqkv_l), 'bqkv': stack(bqkv_l),
        'wo_t': stack(wo_l), 'bo': stack(bo_l),
        'ln1w': stack(ln1w_l), 'ln1b': stack(ln1b_l),
        'w1_t': stack(w1_l), 'b1': stack(b1_l),
        'w2_t': stack(w2_l), 'b2': stack(b2_l),
        'ln2w': stack(ln2w_l), 'ln2b': stack(ln2b_l),
    }


if __name__ == "__main__":
    S, B = 8, 2
    ninp, nhead, nhid, nlayers = 4, 4, 32, 2

    key = jax.random.PRNGKey(0)
    pkey, dkey = jax.random.split(key)
    params = init_params(pkey, ninp, nhead, nhid, nlayers)

    src = jax.random.normal(dkey, (S, B, ninp), dtype=jnp.float32)    # seq-major like PyTorch
    lengths = jnp.array([8, 6], dtype=jnp.int32)                      # lengths.max() == S

    output, hidden = transformer_encoder_forward(params, src, lengths, nhead=nhead)
    jax.block_until_ready((output, hidden))

    assert output.shape == (S, B, ninp), output.shape
    assert hidden.shape == (S, B, nhid), hidden.shape
    assert bool(jnp.isfinite(output).all()) and bool(jnp.isfinite(hidden).all())

    ref_out, ref_hid = reference_forward(params, src, lengths, nhead=nhead)
    assert bool(jnp.allclose(output, ref_out, atol=2e-3, rtol=2e-3)), \
        float(jnp.max(jnp.abs(output - ref_out)))
    assert bool(jnp.allclose(hidden, ref_hid, atol=2e-3, rtol=2e-3)), \
        float(jnp.max(jnp.abs(hidden - ref_hid)))

    print("KERNEL_OK")
</pallas_src>

<mosaic_0001>
module attributes {stable_mosaic.version = 11 : i64} {
  func.func @_transformer_forward_kernel(%arg0: i32, %arg1: memref<2xi32, #tpu.memory_space<smem>>, %arg2: memref<16x4xf32, #tpu.memory_space<vmem>>, %arg3: memref<4x32xf32, #tpu.memory_space<vmem>>, %arg4: memref<1x32xf32, #tpu.memory_space<vmem>>, %arg5: memref<2x32x96xf32, #tpu.memory_space<vmem>>, %arg6: memref<2x1x96xf32, #tpu.memory_space<vmem>>, %arg7: memref<2x32x32xf32, #tpu.memory_space<vmem>>, %arg8: memref<2x1x32xf32, #tpu.memory_space<vmem>>, %arg9: memref<2x1x32xf32, #tpu.memory_space<vmem>>, %arg10: memref<2x1x32xf32, #tpu.memory_space<vmem>>, %arg11: memref<2x32x32xf32, #tpu.memory_space<vmem>>, %arg12: memref<2x1x32xf32, #tpu.memory_space<vmem>>, %arg13: memref<2x32x32xf32, #tpu.memory_space<vmem>>, %arg14: memref<2x1x32xf32, #tpu.memory_space<vmem>>, %arg15: memref<2x1x32xf32, #tpu.memory_space<vmem>>, %arg16: memref<2x1x32xf32, #tpu.memory_space<vmem>>, %arg17: memref<32x4xf32, #tpu.memory_space<vmem>>, %arg18: memref<1x4xf32, #tpu.memory_space<vmem>>, %arg19: memref<16x4xf32, #tpu.memory_space<vmem>>, %arg20: memref<16x32xf32, #tpu.memory_space<vmem>>) attributes {dimension_semantics = [#tpu.dimension_semantics<parallel>], iteration_bounds = array<i64: 1>, scalar_prefetch = 1 : i64, scratch_operands = 0 : i64, tpu.core_type = #tpu.core_type<tc>, window_params = [{transform_indices = @transform_0, window_bounds = array<i64: 16, 4>}, {pipeline_mode = #tpu.pipeline_mode<synchronous>, transform_indices = @transform_1, window_bounds = array<i64: 4, 32>}, {pipeline_mode = #tpu.pipeline_mode<synchronous>, transform_indices = @transform_2, window_bounds = array<i64: 1, 32>}, {pipeline_mode = #tpu.pipeline_mode<synchronous>, transform_indices = @transform_3, window_bounds = array<i64: 2, 32, 96>}, {pipeline_mode = #tpu.pipeline_mode<synchronous>, transform_indices = @transform_4, window_bounds = array<i64: 2, 1, 96>}, {pipeline_mode = #tpu.pipeline_mode<synchronous>, transform_indices = @transform_5, window_bounds = array<i64: 2, 32, 32>}, {pipeline_mode = #tpu.pipeline_mode<synchronous>, transform_indices = @transform_6, window_bounds = array<i64: 2, 1, 32>}, {pipeline_mode = #tpu.pipeline_mode<synchronous>, transform_indices = @transform_7, window_bounds = array<i64: 2, 1, 32>}, {pipeline_mode = #tpu.pipeline_mode<synchronous>, transform_indices = @transform_8, window_bounds = array<i64: 2, 1, 32>}, {pipeline_mode = #tpu.pipeline_mode<synchronous>, transform_indices = @transform_9, window_bounds = array<i64: 2, 32, 32>}, {pipeline_mode = #tpu.pipeline_mode<synchronous>, transform_indices = @transform_10, window_bounds = array<i64: 2, 1, 32>}, {pipeline_mode = #tpu.pipeline_mode<synchronous>, transform_indices = @transform_11, window_bounds = array<i64: 2, 32, 32>}, {pipeline_mode = #tpu.pipeline_mode<synchronous>, transform_indices = @transform_12, window_bounds = array<i64: 2, 1, 32>}, {pipeline_mode = #tpu.pipeline_mode<synchronous>, transform_indices = @transform_13, window_bounds = array<i64: 2, 1, 32>}, {pipeline_mode = #tpu.pipeline_mode<synchronous>, transform_indices = @transform_14, window_bounds = array<i64: 2, 1, 32>}, {pipeline_mode = #tpu.pipeline_mode<synchronous>, transform_indices = @transform_15, window_bounds = array<i64: 32, 4>}, {pipeline_mode = #tpu.pipeline_mode<synchronous>, transform_indices = @transform_16, window_bounds = array<i64: 1, 4>}, {transform_indices = @transform_17, window_bounds = array<i64: 16, 4>}, {transform_indices = @transform_18, window_bounds = array<i64: 16, 32>}]} {
    %0 = tpu.iota {dimensions = array<i32: 0>} : vector<8x8xi32>
    %1 = tpu.iota {dimensions = array<i32: 1>} : vector<8x8xi32>
    %2 = arith.cmpi sle, %1, %0 : vector<8x8xi32>
    %cst = arith.constant 0.000000e+00 : f32
    %cst_0 = arith.constant -1.000000e+30 : f32
    %3 = vector.broadcast %cst : f32 to vector<8x8xf32>
    %4 = vector.broadcast %cst_0 : f32 to vector<8x8xf32>
    %5 = arith.select %2, %3, %4 : vector<8x8xi1>, vector<8x8xf32>
    %6 = tpu.iota {dimensions = array<i32: 1>} : vector<1x8xi32>
    %c2_i32 = arith.constant 2 : i32
    %7 = arith.muli %arg0, %c2_i32 : i32
    %c0_i32 = arith.constant 0 : i32
    %8 = arith.addi %7, %c0_i32 : i32
    %9 = arith.index_cast %8 : i32 to index
    %10 = memref.load %arg1[%9] : memref<2xi32, #tpu.memory_space<smem>>
    %11 = vector.broadcast %10 : i32 to vector<1x8xi32>
    %12 = arith.cmpi slt, %6, %11 : vector<1x8xi32>
    %cst_1 = arith.constant 0.000000e+00 : f32
    %cst_2 = arith.constant -1.000000e+30 : f32
    %13 = vector.broadcast %cst_1 : f32 to vector<1x8xf32>
    %14 = vector.broadcast %cst_2 : f32 to vector<1x8xf32>
    %15 = arith.select %12, %13, %14 : vector<1x8xi1>, vector<1x8xf32>
    %c2_i32_3 = arith.constant 2 : i32
    %16 = arith.muli %arg0, %c2_i32_3 : i32
    %c1_i32 = arith.constant 1 : i32
    %17 = arith.addi %16, %c1_i32 : i32
    %18 = arith.index_cast %17 : i32 to index
    %19 = memref.load %arg1[%18] : memref<2xi32, #tpu.memory_space<smem>>
    %20 = vector.broadcast %19 : i32 to vector<1x8xi32>
    %21 = arith.cmpi slt, %6, %20 : vector<1x8xi32>
    %cst_4 = arith.constant 0.000000e+00 : f32
    %cst_5 = arith.constant -1.000000e+30 : f32
    %22 = vector.broadcast %cst_4 : f32 to vector<1x8xf32>
    %23 = vector.broadcast %cst_5 : f32 to vector<1x8xf32>
    %24 = arith.select %21, %22, %23 : vector<1x8xi1>, vector<1x8xf32>
    %25 = tpu.concatenate %15, %24 in 0 : vector<1x8xf32>, vector<1x8xf32> -> vector<2x8xf32>
    %26 = vector.shape_cast %5 : vector<8x8xf32> to vector<1x1x8x8xf32>
    %27 = vector.shape_cast %25 : vector<2x8xf32> to vector<2x1x1x8xf32>
    %28 = vector.broadcast %26 : vector<1x1x8x8xf32> to vector<2x1x8x8xf32>
    %29 = vector.broadcast %27 : vector<2x1x1x8xf32> to vector<2x1x8x8xf32>
    %30 = arith.addf %28, %29 : vector<2x1x8x8xf32>
    %c0 = arith.constant 0 : index
    %c0_6 = arith.constant 0 : index
    %31 = vector.load %arg2[%c0, %c0_6] : memref<16x4xf32, #tpu.memory_space<vmem>>, vector<16x4xf32>
    %c0_7 = arith.constant 0 : index
    %c0_8 = arith.constant 0 : index
    %32 = vector.load %arg3[%c0_7, %c0_8] : memref<4x32xf32, #tpu.memory_space<vmem>>, vector<4x32xf32>
    %cst_9 = arith.constant dense<0.000000e+00> : vector<16x32xf32>
    %33 = tpu.matmul %31, %32, %cst_9 {dimension_numbers = #tpu.dot_dimension_numbers<[1], [0], [0], [1], [0, 0, 1, 1], [], []>} : vector<16x4xf32>, vector<4x32xf32>, vector<16x32xf32> -> vector<16x32xf32>
    %c0_10 = arith.constant 0 : index
    %c0_11 = arith.constant 0 : index
    %34 = vector.load %arg4[%c0_10, %c0_11] : memref<1x32xf32, #tpu.memory_space<vmem>>, vector<1x32xf32>
    %35 = vector.broadcast %34 : vector<1x32xf32> to vector<16x32xf32>
    %36 = arith.addf %33, %35 : vector<16x32xf32>
    %c0_12 = arith.constant 0 : index
    %c0_13 = arith.constant 0 : index
    %c0_14 = arith.constant 0 : index
    %37 = vector.load %arg5[%c0_12, %c0_13, %c0_14] : memref<2x32x96xf32, #tpu.memory_space<vmem>>, vector<1x32x96xf32>
    %38 = vector.shape_cast %37 : vector<1x32x96xf32> to vector<32x96xf32>
    %cst_15 = arith.constant dense<0.000000e+00> : vector<16x96xf32>
    %39 = tpu.matmul %36, %38, %cst_15 {dimension_numbers = #tpu.dot_dimension_numbers<[1], [0], [0], [1], [0, 0, 1, 1], [], []>} : vector<16x32xf32>, vector<32x96xf32>, vector<16x96xf32> -> vector<16x96xf32>
    %c0_16 = arith.constant 0 : index
    %c0_17 = arith.constant 0 : index
    %c0_18 = arith.constant 0 : index
    %40 = vector.load %arg6[%c0_16, %c0_17, %c0_18] : memref<2x1x96xf32, #tpu.memory_space<vmem>>, vector<1x1x96xf32>
    %41 = vector.shape_cast %40 : vector<1x1x96xf32> to vector<1x96xf32>
    %42 = vector.broadcast %41 : vector<1x96xf32> to vector<16x96xf32>
    %43 = arith.addf %39, %42 : vector<16x96xf32>
    %44 = vector.extract_strided_slice %43 {offsets = [0, 0], sizes = [16, 32], strides = [1, 1]} : vector<16x96xf32> to vector<16x32xf32>
    %45 = vector.shape_cast %44 : vector<16x32xf32> to vector<2x8x4x8xf32>
    %46 = tpu.transpose %45, [0, 2, 1, 3] : vector<2x8x4x8xf32> -> vector<2x4x8x8xf32>
    %47 = vector.shape_cast %46 : vector<2x4x8x8xf32> to vector<8x8x8xf32>
    %48 = vector.extract_strided_slice %43 {offsets = [0, 32], sizes = [16, 32], strides = [1, 1]} : vector<16x96xf32> to vector<16x32xf32>
    %49 = vector.shape_cast %48 : vector<16x32xf32> to vector<2x8x4x8xf32>
    %50 = tpu.transpose %49, [0, 2, 1, 3] : vector<2x8x4x8xf32> -> vector<2x4x8x8xf32>
    %51 = vector.shape_cast %50 : vector<2x4x8x8xf32> to vector<8x8x8xf32>
    %52 = vector.extract_strided_slice %43 {offsets = [0, 64], sizes = [16, 32], strides = [1, 1]} : vector<16x96xf32> to vector<16x32xf32>
    %53 = vector.shape_cast %52 : vector<16x32xf32> to vector<2x8x4x8xf32>
    %54 = tpu.transpose %53, [0, 2, 1, 3] : vector<2x8x4x8xf32> -> vector<2x4x8x8xf32>
    %55 = vector.shape_cast %54 : vector<2x4x8x8xf32> to vector<8x8x8xf32>
    "tpu.trace_start"() <{level = 10 : i32, message = "bqe,bke->bqk"}> : () -> ()
    %cst_19 = arith.constant dense<0.000000e+00> : vector<8x8x8xf32>
    %56 = tpu.matmul %47, %51, %cst_19 {dimension_numbers = #tpu.dot_dimension_numbers<[2], [2], [1], [1], [0, 0, 0, 1, 1, 1], [0], [0]>} : vector<8x8x8xf32>, vector<8x8x8xf32>, vector<8x8x8xf32> -> vector<8x8x8xf32>
    "tpu.trace_stop"() : () -> ()
    %57 = vector.shape_cast %56 : vector<8x8x8xf32> to vector<2x4x8x8xf32>
    %58 = vector.broadcast %30 : vector<2x1x8x8xf32> to vector<2x4x8x8xf32>
    %59 = arith.addf %57, %58 : vector<2x4x8x8xf32>
    %cst_20 = arith.constant dense<0xFF800000> : vector<2x4x8xf32>
    %60 = vector.multi_reduction <maximumf>, %59, %cst_20 [3] : vector<2x4x8x8xf32> to vector<2x4x8xf32>
    %61 = vector.shape_cast %60 : vector<2x4x8xf32> to vector<2x4x8x1xf32>
    %62 = vector.broadcast %61 : vector<2x4x8x1xf32> to vector<2x4x8x8xf32>
    %63 = arith.subf %59, %62 : vector<2x4x8x8xf32>
    %64 = math.exp %63 : vector<2x4x8x8xf32>
    %cst_21 = arith.constant dense<0.000000e+00> : vector<2x4x8xf32>
    %65 = vector.multi_reduction <add>, %64, %cst_21 [3] : vector<2x4x8x8xf32> to vector<2x4x8xf32>
    %66 = vector.shape_cast %65 : vector<2x4x8xf32> to vector<2x4x8x1xf32>
    %67 = vector.shape_cast %64 : vector<2x4x8x8xf32> to vector<8x8x8xf32>
    "tpu.trace_start"() <{level = 10 : i32, message = "bqk,bke->bqe"}> : () -> ()
    %cst_22 = arith.constant dense<0.000000e+00> : vector<8x8x8xf32>
    %68 = tpu.matmul %67, %55, %cst_22 {dimension_numbers = #tpu.dot_dimension_numbers<[2], [1], [1], [2], [0, 0, 0, 1, 1, 2], [0], [0]>} : vector<8x8x8xf32>, vector<8x8x8xf32>, vector<8x8x8xf32> -> vector<8x8x8xf32>
    "tpu.trace_stop"() : () -> ()
    %69 = vector.shape_cast %66 : vector<2x4x8x1xf32> to vector<8x8x1xf32>
    %70 = vector.broadcast %69 : vector<8x8x1xf32> to vector<8x8x8xf32>
    %71 = arith.divf %68, %70 : vector<8x8x8xf32>
    %72 = vector.shape_cast %71 : vector<8x8x8xf32> to vector<2x4x8x8xf32>
    %73 = tpu.transpose %72, [0, 2, 1, 3] : vector<2x4x8x8xf32> -> vector<2x8x4x8xf32>
    %74 = vector.shape_cast %73 : vector<2x8x4x8xf32> to vector<16x32xf32>
    %c0_23 = arith.constant 0 : index
    %c0_24 = arith.constant 0 : index
    %c0_25 = arith.constant 0 : index
    %75 = vector.load %arg7[%c0_23, %c0_24, %c0_25] : memref<2x32x32xf32, #tpu.memory_space<vmem>>, vector<1x32x32xf32>
    %76 = vector.shape_cast %75 : vector<1x32x32xf32> to vector<32x32xf32>
    %cst_26 = arith.constant dense<0.000000e+00> : vector<16x32xf32>
    %77 = tpu.matmul %74, %76, %cst_26 {dimension_numbers = #tpu.dot_dimension_numbers<[1], [0], [0], [1], [0, 0, 1, 1], [], []>} : vector<16x32xf32>, vector<32x32xf32>, vector<16x32xf32> -> vector<16x32xf32>
    %c0_27 = arith.constant 0 : index
    %c0_28 = arith.constant 0 : index
    %c0_29 = arith.constant 0 : index
    %78 = vector.load %arg8[%c0_27, %c0_28, %c0_29] : memref<2x1x32xf32, #tpu.memory_space<vmem>>, vector<1x1x32xf32>
    %79 = vector.shape_cast %78 : vector<1x1x32xf32> to vector<1x32xf32>
    %80 = vector.broadcast %79 : vector<1x32xf32> to vector<16x32xf32>
    %81 = arith.addf %77, %80 : vector<16x32xf32>
    %82 = arith.addf %36, %81 : vector<16x32xf32>
    %c0_30 = arith.constant 0 : index
    %c0_31 = arith.constant 0 : index
    %c0_32 = arith.constant 0 : index
    %83 = vector.load %arg9[%c0_30, %c0_31, %c0_32] : memref<2x1x32xf32, #tpu.memory_space<vmem>>, vector<1x1x32xf32>
    %84 = vector.shape_cast %83 : vector<1x1x32xf32> to vector<1x32xf32>
    %c0_33 = arith.constant 0 : index
    %c0_34 = arith.constant 0 : index
    %c0_35 = arith.constant 0 : index
    %85 = vector.load %arg10[%c0_33, %c0_34, %c0_35] : memref<2x1x32xf32, #tpu.memory_space<vmem>>, vector<1x1x32xf32>
    %86 = vector.shape_cast %85 : vector<1x1x32xf32> to vector<1x32xf32>
    %cst_36 = arith.constant dense<0.000000e+00> : vector<16xf32>
    %87 = vector.multi_reduction <add>, %82, %cst_36 [1] : vector<16x32xf32> to vector<16xf32>
    %88 = vector.shape_cast %87 : vector<16xf32> to vector<16x1xf32>
    %cst_37 = arith.constant 3.200000e+01 : f32
    %89 = vector.broadcast %cst_37 : f32 to vector<16x1xf32>
    %90 = arith.divf %88, %89 : vector<16x1xf32>
    %91 = vector.broadcast %90 : vector<16x1xf32> to vector<16x32xf32>
    %92 = arith.subf %82, %91 : vector<16x32xf32>
    %93 = arith.mulf %92, %92 : vector<16x32xf32>
    %cst_38 = arith.constant dense<0.000000e+00> : vector<16xf32>
    %94 = vector.multi_reduction <add>, %93, %cst_38 [1] : vector<16x32xf32> to vector<16xf32>
    %95 = vector.shape_cast %94 : vector<16xf32> to vector<16x1xf32>
    %cst_39 = arith.constant 3.200000e+01 : f32
    %96 = vector.broadcast %cst_39 : f32 to vector<16x1xf32>
    %97 = arith.divf %95, %96 : vector<16x1xf32>
    %cst_40 = arith.constant 9.99999974E-6 : f32
    %98 = vector.broadcast %cst_40 : f32 to vector<16x1xf32>
    %99 = arith.addf %97, %98 : vector<16x1xf32>
    %100 = math.rsqrt %99 : vector<16x1xf32>
    %101 = vector.broadcast %100 : vector<16x1xf32> to vector<16x32xf32>
    %102 = arith.mulf %92, %101 : vector<16x32xf32>
    %103 = vector.broadcast %84 : vector<1x32xf32> to vector<16x32xf32>
    %104 = arith.mulf %102, %103 : vector<16x32xf32>
    %105 = vector.broadcast %86 : vector<1x32xf32> to vector<16x32xf32>
    %106 = arith.addf %104, %105 : vector<16x32xf32>
    %c0_41 = arith.constant 0 : index
    %c0_42 = arith.constant 0 : index
    %c0_43 = arith.constant 0 : index
    %107 = vector.load %arg11[%c0_41, %c0_42, %c0_43] : memref<2x32x32xf32, #tpu.memory_space<vmem>>, vector<1x32x32xf32>
    %108 = vector.shape_cast %107 : vector<1x32x32xf32> to vector<32x32xf32>
    %cst_44 = arith.constant dense<0.000000e+00> : vector<16x32xf32>
    %109 = tpu.matmul %106, %108, %cst_44 {dimension_numbers = #tpu.dot_dimension_numbers<[1], [0], [0], [1], [0, 0, 1, 1], [], []>} : vector<16x32xf32>, vector<32x32xf32>, vector<16x32xf32> -> vector<16x32xf32>
    %c0_45 = arith.constant 0 : index
    %c0_46 = arith.constant 0 : index
    %c0_47 = arith.constant 0 : index
    %110 = vector.load %arg12[%c0_45, %c0_46, %c0_47] : memref<2x1x32xf32, #tpu.memory_space<vmem>>, vector<1x1x32xf32>
    %111 = vector.shape_cast %110 : vector<1x1x32xf32> to vector<1x32xf32>
    %112 = vector.broadcast %111 : vector<1x32xf32> to vector<16x32xf32>
    %113 = arith.addf %109, %112 : vector<16x32xf32>
    %cst_48 = arith.constant 0.000000e+00 : f32
    %114 = vector.broadcast %cst_48 : f32 to vector<16x32xf32>
    %115 = arith.maximumf %113, %114 : vector<16x32xf32>
    %c0_49 = arith.constant 0 : index
    %c0_50 = arith.constant 0 : index
    %c0_51 = arith.constant 0 : index
    %116 = vector.load %arg13[%c0_49, %c0_50, %c0_51] : memref<2x32x32xf32, #tpu.memory_space<vmem>>, vector<1x32x32xf32>
    %117 = vector.shape_cast %116 : vector<1x32x32xf32> to vector<32x32xf32>
    %cst_52 = arith.constant dense<0.000000e+00> : vector<16x32xf32>
    %118 = tpu.matmul %115, %117, %cst_52 {dimension_numbers = #tpu.dot_dimension_numbers<[1], [0], [0], [1], [0, 0, 1, 1], [], []>} : vector<16x32xf32>, vector<32x32xf32>, vector<16x32xf32> -> vector<16x32xf32>
    %c0_53 = arith.constant 0 : index
    %c0_54 = arith.constant 0 : index
    %c0_55 = arith.constant 0 : index
    %119 = vector.load %arg14[%c0_53, %c0_54, %c0_55] : memref<2x1x32xf32, #tpu.memory_space<vmem>>, vector<1x1x32xf32>
    %120 = vector.shape_cast %119 : vector<1x1x32xf32> to vector<1x32xf32>
    %121 = vector.broadcast %120 : vector<1x32xf32> to vector<16x32xf32>
    %122 = arith.addf %118, %121 : vector<16x32xf32>
    %123 = arith.addf %106, %122 : vector<16x32xf32>
    %c0_56 = arith.constant 0 : index
    %c0_57 = arith.constant 0 : index
    %c0_58 = arith.constant 0 : index
    %124 = vector.load %arg15[%c0_56, %c0_57, %c0_58] : memref<2x1x32xf32, #tpu.memory_space<vmem>>, vector<1x1x32xf32>
    %125 = vector.shape_cast %124 : vector<1x1x32xf32> to vector<1x32xf32>
    %c0_59 = arith.constant 0 : index
    %c0_60 = arith.constant 0 : index
    %c0_61 = arith.constant 0 : index
    %126 = vector.load %arg16[%c0_59, %c0_60, %c0_61] : memref<2x1x32xf32, #tpu.memory_space<vmem>>, vector<1x1x32xf32>
    %127 = vector.shape_cast %126 : vector<1x1x32xf32> to vector<1x32xf32>
    %cst_62 = arith.constant dense<0.000000e+00> : vector<16xf32>
    %128 = vector.multi_reduction <add>, %123, %cst_62 [1] : vector<16x32xf32> to vector<16xf32>
    %129 = vector.shape_cast %128 : vector<16xf32> to vector<16x1xf32>
    %cst_63 = arith.constant 3.200000e+01 : f32
    %130 = vector.broadcast %cst_63 : f32 to vector<16x1xf32>
    %131 = arith.divf %129, %130 : vector<16x1xf32>
    %132 = vector.broadcast %131 : vector<16x1xf32> to vector<16x32xf32>
    %133 = arith.subf %123, %132 : vector<16x32xf32>
    %134 = arith.mulf %133, %133 : vector<16x32xf32>
    %cst_64 = arith.constant dense<0.000000e+00> : vector<16xf32>
    %135 = vector.multi_reduction <add>, %134, %cst_64 [1] : vector<16x32xf32> to vector<16xf32>
    %136 = vector.shape_cast %135 : vector<16xf32> to vector<16x1xf32>
    %cst_65 = arith.constant 3.200000e+01 : f32
    %137 = vector.broadcast %cst_65 : f32 to vector<16x1xf32>
    %138 = arith.divf %136, %137 : vector<16x1xf32>
    %cst_66 = arith.constant 9.99999974E-6 : f32
    %139 = vector.broadcast %cst_66 : f32 to vector<16x1xf32>
    %140 = arith.addf %138, %139 : vector<16x1xf32>
    %141 = math.rsqrt %140 : vector<16x1xf32>
    %142 = vector.broadcast %141 : vector<16x1xf32> to vector<16x32xf32>
    %143 = arith.mulf %133, %142 : vector<16x32xf32>
    %144 = vector.broadcast %125 : vector<1x32xf32> to vector<16x32xf32>
    %145 = arith.mulf %143, %144 : vector<16x32xf32>
    %146 = vector.broadcast %127 : vector<1x32xf32> to vector<16x32xf32>
    %147 = arith.addf %145, %146 : vector<16x32xf32>
    %c1 = arith.constant 1 : index
    %c0_67 = arith.constant 0 : index
    %c0_68 = arith.constant 0 : index
    %148 = vector.load %arg5[%c1, %c0_67, %c0_68] : memref<2x32x96xf32, #tpu.memory_space<vmem>>, vector<1x32x96xf32>
    %149 = vector.shape_cast %148 : vector<1x32x96xf32> to vector<32x96xf32>
    %cst_69 = arith.constant dense<0.000000e+00> : vector<16x96xf32>
    %150 = tpu.matmul %147, %149, %cst_69 {dimension_numbers = #tpu.dot_dimension_numbers<[1], [0], [0], [1], [0, 0, 1, 1], [], []>} : vector<16x32xf32>, vector<32x96xf32>, vector<16x96xf32> -> vector<16x96xf32>
    %c1_70 = arith.constant 1 : index
    %c0_71 = arith.constant 0 : index
    %c0_72 = arith.constant 0 : index
    %151 = vector.load %arg6[%c1_70, %c0_71, %c0_72] : memref<2x1x96xf32, #tpu.memory_space<vmem>>, vector<1x1x96xf32>
    %152 = vector.shape_cast %151 : vector<1x1x96xf32> to vector<1x96xf32>
    %153 = vector.broadcast %152 : vector<1x96xf32> to vector<16x96xf32>
    %154 = arith.addf %150, %153 : vector<16x96xf32>
    %155 = vector.extract_strided_slice %154 {offsets = [0, 0], sizes = [16, 32], strides = [1, 1]} : vector<16x96xf32> to vector<16x32xf32>
    %156 = vector.shape_cast %155 : vector<16x32xf32> to vector<2x8x4x8xf32>
    %157 = tpu.transpose %156, [0, 2, 1, 3] : vector<2x8x4x8xf32> -> vector<2x4x8x8xf32>
    %158 = vector.shape_cast %157 : vector<2x4x8x8xf32> to vector<8x8x8xf32>
    %159 = vector.extract_strided_slice %154 {offsets = [0, 32], sizes = [16, 32], strides = [1, 1]} : vector<16x96xf32> to vector<16x32xf32>
    %160 = vector.shape_cast %159 : vector<16x32xf32> to vector<2x8x4x8xf32>
    %161 = tpu.transpose %160, [0, 2, 1, 3] : vector<2x8x4x8xf32> -> vector<2x4x8x8xf32>
    %162 = vector.shape_cast %161 : vector<2x4x8x8xf32> to vector<8x8x8xf32>
    %163 = vector.extract_strided_slice %154 {offsets = [0, 64], sizes = [16, 32], strides = [1, 1]} : vector<16x96xf32> to vector<16x32xf32>
    %164 = vector.shape_cast %163 : vector<16x32xf32> to vector<2x8x4x8xf32>
    %165 = tpu.transpose %164, [0, 2, 1, 3] : vector<2x8x4x8xf32> -> vector<2x4x8x8xf32>
    %166 = vector.shape_cast %165 : vector<2x4x8x8xf32> to vector<8x8x8xf32>
    "tpu.trace_start"() <{level = 10 : i32, message = "bqe,bke->bqk"}> : () -> ()
    %cst_73 = arith.constant dense<0.000000e+00> : vector<8x8x8xf32>
    %167 = tpu.matmul %158, %162, %cst_73 {dimension_numbers = #tpu.dot_dimension_numbers<[2], [2], [1], [1], [0, 0, 0, 1, 1, 1], [0], [0]>} : vector<8x8x8xf32>, vector<8x8x8xf32>, vector<8x8x8xf32> -> vector<8x8x8xf32>
    "tpu.trace_stop"() : () -> ()
    %168 = vector.shape_cast %167 : vector<8x8x8xf32> to vector<2x4x8x8xf32>
    %169 = vector.broadcast %30 : vector<2x1x8x8xf32> to vector<2x4x8x8xf32>
    %170 = arith.addf %168, %169 : vector<2x4x8x8xf32>
    %cst_74 = arith.constant dense<0xFF800000> : vector<2x4x8xf32>
    %171 = vector.multi_reduction <maximumf>, %170, %cst_74 [3] : vector<2x4x8x8xf32> to vector<2x4x8xf32>
    %172 = vector.shape_cast %171 : vector<2x4x8xf32> to vector<2x4x8x1xf32>
    %173 = vector.broadcast %172 : vector<2x4x8x1xf32> to vector<2x4x8x8xf32>
    %174 = arith.subf %170, %173 : vector<2x4x8x8xf32>
    %175 = math.exp %174 : vector<2x4x8x8xf32>
    %cst_75 = arith.constant dense<0.000000e+00> : vector<2x4x8xf32>
    %176 = vector.multi_reduction <add>, %175, %cst_75 [3] : vector<2x4x8x8xf32> to vector<2x4x8xf32>
    %177 = vector.shape_cast %176 : vector<2x4x8xf32> to vector<2x4x8x1xf32>
    %178 = vector.shape_cast %175 : vector<2x4x8x8xf32> to vector<8x8x8xf32>
    "tpu.trace_start"() <{level = 10 : i32, message = "bqk,bke->bqe"}> : () -> ()
    %cst_76 = arith.constant dense<0.000000e+00> : vector<8x8x8xf32>
    %179 = tpu.matmul %178, %166, %cst_76 {dimension_numbers = #tpu.dot_dimension_numbers<[2], [1], [1], [2], [0, 0, 0, 1, 1, 2], [0], [0]>} : vector<8x8x8xf32>, vector<8x8x8xf32>, vector<8x8x8xf32> -> vector<8x8x8xf32>
    "tpu.trace_stop"() : () -> ()
    %180 = vector.shape_cast %177 : vector<2x4x8x1xf32> to vector<8x8x1xf32>
    %181 = vector.broadcast %180 : vector<8x8x1xf32> to vector<8x8x8xf32>
    %182 = arith.divf %179, %181 : vector<8x8x8xf32>
    %183 = vector.shape_cast %182 : vector<8x8x8xf32> to vector<2x4x8x8xf32>
    %184 = tpu.transpose %183, [0, 2, 1, 3] : vector<2x4x8x8xf32> -> vector<2x8x4x8xf32>
    %185 = vector.shape_cast %184 : vector<2x8x4x8xf32> to vector<16x32xf32>
    %c1_77 = arith.constant 1 : index
    %c0_78 = arith.constant 0 : index
    %c0_79 = arith.constant 0 : index
    %186 = vector.load %arg7[%c1_77, %c0_78, %c0_79] : memref<2x32x32xf32, #tpu.memory_space<vmem>>, vector<1x32x32xf32>
    %187 = vector.shape_cast %186 : vector<1x32x32xf32> to vector<32x32xf32>
    %cst_80 = arith.constant dense<0.000000e+00> : vector<16x32xf32>
    %188 = tpu.matmul %185, %187, %cst_80 {dimension_numbers = #tpu.dot_dimension_numbers<[1], [0], [0], [1], [0, 0, 1, 1], [], []>} : vector<16x32xf32>, vector<32x32xf32>, vector<16x32xf32> -> vector<16x32xf32>
    %c1_81 = arith.constant 1 : index
    %c0_82 = arith.constant 0 : index
    %c0_83 = arith.constant 0 : index
    %189 = vector.load %arg8[%c1_81, %c0_82, %c0_83] : memref<2x1x32xf32, #tpu.memory_space<vmem>>, vector<1x1x32xf32>
    %190 = vector.shape_cast %189 : vector<1x1x32xf32> to vector<1x32xf32>
    %191 = vector.broadcast %190 : vector<1x32xf32> to vector<16x32xf32>
    %192 = arith.addf %188, %191 : vector<16x32xf32>
    %193 = arith.addf %147, %192 : vector<16x32xf32>
    %c1_84 = arith.constant 1 : index
    %c0_85 = arith.constant 0 : index
    %c0_86 = arith.constant 0 : index
    %194 = vector.load %arg9[%c1_84, %c0_85, %c0_86] : memref<2x1x32xf32, #tpu.memory_space<vmem>>, vector<1x1x32xf32>
    %195 = vector.shape_cast %194 : vector<1x1x32xf32> to vector<1x32xf32>
    %c1_87 = arith.constant 1 : index
    %c0_88 = arith.constant 0 : index
    %c0_89 = arith.constant 0 : index
    %196 = vector.load %arg10[%c1_87, %c0_88, %c0_89] : memref<2x1x32xf32, #tpu.memory_space<vmem>>, vector<1x1x32xf32>
    %197 = vector.shape_cast %196 : vector<1x1x32xf32> to vector<1x32xf32>
    %cst_90 = arith.constant dense<0.000000e+00> : vector<16xf32>
    %198 = vector.multi_reduction <add>, %193, %cst_90 [1] : vector<16x32xf32> to vector<16xf32>
    %199 = vector.shape_cast %198 : vector<16xf32> to vector<16x1xf32>
    %cst_91 = arith.constant 3.200000e+01 : f32
    %200 = vector.broadcast %cst_91 : f32 to vector<16x1xf32>
    %201 = arith.divf %199, %200 : vector<16x1xf32>
    %202 = vector.broadcast %201 : vector<16x1xf32> to vector<16x32xf32>
    %203 = arith.subf %193, %202 : vector<16x32xf32>
    %204 = arith.mulf %203, %203 : vector<16x32xf32>
    %cst_92 = arith.constant dense<0.000000e+00> : vector<16xf32>
    %205 = vector.multi_reduction <add>, %204, %cst_92 [1] : vector<16x32xf32> to vector<16xf32>
    %206 = vector.shape_cast %205 : vector<16xf32> to vector<16x1xf32>
    %cst_93 = arith.constant 3.200000e+01 : f32
    %207 = vector.broadcast %cst_93 : f32 to vector<16x1xf32>
    %208 = arith.divf %206, %207 : vector<16x1xf32>
    %cst_94 = arith.constant 9.99999974E-6 : f32
    %209 = vector.broadcast %cst_94 : f32 to vector<16x1xf32>
    %210 = arith.addf %208, %209 : vector<16x1xf32>
    %211 = math.rsqrt %210 : vector<16x1xf32>
    %212 = vector.broadcast %211 : vector<16x1xf32> to vector<16x32xf32>
    %213 = arith.mulf %203, %212 : vector<16x32xf32>
    %214 = vector.broadcast %195 : vector<1x32xf32> to vector<16x32xf32>
    %215 = arith.mulf %213, %214 : vector<16x32xf32>
    %216 = vector.broadcast %197 : vector<1x32xf32> to vector<16x32xf32>
    %217 = arith.addf %215, %216 : vector<16x32xf32>
    %c1_95 = arith.constant 1 : index
    %c0_96 = arith.constant 0 : index
    %c0_97 = arith.constant 0 : index
    %218 = vector.load %arg11[%c1_95, %c0_96, %c0_97] : memref<2x32x32xf32, #tpu.memory_space<vmem>>, vector<1x32x32xf32>
    %219 = vector.shape_cast %218 : vector<1x32x32xf32> to vector<32x32xf32>
    %cst_98 = arith.constant dense<0.000000e+00> : vector<16x32xf32>
    %220 = tpu.matmul %217, %219, %cst_98 {dimension_numbers = #tpu.dot_dimension_numbers<[1], [0], [0], [1], [0, 0, 1, 1], [], []>} : vector<16x32xf32>, vector<32x32xf32>, vector<16x32xf32> -> vector<16x32xf32>
    %c1_99 = arith.constant 1 : index
    %c0_100 = arith.constant 0 : index
    %c0_101 = arith.constant 0 : index
    %221 = vector.load %arg12[%c1_99, %c0_100, %c0_101] : memref<2x1x32xf32, #tpu.memory_space<vmem>>, vector<1x1x32xf32>
    %222 = vector.shape_cast %221 : vector<1x1x32xf32> to vector<1x32xf32>
    %223 = vector.broadcast %222 : vector<1x32xf32> to vector<16x32xf32>
    %224 = arith.addf %220, %223 : vector<16x32xf32>
    %cst_102 = arith.constant 0.000000e+00 : f32
    %225 = vector.broadcast %cst_102 : f32 to vector<16x32xf32>
    %226 = arith.maximumf %224, %225 : vector<16x32xf32>
    %c1_103 = arith.constant 1 : index
    %c0_104 = arith.constant 0 : index
    %c0_105 = arith.constant 0 : index
    %227 = vector.load %arg13[%c1_103, %c0_104, %c0_105] : memref<2x32x32xf32, #tpu.memory_space<vmem>>, vector<1x32x32xf32>
    %228 = vector.shape_cast %227 : vector<1x32x32xf32> to vector<32x32xf32>
    %cst_106 = arith.constant dense<0.000000e+00> : vector<16x32xf32>
    %229 = tpu.matmul %226, %228, %cst_106 {dimension_numbers = #tpu.dot_dimension_numbers<[1], [0], [0], [1], [0, 0, 1, 1], [], []>} : vector<16x32xf32>, vector<32x32xf32>, vector<16x32xf32> -> vector<16x32xf32>
    %c1_107 = arith.constant 1 : index
    %c0_108 = arith.constant 0 : index
    %c0_109 = arith.constant 0 : index
    %230 = vector.load %arg14[%c1_107, %c0_108, %c0_109] : memref<2x1x32xf32, #tpu.memory_space<vmem>>, vector<1x1x32xf32>
    %231 = vector.shape_cast %230 : vector<1x1x32xf32> to vector<1x32xf32>
    %232 = vector.broadcast %231 : vector<1x32xf32> to vector<16x32xf32>
    %233 = arith.addf %229, %232 : vector<16x32xf32>
    %234 = arith.addf %217, %233 : vector<16x32xf32>
    %c1_110 = arith.constant 1 : index
    %c0_111 = arith.constant 0 : index
    %c0_112 = arith.constant 0 : index
    %235 = vector.load %arg15[%c1_110, %c0_111, %c0_112] : memref<2x1x32xf32, #tpu.memory_space<vmem>>, vector<1x1x32xf32>
    %236 = vector.shape_cast %235 : vector<1x1x32xf32> to vector<1x32xf32>
    %c1_113 = arith.constant 1 : index
    %c0_114 = arith.constant 0 : index
    %c0_115 = arith.constant 0 : index
    %237 = vector.load %arg16[%c1_113, %c0_114, %c0_115] : memref<2x1x32xf32, #tpu.memory_space<vmem>>, vector<1x1x32xf32>
    %238 = vector.shape_cast %237 : vector<1x1x32xf32> to vector<1x32xf32>
    %cst_116 = arith.constant dense<0.000000e+00> : vector<16xf32>
    %239 = vector.multi_reduction <add>, %234, %cst_116 [1] : vector<16x32xf32> to vector<16xf32>
    %240 = vector.shape_cast %239 : vector<16xf32> to vector<16x1xf32>
    %cst_117 = arith.constant 3.200000e+01 : f32
    %241 = vector.broadcast %cst_117 : f32 to vector<16x1xf32>
    %242 = arith.divf %240, %241 : vector<16x1xf32>
    %243 = vector.broadcast %242 : vector<16x1xf32> to vector<16x32xf32>
    %244 = arith.subf %234, %243 : vector<16x32xf32>
    %245 = arith.mulf %244, %244 : vector<16x32xf32>
    %cst_118 = arith.constant dense<0.000000e+00> : vector<16xf32>
    %246 = vector.multi_reduction <add>, %245, %cst_118 [1] : vector<16x32xf32> to vector<16xf32>
    %247 = vector.shape_cast %246 : vector<16xf32> to vector<16x1xf32>
    %cst_119 = arith.constant 3.200000e+01 : f32
    %248 = vector.broadcast %cst_119 : f32 to vector<16x1xf32>
    %249 = arith.divf %247, %248 : vector<16x1xf32>
    %cst_120 = arith.constant 9.99999974E-6 : f32
    %250 = vector.broadcast %cst_120 : f32 to vector<16x1xf32>
    %251 = arith.addf %249, %250 : vector<16x1xf32>
    %252 = math.rsqrt %251 : vector<16x1xf32>
    %253 = vector.broadcast %252 : vector<16x1xf32> to vector<16x32xf32>
    %254 = arith.mulf %244, %253 : vector<16x32xf32>
    %255 = vector.broadcast %236 : vector<1x32xf32> to vector<16x32xf32>
    %256 = arith.mulf %254, %255 : vector<16x32xf32>
    %257 = vector.broadcast %238 : vector<1x32xf32> to vector<16x32xf32>
    %258 = arith.addf %256, %257 : vector<16x32xf32>
    %c0_121 = arith.constant 0 : index
    %c0_122 = arith.constant 0 : index
    %259 = vector.load %arg20[%c0_121, %c0_122] : memref<16x32xf32, #tpu.memory_space<vmem>>, vector<16x32xf32>
    tpu.vector_store %arg20[%c0_121, %c0_122], %258 {strides = array<i32>} : memref<16x32xf32, #tpu.memory_space<vmem>>, vector<16x32xf32>,
    %c0_123 = arith.constant 0 : index
    %c0_124 = arith.constant 0 : index
    %260 = vector.load %arg17[%c0_123, %c0_124] : memref<32x4xf32, #tpu.memory_space<vmem>>, vector<32x4xf32>
    %cst_125 = arith.constant dense<0.000000e+00> : vector<16x4xf32>
    %261 = tpu.matmul %258, %260, %cst_125 {dimension_numbers = #tpu.dot_dimension_numbers<[1], [0], [0], [1], [0, 0, 1, 1], [], []>} : vector<16x32xf32>, vector<32x4xf32>, vector<16x4xf32> -> vector<16x4xf32>
    %c0_126 = arith.constant 0 : index
    %c0_127 = arith.constant 0 : index
    %262 = vector.load %arg18[%c0_126, %c0_127] : memref<1x4xf32, #tpu.memory_space<vmem>>, vector<1x4xf32>
    %263 = vector.broadcast %262 : vector<1x4xf32> to vector<16x4xf32>
    %264 = arith.addf %261, %263 : vector<16x4xf32>
    %c0_128 = arith.constant 0 : index
    %c0_129 = arith.constant 0 : index
    %265 = vector.load %arg19[%c0_128, %c0_129] : memref<16x4xf32, #tpu.memory_space<vmem>>, vector<16x4xf32>
    tpu.vector_store %arg19[%c0_128, %c0_129], %264 {strides = array<i32>} : memref<16x4xf32, #tpu.memory_space<vmem>>, vector<16x4xf32>,
    return
  }
  func.func @transform_0(%arg0: i32, %arg1: memref<2xi32, #tpu.memory_space<smem>>) -> (i32, i32) {
    %c0_i32 = arith.constant 0 : i32
    %c0_i32_0 = arith.constant 0 : i32
    return %arg0, %c0_i32 : i32, i32
  }
  func.func @transform_1(%arg0: i32, %arg1: memref<2xi32, #tpu.memory_space<smem>>) -> (i32, i32) {
    %c0_i32 = arith.constant 0 : i32
    %c0_i32_0 = arith.constant 0 : i32
    %c0_i32_1 = arith.constant 0 : i32
    return %c0_i32, %c0_i32_0 : i32, i32
  }
  func.func @transform_2(%arg0: i32, %arg1: memref<2xi32, #tpu.memory_space<smem>>) -> (i32, i32) {
    %c0_i32 = arith.constant 0 : i32
    %c0_i32_0 = arith.constant 0 : i32
    %c0_i32_1 = arith.constant 0 : i32
    return %c0_i32, %c0_i32_0 : i32, i32
  }
  func.func @transform_3(%arg0: i32, %arg1: memref<2xi32, #tpu.memory_space<smem>>) -> (i32, i32, i32) {
    %c0_i32 = arith.constant 0 : i32
    %c0_i32_0 = arith.constant 0 : i32
    %c0_i32_1 = arith.constant 0 : i32
    %c0_i32_2 = arith.constant 0 : i32
    return %c0_i32, %c0_i32_0, %c0_i32_1 : i32, i32, i32
  }
  func.func @transform_4(%arg0: i32, %arg1: memref<2xi32, #tpu.memory_space<smem>>) -> (i32, i32, i32) {
    %c0_i32 = arith.constant 0 : i32
    %c0_i32_0 = arith.constant 0 : i32
    %c0_i32_1 = arith.constant 0 : i32
    %c0_i32_2 = arith.constant 0 : i32
    return %c0_i32, %c0_i32_0, %c0_i32_1 : i32, i32, i32
  }
  func.func @transform_5(%arg0: i32, %arg1: memref<2xi32, #tpu.memory_space<smem>>) -> (i32, i32, i32) {
    %c0_i32 = arith.constant 0 : i32
    %c0_i32_0 = arith.constant 0 : i32
    %c0_i32_1 = arith.constant 0 : i32
    %c0_i32_2 = arith.constant 0 : i32
    return %c0_i32, %c0_i32_0, %c0_i32_1 : i32, i32, i32
  }
  func.func @transform_6(%arg0: i32, %arg1: memref<2xi32, #tpu.memory_space<smem>>) -> (i32, i32, i32) {
    %c0_i32 = arith.constant 0 : i32
    %c0_i32_0 = arith.constant 0 : i32
    %c0_i32_1 = arith.constant 0 : i32
    %c0_i32_2 = arith.constant 0 : i32
    return %c0_i32, %c0_i32_0, %c0_i32_1 : i32, i32, i32
  }
  func.func @transform_7(%arg0: i32, %arg1: memref<2xi32, #tpu.memory_space<smem>>) -> (i32, i32, i32) {
    %c0_i32 = arith.constant 0 : i32
    %c0_i32_0 = arith.constant 0 : i32
    %c0_i32_1 = arith.constant 0 : i32
    %c0_i32_2 = arith.constant 0 : i32
    return %c0_i32, %c0_i32_0, %c0_i32_1 : i32, i32, i32
  }
  func.func @transform_8(%arg0: i32, %arg1: memref<2xi32, #tpu.memory_space<smem>>) -> (i32, i32, i32) {
    %c0_i32 = arith.constant 0 : i32
    %c0_i32_0 = arith.constant 0 : i32
    %c0_i32_1 = arith.constant 0 : i32
    %c0_i32_2 = arith.constant 0 : i32
    return %c0_i32, %c0_i32_0, %c0_i32_1 : i32, i32, i32
  }
  func.func @transform_9(%arg0: i32, %arg1: memref<2xi32, #tpu.memory_space<smem>>) -> (i32, i32, i32) {
    %c0_i32 = arith.constant 0 : i32
    %c0_i32_0 = arith.constant 0 : i32
    %c0_i32_1 = arith.constant 0 : i32
    %c0_i32_2 = arith.constant 0 : i32
    return %c0_i32, %c0_i32_0, %c0_i32_1 : i32, i32, i32
  }
  func.func @transform_10(%arg0: i32, %arg1: memref<2xi32, #tpu.memory_space<smem>>) -> (i32, i32, i32) {
    %c0_i32 = arith.constant 0 : i32
    %c0_i32_0 = arith.constant 0 : i32
    %c0_i32_1 = arith.constant 0 : i32
    %c0_i32_2 = arith.constant 0 : i32
    return %c0_i32, %c0_i32_0, %c0_i32_1 : i32, i32, i32
  }
  func.func @transform_11(%arg0: i32, %arg1: memref<2xi32, #tpu.memory_space<smem>>) -> (i32, i32, i32) {
    %c0_i32 = arith.constant 0 : i32
    %c0_i32_0 = arith.constant 0 : i32
    %c0_i32_1 = arith.constant 0 : i32
    %c0_i32_2 = arith.constant 0 : i32
    return %c0_i32, %c0_i32_0, %c0_i32_1 : i32, i32, i32
  }
  func.func @transform_12(%arg0: i32, %arg1: memref<2xi32, #tpu.memory_space<smem>>) -> (i32, i32, i32) {
    %c0_i32 = arith.constant 0 : i32
    %c0_i32_0 = arith.constant 0 : i32
    %c0_i32_1 = arith.constant 0 : i32
    %c0_i32_2 = arith.constant 0 : i32
    return %c0_i32, %c0_i32_0, %c0_i32_1 : i32, i32, i32
  }
  func.func @transform_13(%arg0: i32, %arg1: memref<2xi32, #tpu.memory_space<smem>>) -> (i32, i32, i32) {
    %c0_i32 = arith.constant 0 : i32
    %c0_i32_0 = arith.constant 0 : i32
    %c0_i32_1 = arith.constant 0 : i32
    %c0_i32_2 = arith.constant 0 : i32
    return %c0_i32, %c0_i32_0, %c0_i32_1 : i32, i32, i32
  }
  func.func @transform_14(%arg0: i32, %arg1: memref<2xi32, #tpu.memory_space<smem>>) -> (i32, i32, i32) {
    %c0_i32 = arith.constant 0 : i32
    %c0_i32_0 = arith.constant 0 : i32
    %c0_i32_1 = arith.constant 0 : i32
    %c0_i32_2 = arith.constant 0 : i32
    return %c0_i32, %c0_i32_0, %c0_i32_1 : i32, i32, i32
  }
  func.func @transform_15(%arg0: i32, %arg1: memref<2xi32, #tpu.memory_space<smem>>) -> (i32, i32) {
    %c0_i32 = arith.constant 0 : i32
    %c0_i32_0 = arith.constant 0 : i32
    %c0_i32_1 = arith.constant 0 : i32
    return %c0_i32, %c0_i32_0 : i32, i32
  }
  func.func @transform_16(%arg0: i32, %arg1: memref<2xi32, #tpu.memory_space<smem>>) -> (i32, i32) {
    %c0_i32 = arith.constant 0 : i32
    %c0_i32_0 = arith.constant 0 : i32
    %c0_i32_1 = arith.constant 0 : i32
    return %c0_i32, %c0_i32_0 : i32, i32
  }
  func.func @transform_17(%arg0: i32, %arg1: memref<2xi32, #tpu.memory_space<smem>>) -> (i32, i32) {
    %c0_i32 = arith.constant 0 : i32
    %c0_i32_0 = arith.constant 0 : i32
    return %arg0, %c0_i32 : i32, i32
  }
  func.func @transform_18(%arg0: i32, %arg1: memref<2xi32, #tpu.memory_space<smem>>) -> (i32, i32) {
    %c0_i32 = arith.constant 0 : i32
    %c0_i32_0 = arith.constant 0 : i32
    return %arg0, %c0_i32 : i32, i32
  }
}

</mosaic_0001>

<bundles_post_ra>
// kernel: tpu_custom_call.1
= control target key start
LH: loop header
LB: loop body
LE: loop exit
PB: predicated region body
PF: predicated region fallthrough
CT: control target
= control target key end

     0   :  { %s8218_s0 = inlined_call_operand.hbm [shape: s32[2], index: 0, kind: input, shape index: {}]   ;;  %s8219_s1 = inlined_call_operand.vmem [shape: f32[16,4], index: 1, kind: input, shape index: {}]   ;;  %s8220_s2 = inlined_call_operand.vmem [shape: f32[4,32], index: 2, kind: input, shape index: {}]   ;;  %s8221_s3 = inlined_call_operand.hbm [shape: f32[1,32], index: 3, kind: input, shape index: {}]   ;;  %s8222_s4 = inlined_call_operand.vmem [shape: f32[2,32,96], index: 4, kind: input, shape index: {}]   ;;  %s8223_s5 = inlined_call_operand.vmem [shape: f32[2,1,96], index: 5, kind: input, shape index: {}]   ;;  %s8224_s6 = inlined_call_operand.hbm [shape: f32[2,32,32], index: 6, kind: input, shape index: {}]   ;;  %s8225_s7 = inlined_call_operand.vmem [shape: f32[2,1,32], index: 7, kind: input, shape index: {}]   ;;  %s8226_s8 = inlined_call_operand.vmem [shape: f32[2,1,32], index: 8, kind: input, shape index: {}]   ;;  %s8227_s9 = inlined_call_operand.vmem [shape: f32[2,1,32], index: 9, kind: input, shape index: {}]   ;;  %s8228_s10 = inlined_call_operand.hbm [shape: f32[2,32,32], index: 10, kind: input, shape index: {}]   ;;  %s8229_s11 = inlined_call_operand.vmem [shape: f32[2,1,32], index: 11, kind: input, shape index: {}]   ;;  %s8230_s12 = inlined_call_operand.hbm [shape: f32[2,32,32], index: 12, kind: input, shape index: {}]   ;;  %s8231_s13 = inlined_call_operand.vmem [shape: f32[2,1,32], index: 13, kind: input, shape index: {}]   ;;  %s8232_s14 = inlined_call_operand.vmem [shape: f32[2,1,32], index: 14, kind: input, shape index: {}]   ;;  %s8233_s15 = inlined_call_operand.vmem [shape: f32[2,1,32], index: 15, kind: input, shape index: {}]   ;;  %s8234_s16 = inlined_call_operand.vmem [shape: f32[32,4], index: 16, kind: input, shape index: {}]   ;;  %s8235_s17 = inlined_call_operand.vmem [shape: f32[1,4], index: 17, kind: input, shape index: {}]   ;;  %s8236_s18 = inlined_call_operand.vmem [shape: f32[16,4], index: 18, kind: output, shape index: {0}]   ;;  %s8237_s19 = inlined_call_operand.hbm [shape: f32[16,32], index: 19, kind: output, shape index: {1}]  }
   0x1   :  { %8243 = sst [smem:[#allocation18_spill]] %s8218_s0 }
   0x2   :  { %8244 = sst [smem:[#allocation19_spill]] %s8219_s1  ;;  %s8249_s20 = sld [smem:[#allocation18_spill]] }
   0x3   :  { %8245 = sst [smem:[#allocation20_spill]] %s8220_s2 }
   0x4   :  { %8246 = sst [smem:[#allocation21_spill]] %s8221_s3 }
   0x5   :  { %8247 = sst [smem:[#allocation22_spill]] %s8231_s13 }
   0x6   :  { %8248 = sst [smem:[#allocation23_spill]] %s8236_s18 }
   0x8   :  { %s6964_s13 = scalar_lea.hbm %s8249_s20, 16 }
   0x9   :  { %p6965_p0 = scmp.ne.s32.totalorder %s8249_s20, %s6964_s13  ;;  %p6968_p1 = scmp.lt.u32.totalorder %s6964_s13, %s8249_s20 }
   0xb   :  { %p6970_p2 = pnand %p6968_p1, %p6965_p0 }
   0xd   :  { %6973 = shalt.err (!%p6970_p2)  }
   0xe   :  { %s7094_s23 = smov [#allocation3]  }
   0xf   :  { %26 = dma.hbm_to_smem %s8249_s20, 16, %s7094_s23, [#allocation2] }
  0x10   :  { %7084 = dma.done.wait [#allocation2], 16 }
  0x11   :  { %7085 = vsyncadd [#allocation2], 4294967280 }
  0x12   :  { %28 = sfence }
  0x13   :  { %29 = vsyncpa [#allocation5], 0 }
  0x14   :  { %30 = vsyncpa [#allocation8], 0 }
  0x15   :  { %31 = vsyncpa [#allocation11], 0 }
  0x16   :  { %32 = vsyncpa [#allocation6], 0  ;;  %s7095_s3 = smov [#allocation7]   ;;  %s6974_s13 = scalar_lea.hbm %s8224_s6, 1024 }
  0x17   :  { %s56_s26 = sshll.u32 %s7095_s3, 4  ;;  %p6975_p3 = scmp.ne.s32.totalorder %s8224_s6, %s6974_s13  ;;  %s57_s26 = int_to_ptr.vmem [resolvable:$true] %s56_s26 }
  0x18   :  { %p6978_p4 = scmp.lt.u32.totalorder %s6974_s13, %s8224_s6 }
  0x1a   :  { %p6980_p5 = pnand %p6978_p4, %p6975_p3 }
  0x1c   :  { %6983 = shalt.err (!%p6980_p5)
}
  0x1d   :  { %s6984_s21 = scalar_lea.vmem %s57_s26, 1024  ;;  %p6989_p7 = scmp.lt.s32.totalorder %s57_s26, %s57_s26 }
  0x1e   :  { %p6985_p6 = scmp.ne.s32.totalorder %s57_s26, %s6984_s21  ;;  %p6990_p8 = scmp.lt.s32.totalorder %s6984_s21, %s6984_s21 }
  0x20   :  { %p6991_p9 = por %p6990_p8, %p6989_p7 }
  0x22   :  { %p6992_p10 = pnand %p6991_p9, %p6985_p6 }
  0x24   :  { %6995 = shalt.err (!%p6992_p10)
}
  0x25   :  { %s7096_s1 = smov 128   ;;  %s7097_s22 = smov 8  }
  0x26   :  { %62 = dma.hbm_to_vmem [thread:$0]  %s8224_s6, 1024, %s57_s26, [#allocation8], %s7096_s1, %s7096_s1, %s7097_s22  }
  0x27   :  { %s7098_s24 = smov [#allocation4]   ;;  %s7099_s3 = smov [#allocation9]  }
  0x28   :  { %s43_s25 = sshll.u32 %s7098_s24, 4  ;;  %s74_s27 = sshll.u32 %s7099_s3, 4  ;;  %s44_s25 = int_to_ptr.vmem [resolvable:$true] %s43_s25  ;;  %s75_s27 = int_to_ptr.vmem [resolvable:$true] %s74_s27 }
  0x29   :  { %s8250_s29 = sld [smem:[#allocation21_spill]] }
  0x2f   :  { %s6996_s0 = scalar_lea.hbm %s8250_s29, 16 }
  0x30   :  { %p6997_p11 = scmp.ne.s32.totalorder %s8250_s29, %s6996_s0  ;;  %p7000_p12 = scmp.lt.u32.totalorder %s6996_s0, %s8250_s29 }
  0x32   :  { %p7002_p13 = pnand %p7000_p12, %p6997_p11 }
  0x34   :  { %7005 = shalt.err (!%p7002_p13)
}
  0x35   :  { %s7006_s6 = scalar_lea.vmem %s44_s25, 16  ;;  %s7010_s26 = scalar_lea.vmem %s44_s25, 32 }
  0x36   :  { %p7007_p0 = scmp.ne.s32.totalorder %s44_s25, %s7006_s6  ;;  %p7011_p1 = scmp.lt.s32.totalorder %s44_s25, %s44_s25 }
  0x37   :  { %p7012_p2 = scmp.lt.s32.totalorder %s7010_s26, %s7006_s6 }
  0x39   :  { %p7013_p3 = por %p7012_p2, %p7011_p1 }
  0x3b   :  { %p7014_p4 = pnand %p7013_p3, %p7007_p0 }
  0x3d   :  { %7017 = shalt.err (!%p7014_p4)
}
  0x3e   :  { %46 = dma.hbm_to_vmem [thread:$0]  %s8250_s29, 16, %s44_s25, [#allocation5]  }
  0x3f   :  { %s7018_s18 = scalar_lea.hbm %s8228_s10, 1024 }
  0x40   :  { %p7019_p5 = scmp.ne.s32.totalorder %s8228_s10, %s7018_s18  ;;  %p7022_p6 = scmp.lt.u32.totalorder %s7018_s18, %s8228_s10 }
  0x42   :  { %p7024_p7 = pnand %p7022_p6, %p7019_p5 }
  0x44   :  { %7027 = shalt.err (!%p7024_p7)
}
  0x45   :  { %s7028_s20 = scalar_lea.vmem %s75_s27, 1024  ;;  %p7033_p9 = scmp.lt.s32.totalorder %s75_s27, %s75_s27 }
  0x46   :  { %p7029_p8 = scmp.ne.s32.totalorder %s75_s27, %s7028_s20  ;;  %p7034_p10 = scmp.lt.s32.totalorder %s7028_s20, %s7028_s20 }
  0x48   :  { %p7035_p11 = por %p7034_p10, %p7033_p9 }
  0x4a   :  { %p7036_p12 = pnand %p7035_p11, %p7029_p8 }
  0x4c   :  { %7039 = shalt.err (!%p7036_p12)
}
  0x4d   :  { %80 = dma.hbm_to_vmem [thread:$0]  %s8228_s10, 1024, %s75_s27, [#allocation8], %s7096_s1, %s7096_s1, %s7097_s22  }
  0x4e   :  { %s7100_s21 = smov [#allocation10]   ;;  %s7040_s23 = scalar_lea.hbm %s8230_s12, 1024 }
  0x4f   :  { %s88_s6 = sshll.u32 %s7100_s21, 4  ;;  %p7041_p13 = scmp.ne.s32.totalorder %s8230_s12, %s7040_s23  ;;  %s89_s6 = int_to_ptr.vmem [resolvable:$true] %s88_s6 }
  0x50   :  { %p7044_p0 = scmp.lt.u32.totalorder %s7040_s23, %s8230_s12 }
  0x52   :  { %p7046_p1 = pnand %p7044_p0, %p7041_p13 }
  0x54   :  { %7049 = shalt.err (!%p7046_p1)
}
  0x55   :  { %s7050_s13 = scalar_lea.vmem %s89_s6, 1024  ;;  %p7055_p3 = scmp.lt.s32.totalorder %s89_s6, %s89_s6 }
  0x56   :  { %p7051_p2 = scmp.ne.s32.totalorder %s89_s6, %s7050_s13  ;;  %p7056_p4 = scmp.lt.s32.totalorder %s7050_s13, %s7050_s13 }
  0x58   :  { %p7057_p5 = por %p7056_p4, %p7055_p3 }
  0x5a   :  { %p7058_p6 = pnand %p7057_p5, %p7051_p2 }
  0x5c   :  { %7061 = shalt.err (!%p7058_p6)
}
  0x5d   :  { %94 = dma.hbm_to_vmem [thread:$0]  %s8230_s12, 1024, %s89_s6, [#allocation11], %s7096_s1, %s7096_s1, %s7097_s22  }
  0x5e   :  { %7086 = dma.done.wait [#allocation5], 16  }
  0x5f   :  { %7087 = vsyncadd [#allocation5], 4294967280 }
  0x60   :  { %7088 = dma.done.wait [#allocation8], 2048  }
  0x61   :  { %7089 = vsyncadd [#allocation8], 4294965248 }
  0x62   :  { %7090 = dma.done.wait [#allocation11], 1024  }
  0x63   :  { %7091 = vsyncadd [#allocation11], 4294966272  ;;  %vm187_vm0 = vcmask 1043456   ;;  %vm180_vm1 = vcmask 31744   ;;  %s8251_s20 = sld [smem:[#allocation20_spill]]  ;;  %s8252_s21 = sld [smem:[#allocation19_spill]]  ;;  %v117_v26 = vlaneseq }
  0x64   :  { %v266_v3 = vld [vmem:[%s8222_s4] sm:$0xff]  ;;  %v267_v4 = vld [vmem:[%s8222_s4 + $0x8] sm:$0xff]  ;;  %v268_v6 = vld [vmem:[%s8222_s4 + $0x10] sm:$0xff]  ;;  %vm277_vm2 = vcmask 261120   ;;  %s7101_s0 = smov 104   ;;  %s7102_s30 = smov 120  }
  0x65   :  { %v6791_v5 = vpack.c.bf16 %v267_v4, %v266_v3  ;;  %v269_v7 = vld [vmem:[%s8222_s4 + $0x18] sm:$0xff]  ;;  %v6275_v9 = vld [vmem:[#allocation4] ss:$0 sm:$0xff]  ;;  %s7104_s25 = smov 96   ;;  %v7105_v25 = vmov 0.0   ;;  %s7106_s29 = smov 64  }
  0x66   :  { %v6795_v8 = vpack.c.bf16 %v269_v7, %v268_v6  ;;  %v6279_v14 = vld [vmem:[%s8223_s5] ss:$0 sm:$0xff]  ;;  %vm7107_vm3 = vmmov 0   ;;  %v7108_v27 = vmov 1983009808   ;;  %v7358_v29 = vshrl.u32 %v117_v26, 7 }
  0x67   :  { %6792 = vmatprep.subr.bf16.mxu1 %v6791_v5  ;;  %v382_v28 = vunpack.c.l.s4 %v7108_v27  ;;  %v7109_v31 = vmov 1934713408   ;;  %vm1243_vm4 = vcmask 64512   ;;  %s6274_s26 = sld [smem:[#allocation3 + $0x1]]  ;;  %vm133_vm7 = vcmask 1040384   ;;  %s7112_s2 = smov 16  }
  0x68   :  { %6794 = vmatpush3.bf16.msra.mxu1 %v6791_v5  ;;  %v414_v32 = vunpack.c.l.s4 %v7109_v31  ;;  %s7113_s12 = smov 24   ;;  %vm2830_vm9 = vcmask 130048   ;;  %vm2833_vm10 = vcmask 195584  }
  0x69   :  { %v172_v0 = vld [vmem:[%s8251_s20] sm:$0xf]  ;;  %v171_v2 = vld [vmem:[%s8252_s21 + $0x8] sm:$0xff]  ;;  %6796 = vmatprep.subr.bf16.mxu1 %v6795_v8  ;;  %s7103_s20 = smov 112   ;;  %v383_v30 = vunpack.c.0.s8 %v382_v28 }
  0x6a   :  { %v170_v1 = vld [vmem:[%s8252_s21] sm:$0xff]  ;;  %6527 = vmatprep.subr.msk.mxu0 %vm187_vm0, %v172_v0  ;;  %v415_v38 = vunpack.c.0.s8 %v414_v32  ;;  %s124_s21 = sld [smem:[#allocation3]] }
  0x6b   :  { %6529 = vmatprep.mubr.msk.f32.mxu0 %vm180_vm1, %v170_v1  ;;  %6528 = vmatpush3.msk.msra.mxu0 %vm187_vm0, %v172_v0  ;;  %v7361_v35 = vsub.s32 %v383_v30, %v7358_v29 }
  0x6c   :  { %6530 = vmatmul.mubr.msk.f32.vlgmr.msra.gmra.mrb[0].mxu0 %vm180_vm1, %v171_v2  ;;  %6798 = vmatpush3.bf16.msra.mxu1 %v6795_v8  ;;  %v7368_v43 = vsub.s32 %v415_v38, %v7358_v29 }
  0x6d   :  { %6543 = vmatprep.subr.mxu0 %v7105_v25  ;;  %6553 = vmatprep.subr.mxu1 %v7105_v25 }
  0x6e   :  { %6545 = vmatprep.mubr.msk.f32.mxu0 %vm7107_vm3, %v7105_v25 }
 0x13f   :  { %v6531_v10 = vpop.f32.mrb[0].mxu0 }
 0x140   :  { %v257_v11 = vpop.f32.mrb[1].mxu0  ;;  %v7309_v13 = vadd.f32 %v6531_v10, %v6275_v9 }
 0x141   :  { %v7307_v12 = vadd.f32 %v6275_v9, %v257_v11 }
 0x143   :  { %6540 = vmatprep.mubr.msk.f32.mxu1 %vm277_vm2, %v7307_v12 }
 0x144   :  { %6541 = vmatmul.mubr.msk.f32.vlgmr.msra.gmra.mrb[0].mxu1 %vm277_vm2, %v7309_v13 }
 0x145   :  { %6555 = vmatprep.mubr.msk.f32.mxu1 %vm7107_vm3, %v7105_v25 }
 0x217   :  { %v6542_v15 = vpop.f32.mrb[0].mxu1 }
 0x218   :  { %v350_v16 = vpop.f32.mrb[1].mxu1  ;;  %v7320_v18 = vadd.f32 %v6542_v15, %v6279_v14 }
 0x219   :  { %v351_v17 = vadd.f32 %v6279_v14, %v350_v16 }
 0x21b   :  { %373 = vrot.lane.b32.xlu1 %v351_v17, %s7101_s0  ;;  %361 = vrot.lane.b32.xlu0 %v351_v17, %s7102_s30 }
 0x21f   :  { %363 = vrot.lane.b32.xlu1 %v7320_v18, %s7102_s30  ;;  %367 = vrot.lane.b32.xlu0 %v351_v17, %s7103_s20 }
 0x223   :  { %375 = vrot.lane.b32.xlu1 %v7320_v18, %s7101_s0  ;;  %369 = vrot.lane.b32.xlu0 %v7320_v18, %s7103_s20 }
 0x227   :  { %651 = vrot.lane.b32.xlu0 %v351_v17, %s7104_s25 }
 0x28d   :  { %v374_v19 = vpop.permute.xlu1 %373  ;;  %v362_v20 = vpop.permute.xlu0 %361 }
 0x28e   :  { %655 = vrot.lane.b32.xlu1 %v362_v20, %s7104_s25  ;;  %v395_v36 = vcombine.low %v362_v20, %v374_v19  ;;  %v396_v37 = vcombine.high %v362_v20, %v374_v19 }
 0x290   :  { %v403_v41 = vrot.slane %v395_v36, %v7361_v35  ;;  %v410_v42 = vrot.slane %v396_v37, %v7361_v35 }
 0x291   :  { %v368_v21 = vpop.permute.xlu0 %367  ;;  %v364_v22 = vpop.permute.xlu1 %363 }
 0x292   :  { %663 = vrot.lane.b32.xlu1 %v374_v19, %s7104_s25  ;;  %659 = vrot.lane.b32.xlu0 %v368_v21, %s7104_s25  ;;  %v379_v33 = vcombine.low %v351_v17, %v368_v21  ;;  %v380_v34 = vcombine.high %v351_v17, %v368_v21 }
 0x294   :  { %v387_v39 = vrot.slane %v379_v33, %v7361_v35  ;;  %v394_v40 = vrot.slane %v380_v34, %v7361_v35 }
 0x295   :  { %v7336_v23 = vpop.permute.xlu1 %375  ;;  %v7338_v24 = vpop.permute.xlu0 %369 }
 0x296   :  { %657 = vrot.lane.b32.xlu1 %v364_v22, %s7104_s25  ;;  %653 = vrot.lane.b32.xlu0 %v7320_v18, %s7104_s25  ;;  %v463_v44 = vcombine.low %v364_v22, %v7336_v23  ;;  %v447_v45 = vcombine.low %v7320_v18, %v7338_v24  ;;  %v411_v46 = vcombine.low %v387_v39, %v403_v41 }
 0x297   :  { %v412_v47 = vcombine.high %v387_v39, %v403_v41  ;;  %v464_v48 = vcombine.high %v364_v22, %v7336_v23  ;;  %v448_v49 = vcombine.high %v7320_v18, %v7338_v24  ;;  %v427_v50 = vcombine.low %v394_v40, %v410_v42 }
 0x298   :  { %v428_v51 = vcombine.high %v394_v40, %v410_v42  ;;  %v471_v52 = vrot.slane %v463_v44, %v7361_v35  ;;  %v455_v53 = vrot.slane %v447_v45, %v7361_v35  ;;  %v419_v54 = vrot.slane %v411_v46, %v7368_v43 }
 0x299   :  { %v426_v55 = vrot.slane %v412_v47, %v7368_v43  ;;  %v478_v56 = vrot.slane %v464_v48, %v7361_v35  ;;  %v462_v57 = vrot.slane %v448_v49, %v7361_v35  ;;  %v435_v58 = vrot.slane %v427_v50, %v7368_v43  ;;  %v652_v4 = vpop.permute.xlu0 %651 }
 0x29a   :  { %665 = vrot.lane.b32.xlu1 %v7336_v23, %s7104_s25  ;;  %661 = vrot.lane.b32.xlu0 %v7338_v24, %s7104_s25  ;;  %v442_v59 = vrot.slane %v428_v51, %v7368_v43  ;;  %v479_v60 = vcombine.low %v455_v53, %v471_v52  ;;  %v480_v61 = vcombine.high %v455_v53, %v471_v52 }
 0x29b   :  { %v515_v62 = vcombine.low %v419_v54, %v426_v55  ;;  %v495_v63 = vcombine.low %v462_v57, %v478_v56  ;;  %v6282_v0 = vcombine.high %v419_v54, %v426_v55  ;;  %v496_v3 = vcombine.high %v462_v57, %v478_v56 }
 0x29c   :  { %v531_v1 = vcombine.low %v435_v58, %v442_v59  ;;  %v6283_v2 = vcombine.high %v435_v58, %v442_v59  ;;  %v487_v6 = vrot.slane %v479_v60, %v7368_v43  ;;  %v494_v7 = vrot.slane %v480_v61, %v7368_v43 }
 0x29d   :  { %v503_v8 = vrot.slane %v495_v63, %v7368_v43  ;;  %v7388_v9 = vrot.slane %v515_v62, %v7361_v35  ;;  %v510_v10 = vrot.slane %v496_v3, %v7368_v43  ;;  %v7392_v15 = vrot.slane %v6282_v0, %v7361_v35 }
 0x29e   :  { %947 = vrot.lane.b32.xlu1 %v351_v17, %s7106_s29  ;;  %949 = vrot.lane.b32.xlu0 %v7320_v18, %s7106_s29  ;;  %v7395_v16 = vrot.slane %v531_v1, %v7361_v35  ;;  %v7398_v17 = vrot.slane %v6283_v2, %v7361_v35  ;;  %v6284_v27 = vcombine.high %v487_v6, %v494_v7 }
 0x29f   :  { %v599_v33 = vcombine.low %v503_v8, %v510_v10  ;;  %v6285_v34 = vcombine.high %v503_v8, %v510_v10  ;;  %v547_v37 = vcombine.low %v7388_v9, %v7392_v15  ;;  %v548_v45 = vcombine.high %v7388_v9, %v7392_v15 }
 0x2a0   :  { %v563_v38 = vcombine.low %v7395_v16, %v7398_v17  ;;  %v564_v46 = vcombine.high %v7395_v16, %v7398_v17  ;;  %v7416_v48 = vrot.slane %v6284_v27, %v7361_v35 }
 0x2a1   :  { %v7423_v54 = vrot.slane %v547_v37, %v7368_v43  ;;  %v7429_v56 = vrot.slane %v599_v33, %v7361_v35  ;;  %v7432_v57 = vrot.slane %v6285_v34, %v7361_v35 }
 0x2a2   :  { %953 = vrot.lane.b32.xlu1 %v364_v22, %s7106_s29  ;;  %951 = vrot.lane.b32.xlu0 %v362_v20, %s7106_s29  ;;  %v583_v22 = vcombine.low %v487_v6, %v494_v7  ;;  %v7426_v55 = vrot.slane %v563_v38, %v7368_v43 }
 0x2a4   :  { %v7413_v47 = vrot.slane %v583_v22, %v7361_v35 }
 0x2a6   :  { %955 = vrot.lane.b32.xlu1 %v368_v21, %s7106_s29 }
 0x2aa   :  { %959 = vrot.lane.b32.xlu1 %v374_v19, %s7106_s29 }
 0x300   :  { %v656_v5 = vpop.permute.xlu1 %655 }
 0x304   :  { %v664_v11 = vpop.permute.xlu1 %663  ;;  %v660_v14 = vpop.permute.xlu0 %659 }
 0x305   :  { %v691_v18 = vcombine.low %v656_v5, %v664_v11  ;;  %v692_v19 = vcombine.high %v656_v5, %v664_v11  ;;  %v675_v20 = vcombine.low %v652_v4, %v660_v14  ;;  %v676_v21 = vcombine.high %v652_v4, %v660_v14 }
 0x307   :  { %v699_v28 = vrot.slane %v691_v18, %v7361_v35  ;;  %v706_v30 = vrot.slane %v692_v19, %v7361_v35  ;;  %v683_v31 = vrot.slane %v675_v20, %v7361_v35  ;;  %v690_v32 = vrot.slane %v676_v21, %v7361_v35 }
 0x308   :  { %v658_v36 = vpop.permute.xlu1 %657  ;;  %v654_v44 = vpop.permute.xlu0 %653 }
 0x309   :  { %v707_v39 = vcombine.low %v683_v31, %v699_v28  ;;  %v708_v40 = vcombine.high %v683_v31, %v699_v28  ;;  %v723_v41 = vcombine.low %v690_v32, %v706_v30  ;;  %v724_v42 = vcombine.high %v690_v32, %v706_v30 }
 0x30b   :  { %v715_v49 = vrot.slane %v707_v39, %v7368_v43  ;;  %v722_v50 = vrot.slane %v708_v40, %v7368_v43  ;;  %v731_v51 = vrot.slane %v723_v41, %v7368_v43  ;;  %v738_v52 = vrot.slane %v724_v42, %v7368_v43 }
 0x30c   :  { %v666_v53 = vpop.permute.xlu1 %665  ;;  %v662_v62 = vpop.permute.xlu0 %661  ;;  %v7458_v39 = vrot.slane %v548_v45, %v7368_v43  ;;  %v7461_v40 = vrot.slane %v564_v46, %v7368_v43  ;;  %v615_v45 = vcombine.low %v7413_v47, %v7416_v48  ;;  %v631_v46 = vcombine.low %v7429_v56, %v7432_v57 }
 0x30d   :  { %v811_v58 = vcombine.low %v715_v49, %v722_v50  ;;  %v6286_v59 = vcombine.high %v715_v49, %v722_v50  ;;  %v827_v60 = vcombine.low %v731_v51, %v738_v52  ;;  %v6287_v61 = vcombine.high %v731_v51, %v738_v52 }
 0x30e   :  { %v759_v63 = vcombine.low %v658_v36, %v666_v53  ;;  %v760_v0 = vcombine.high %v658_v36, %v666_v53  ;;  %v743_v1 = vcombine.low %v654_v44, %v662_v62  ;;  %v744_v2 = vcombine.high %v654_v44, %v662_v62 }
 0x30f   :  { %v818_v3 = vrot.slane %v811_v58, %v7361_v35  ;;  %v826_v4 = vrot.slane %v6286_v59, %v7361_v35  ;;  %v834_v5 = vrot.slane %v827_v60, %v7361_v35  ;;  %v842_v6 = vrot.slane %v6287_v61, %v7361_v35 }
 0x310   :  { %v767_v7 = vrot.slane %v759_v63, %v7361_v35  ;;  %v774_v8 = vrot.slane %v760_v0, %v7361_v35  ;;  %v751_v9 = vrot.slane %v743_v1, %v7361_v35  ;;  %v758_v10 = vrot.slane %v744_v2, %v7361_v35  ;;  %v7442_v11 = vpop.permute.xlu1 %947  ;;  %v7463_v50 = vpop.permute.xlu0 %949 }
 0x311   :  { %v843_v14 = vcombine.low %v818_v3, %v826_v4  ;;  %v844_v15 = vcombine.high %v818_v3, %v826_v4  ;;  %v859_v16 = vcombine.low %v834_v5, %v842_v6  ;;  %v860_v17 = vcombine.high %v834_v5, %v842_v6 }
 0x312   :  { %v775_v18 = vcombine.low %v751_v9, %v767_v7  ;;  %v776_v19 = vcombine.high %v751_v9, %v767_v7  ;;  %v791_v20 = vcombine.low %v758_v10, %v774_v8  ;;  %v792_v21 = vcombine.high %v758_v10, %v774_v8 }
 0x313   :  { %v851_v22 = vrot.slane %v843_v14, %v7368_v43  ;;  %v867_v27 = vrot.slane %v859_v16, %v7368_v43  ;;  %v7447_v28 = vrot.slane %v844_v15, %v7368_v43  ;;  %v874_v30 = vrot.slane %v860_v17, %v7368_v43 }
 0x314   :  { %v783_v31 = vrot.slane %v775_v18, %v7368_v43  ;;  %v790_v32 = vrot.slane %v776_v19, %v7368_v43  ;;  %v799_v33 = vrot.slane %v791_v20, %v7368_v43  ;;  %v806_v34 = vrot.slane %v792_v21, %v7368_v43  ;;  %v7454_v36 = vpop.permute.xlu1 %953  ;;  %v952_v8 = vpop.permute.xlu0 %951 }
 0x315   :  { %v875_v37 = vcombine.low %v851_v22, %v867_v27  ;;  %v877_v38 = vcombine.low %v7447_v28, %v874_v30  ;;  %v579_v51 = vcombine.low %v7423_v54, %v7426_v55  ;;  %v581_v62 = vcombine.low %v7458_v39, %v7461_v40 }
 0x316   :  { %v879_v41 = vcombine.low %v783_v31, %v790_v32  ;;  %v6288_v42 = vcombine.high %v783_v31, %v790_v32  ;;  %v895_v44 = vcombine.low %v799_v33, %v806_v34  ;;  %v6289_v49 = vcombine.high %v799_v33, %v806_v34 }
 0x317   :  { %6544 = vmatpush3.xpose.msk.msra.mxu0 %vm1243_vm4, %v875_v37  ;;  %6554 = vmatpush3.xpose.msk.msra.mxu1 %vm1243_vm4, %v877_v38  ;;  %v876_v63 = vcombine.high %v851_v22, %v867_v27  ;;  %v616_v0 = vcombine.high %v7413_v47, %v7416_v48  ;;  %v580_v6 = vcombine.high %v7423_v54, %v7426_v55 }
 0x318   :  { %v886_v52 = vrot.slane %v879_v41, %v7361_v35  ;;  %v894_v53 = vrot.slane %v6288_v42, %v7361_v35  ;;  %v902_v58 = vrot.slane %v895_v44, %v7361_v35  ;;  %v910_v59 = vrot.slane %v6289_v49, %v7361_v35  ;;  %v956_v60 = vpop.permute.xlu1 %955  ;;  %6548 = vmatprep.subr.mxu0 %v7105_v25 }
 0x319   :  { %v971_v61 = vcombine.low %v7442_v11, %v956_v60  ;;  %6563 = vmatprep.subr.mxu1 %v7105_v25  ;;  %v972_v5 = vcombine.high %v7442_v11, %v956_v60  ;;  %v623_v7 = vrot.slane %v615_v45, %v7368_v43  ;;  %v639_v10 = vrot.slane %v631_v46, %v7368_v43 }
 0x31a   :  { %v911_v1 = vcombine.low %v886_v52, %v894_v53  ;;  %v912_v2 = vcombine.high %v886_v52, %v894_v53  ;;  %v927_v3 = vcombine.low %v902_v58, %v910_v59  ;;  %v928_v4 = vcombine.high %v902_v58, %v910_v59  ;;  %6546 = vmatmul.mubr.msk.f32.vlgmr.msra.gmra.mrb[2].mxu0 %vm1243_vm4, %v579_v51 }
 0x31b   :  { %6556 = vmatmul.mubr.msk.f32.vlgmr.msra.gmra.mrb[2].mxu1 %vm1243_vm4, %v581_v62  ;;  %6549 = vmatpush3.xpose.msk.msra.mxu0 %vm1243_vm4, %v876_v63  ;;  %v878_v15 = vcombine.high %v7447_v28, %v874_v30  ;;  %v632_v54 = vcombine.high %v7429_v56, %v7432_v57  ;;  %v979_v55 = vrot.slane %v971_v61, %v7361_v35 }
 0x31c   :  { %v960_v9 = vpop.permute.xlu1 %959  ;;  %6550 = vmatprep.mubr.msk.f32.mxu0 %vm7107_vm3, %v7105_v25  ;;  %6558 = vmatprep.subr.mxu0 %v7105_v25  ;;  %v919_v47 = vrot.slane %v911_v1, %v7368_v43  ;;  %v935_v48 = vrot.slane %v927_v3, %v7368_v43  ;;  %v926_v17 = vrot.slane %v912_v2, %v7368_v43 }
 0x31d   :  { %v987_v11 = vcombine.low %v952_v8, %v960_v9  ;;  %v988_v14 = vcombine.high %v952_v8, %v960_v9  ;;  %6565 = vmatprep.mubr.msk.f32.mxu1 %vm7107_vm3, %v7105_v25  ;;  %v942_v18 = vrot.slane %v928_v4, %v7368_v43  ;;  %v986_v19 = vrot.slane %v972_v5, %v7361_v35 }
 0x31e   :  { %6551 = vmatmul.mubr.msk.f32.vlgmr.msra.gmra.mrb[4].mxu0 %vm1243_vm4, %v580_v6  ;;  %v943_v16 = vcombine.low %v919_v47, %v935_v48  ;;  %v582_v56 = vcombine.high %v7458_v39, %v7461_v40  ;;  %v647_v57 = vcombine.low %v623_v7, %v639_v10  ;;  %v944_v31 = vcombine.high %v919_v47, %v935_v48 }
 0x31f   :  { %v995_v20 = vrot.slane %v987_v11, %v7361_v35  ;;  %v1002_v21 = vrot.slane %v988_v14, %v7361_v35  ;;  %6559 = vmatpush3.xpose.msk.msra.mxu0 %vm1243_vm4, %v878_v15  ;;  %6560 = vmatprep.mubr.msk.f32.mxu0 %vm7107_vm3, %v7105_v25  ;;  %v945_v32 = vcombine.low %v926_v17, %v942_v18  ;;  %v120_v9 = vand.u32 127, %v117_v26 }
 0x320   :  { %6564 = vmatpush3.xpose.msk.msra.mxu1 %vm1243_vm4, %v943_v16  ;;  %6568 = vmatprep.subr.mxu0 %v7105_v25  ;;  %v630_v33 = vrot.slane %v616_v0, %v7368_v43  ;;  %v646_v34 = vrot.slane %v632_v54, %v7368_v43  ;;  %v648_v41 = vcombine.high %v623_v7, %v639_v10  ;;  %v125_v47 = vstv %s124_s21 }
 0x321   :  { %v1003_v22 = vcombine.low %v979_v55, %v995_v20  ;;  %v1004_v27 = vcombine.high %v979_v55, %v995_v20  ;;  %v1019_v28 = vcombine.low %v986_v19, %v1002_v21  ;;  %v1020_v30 = vcombine.high %v986_v19, %v1002_v21  ;;  %6573 = vmatprep.subr.mxu1 %v7105_v25 }
 0x322   :  { %6561 = vmatmul.mubr.msk.f32.vlgmr.msra.gmra.mrb[6].mxu0 %vm1243_vm4, %v582_v56  ;;  %v649_v45 = vcombine.low %v630_v33, %v646_v34  ;;  %v946_v46 = vcombine.high %v926_v17, %v942_v18  ;;  %v650_v60 = vcombine.high %v630_v33, %v646_v34  ;;  %v130_v48 = vstv %s6274_s26  ;;  %s8253_s26 = sld [smem:[#allocation22_spill]] }
 0x323   :  { %v1011_v37 = vrot.slane %v1003_v22, %v7368_v43  ;;  %v1018_v38 = vrot.slane %v1004_v27, %v7368_v43  ;;  %v1027_v39 = vrot.slane %v1019_v28, %v7368_v43  ;;  %v1034_v40 = vrot.slane %v1020_v30, %v7368_v43  ;;  %6566 = vmatmul.mubr.msk.f32.vlgmr.msra.gmra.mrb[4].mxu1 %vm1243_vm4, %v647_v57 }
 0x324   :  { %6569 = vmatpush3.xpose.msk.msra.mxu0 %vm1243_vm4, %v944_v31  ;;  %6574 = vmatpush3.xpose.msk.msra.mxu1 %vm1243_vm4, %v945_v32  ;;  %v7110_v10 = vmov 1966171168   ;;  %vm126_vm5 = vcmp.lt.s32.totalorder %v120_v9, %v125_v47  ;;  %vm131_vm6 = vcmp.lt.s32.totalorder %v120_v9, %v130_v48  ;;  %v7111_v15 = vmov -1e+30  }
 0x325   :  { %v1107_v42 = vcombine.low %v1011_v37, %v1018_v38  ;;  %v6290_v44 = vcombine.high %v1011_v37, %v1018_v38  ;;  %v1123_v49 = vcombine.low %v1027_v39, %v1034_v40  ;;  %v6291_v51 = vcombine.high %v1027_v39, %v1034_v40  ;;  %6570 = vmatprep.mubr.msk.f32.mxu0 %vm7107_vm3, %v7105_v25 }
 0x326   :  { %6575 = vmatprep.mubr.msk.f32.mxu1 %vm7107_vm3, %v7105_v25  ;;  %6578 = vmatprep.subr.mxu0 %v7105_v25  ;;  %v137_v11 = vunpack.c.l.s4 %v7110_v10  ;;  %v127_v54 = vsel %vm126_vm5, 0.0, %v7111_v15  ;;  %v132_v55 = vsel %vm131_vm6, 0.0, %v7111_v15  ;;  %v160_v20 = vsub.s32 0, %v7358_v29 }
 0x327   :  { %v1114_v52 = vrot.slane %v1107_v42, %v7361_v35  ;;  %v1122_v53 = vrot.slane %v6290_v44, %v7361_v35  ;;  %v1130_v58 = vrot.slane %v1123_v49, %v7361_v35  ;;  %v1138_v59 = vrot.slane %v6291_v51, %v7361_v35  ;;  %6571 = vmatmul.mubr.msk.f32.vlgmr.msra.gmra.mrb[8].mxu0 %vm1243_vm4, %v648_v41 }
 0x328   :  { %6576 = vmatmul.mubr.msk.f32.vlgmr.msra.gmra.mrb[6].mxu1 %vm1243_vm4, %v649_v45  ;;  %6579 = vmatpush3.xpose.msk.msra.mxu0 %vm1243_vm4, %v946_v46  ;;  %v138_v14 = vunpack.c.0.s8 %v137_v11  ;;  %v134_v17 = vsel %vm133_vm7, %v127_v54, %v132_v55  ;;  %vm121_vm8 = vcmp.le.s32.totalorder %v120_v9, %v7358_v29 }
 0x329   :  { %6580 = vmatprep.mubr.msk.f32.mxu0 %vm7107_vm3, %v7105_v25  ;;  %6583 = vmatprep.subr.mxu1 %v7105_v25  ;;  %v1139_v61 = vcombine.low %v1114_v52, %v1122_v53  ;;  %v1155_v62 = vcombine.low %v1130_v58, %v1138_v59  ;;  %v1140_v63 = vcombine.high %v1114_v52, %v1122_v53  ;;  %v122_v21 = vsel %vm121_vm8, 0.0, %v7111_v15 }
 0x32a   :  { %6588 = vmatprep.subr.mxu0 %v7105_v25  ;;  %6585 = vmatprep.mubr.msk.f32.mxu1 %vm7107_vm3, %v7105_v25  ;;  %v1156_v0 = vcombine.high %v1130_v58, %v1138_v59  ;;  %v141_v16 = vsub.s32 %v138_v14, %v7358_v29 }
 0x32b   :  { %6581 = vmatmul.mubr.msk.f32.vlgmr.msra.gmra.mrb[10].mxu0 %vm1243_vm4, %v650_v60  ;;  %v1147_v1 = vrot.slane %v1139_v61, %v7368_v43  ;;  %v1163_v2 = vrot.slane %v1155_v62, %v7368_v43  ;;  %v7549_v3 = vrot.slane %v1140_v63, %v7368_v43 }
 0x32c   :  { %v7552_v4 = vrot.slane %v1156_v0, %v7368_v43  ;;  %6590 = vmatprep.mubr.msk.f32.mxu0 %vm7107_vm3, %v7105_v25  ;;  %v142_v18 = vrot.slane %v134_v17, %v141_v16 }
 0x32d   :  { %v1171_v5 = vcombine.low %v1147_v1, %v1163_v2  ;;  %v1172_v6 = vcombine.high %v1147_v1, %v1163_v2 }
 0x32e   :  { %v1173_v7 = vcombine.low %v7549_v3, %v7552_v4  ;;  %v1174_v8 = vcombine.high %v7549_v3, %v7552_v4  ;;  %v150_v19 = vrot.slane %v142_v18, %v141_v16  ;;  %v143_v56 = vcombine.high %v142_v18, %v142_v18 }
 0x32f   :  { %6584 = vmatpush3.msra.mxu1 %v1171_v5  ;;  %6589 = vmatpush3.msra.mxu0 %v1172_v6 }
 0x330   :  { %6593 = vmatprep.subr.mxu1 %v7105_v25  ;;  %6598 = vmatprep.subr.mxu0 %v7105_v25  ;;  %v161_v26 = vrot.slane %v150_v19, %v160_v20  ;;  %v157_v22 = vrot.slane %v143_v56, %v141_v16 }
 0x332   :  { %v7566_v57 = vadd.f32 %v161_v26, %v122_v21  ;;  %v165_v33 = vrot.slane %v157_v22, %v160_v20 }
 0x334   :  { %v7572_v40 = vadd.f32 %v165_v33, %v122_v21 }
 0x3ed   :  { %v1316_v27 = vpop.f32.mrb[2].mxu0 }
 0x3ee   :  { %v1852_v28 = vadd.f32 %v1316_v27, %v7566_v57  ;;  %v1468_v30 = vpop.f32.mrb[2].mxu1  ;;  %v6547_v31 = vpop.f32.mrb[3].mxu0 }
 0x3ef   :  { %v6557_v32 = vpop.f32.mrb[3].mxu1  ;;  %v1854_v34 = vadd.f32 %v1468_v30, %v7566_v57 }
 0x3f0   :  { %v1860_v37 = vsel %vm1243_vm4, %v1852_v28, -inf }
 0x3f1   :  { %v1392_v38 = vpop.f32.mrb[4].mxu0  ;;  %1861 = vmax.xlane.f32.xlu0 %v1860_v37  ;;  %v1866_v42 = vsel %vm1243_vm4, %v1854_v34, -inf }
 0x3f2   :  { %v1853_v29 = vadd.f32 %v1392_v38, %v7566_v57  ;;  %v6552_v39 = vpop.f32.mrb[5].mxu0 }
 0x3f4   :  { %v1863_v41 = vsel %vm1243_vm4, %v1853_v29, -inf }
 0x3f5   :  { %v1544_v44 = vpop.f32.mrb[6].mxu0  ;;  %1864 = vmax.xlane.f32.xlu1 %v1863_v41  ;;  %1867 = vmax.xlane.f32.xlu0 %v1866_v42 }
 0x3f6   :  { %v1855_v49 = vadd.f32 %v1544_v44, %v7566_v57  ;;  %v1620_v51 = vpop.f32.mrb[4].mxu1  ;;  %v6562_v45 = vpop.f32.mrb[7].mxu0 }
 0x3f7   :  { %v1856_v46 = vadd.f32 %v1620_v51, %v7572_v40  ;;  %v6567_v52 = vpop.f32.mrb[5].mxu1 }
 0x3f8   :  { %v1869_v53 = vsel %vm1243_vm4, %v1855_v49, -inf }
 0x3f9   :  { %1870 = vmax.xlane.f32.xlu0 %v1869_v53  ;;  %v1872_v58 = vsel %vm1243_vm4, %v1856_v46, -inf }
 0x3fa   :  { %v1696_v59 = vpop.f32.mrb[8].mxu0  ;;  %1873 = vmax.xlane.f32.xlu1 %v1872_v58 }
 0x3fb   :  { %v1772_v60 = vpop.f32.mrb[6].mxu1  ;;  %v6572_v61 = vpop.f32.mrb[9].mxu0  ;;  %v1857_v0 = vadd.f32 %v1696_v59, %v7572_v40 }
 0x3fc   :  { %v1858_v62 = vadd.f32 %v1772_v60, %v7572_v40  ;;  %v6577_v63 = vpop.f32.mrb[7].mxu1 }
 0x3fd   :  { %v1875_v47 = vsel %vm1243_vm4, %v1857_v0, -inf }
 0x3fe   :  { %v1848_v1 = vpop.f32.mrb[10].mxu0  ;;  %v1878_v2 = vsel %vm1243_vm4, %v1858_v62, -inf }
 0x3ff   :  { %v1859_v5 = vadd.f32 %v1848_v1, %v7572_v40  ;;  %1879 = vmax.xlane.f32.xlu0 %v1878_v2  ;;  %v6582_v6 = vpop.f32.mrb[11].mxu0 }
 0x401   :  { %v1881_v9 = vsel %vm1243_vm4, %v1859_v5, -inf }
 0x402   :  { %1882 = vmax.xlane.f32.xlu1 %v1881_v9 }
 0x403   :  { %1876 = vmax.xlane.f32.xlu0 %v1875_v47 }
 0x413   :  { %961 = vrot.lane.b32.xlu1 %v7336_v23, %s7106_s29 }
 0x419   :  { %957 = vrot.lane.b32.xlu0 %v7338_v24, %s7106_s29 }
 0x47e   :  { %v1862_v48 = vpop.xlane.xlu0 %1861 }
 0x47f   :  { %v1884_v10 = vsub.f32 %v1852_v28, %v1862_v48 }
 0x481   :  { %v1892_v11 = vmul.f32 1.442695, %v1884_v10 }
 0x482   :  { %v1865_v14 = vpop.xlane.xlu1 %1864  ;;  %v1868_v15 = vpop.xlane.xlu0 %1867 }
 0x483   :  { %6884 = vpow2.f32 %v1892_v11  ;;  %v1885_v54 = vsub.f32 %v1853_v29, %v1865_v14  ;;  %v1886_v55 = vsub.f32 %v1854_v34, %v1868_v15 }
 0x485   :  { %v1894_v16 = vmul.f32 1.442695, %v1885_v54  ;;  %v1896_v17 = vmul.f32 1.442695, %v1886_v55 }
 0x486   :  { %v1871_v18 = vpop.xlane.xlu0 %1870 }
 0x487   :  { %6886 = vpow2.f32 %v1894_v16  ;;  %v1887_v19 = vsub.f32 %v1855_v49, %v1871_v18  ;;  %v1874_v20 = vpop.xlane.xlu1 %1873 }
 0x488   :  { %6888 = vpow2.f32 %v1896_v17  ;;  %v1888_v26 = vsub.f32 %v1856_v46, %v1874_v20 }
 0x489   :  { %v1898_v23 = vmul.f32 1.442695, %v1887_v19 }
 0x48a   :  { %v1900_v21 = vmul.f32 1.442695, %v1888_v26 }
 0x48b   :  { %6890 = vpow2.f32 %v1898_v23 }
 0x48c   :  { %6892 = vpow2.f32 %v1900_v21  ;;  %v1880_v24 = vpop.xlane.xlu0 %1879 }
 0x48d   :  { %v6885_v56 = vpop.eup %6884  ;;  %v1890_v22 = vsub.f32 %v1858_v62, %v1880_v24 }
 0x48e   :  { %6586 = vmatmul.mubr.msk.f32.vlgmr.msra.gmra.mrb[8].mxu1 %vm1243_vm4, %v6885_v56  ;;  %v1908_v27 = vsel %vm1243_vm4, %v6885_v56, 0.0 }
 0x48f   :  { %v1904_v28 = vmul.f32 1.442695, %v1890_v22  ;;  %6594 = vmatpush3.msra.mxu1 %v1173_v7  ;;  %v1883_v30 = vpop.xlane.xlu1 %1882  ;;  %1909 = vadd.xlane.f32.xlu0 %v1908_v27 }
 0x490   :  { %v1877_v31 = vpop.xlane.xlu0 %1876  ;;  %v1891_v32 = vsub.f32 %v1859_v5, %v1883_v30  ;;  %6595 = vmatprep.mubr.msk.f32.mxu1 %vm7107_vm3, %v7105_v25  ;;  %6603 = vmatprep.subr.mxu1 %v7105_v25 }
 0x491   :  { %v6887_v33 = vpop.eup %6886  ;;  %6894 = vpow2.f32 %v1904_v28  ;;  %v1889_v34 = vsub.f32 %v1857_v0, %v1877_v31 }
 0x492   :  { %v6889_v37 = vpop.eup %6888  ;;  %6591 = vmatmul.mubr.msk.f32.vlgmr.msra.gmra.mrb[12].mxu0 %vm1243_vm4, %v6887_v33  ;;  %v1911_v38 = vsel %vm1243_vm4, %v6887_v33, 0.0  ;;  %v1906_v39 = vmul.f32 1.442695, %v1891_v32 }
 0x493   :  { %v1902_v29 = vmul.f32 1.442695, %v1889_v34  ;;  %6596 = vmatmul.mubr.msk.f32.vlgmr.msra.gmra.mrb[10].mxu1 %vm1243_vm4, %v6889_v37  ;;  %6599 = vmatpush3.msra.mxu0 %v1174_v8  ;;  %v962_v7 = vpop.permute.xlu1 %961  ;;  %v1914_v41 = vsel %vm1243_vm4, %v6889_v37, 0.0 }
 0x494   :  { %v958_v42 = vpop.permute.xlu0 %957  ;;  %v1055_v44 = vcombine.low %v7454_v36, %v962_v7  ;;  %v1056_v49 = vcombine.high %v7454_v36, %v962_v7  ;;  %1915 = vadd.xlane.f32.xlu0 %v1914_v41  ;;  %1912 = vadd.xlane.f32.xlu1 %v1911_v38 }
 0x495   :  { %v6891_v51 = vpop.eup %6890  ;;  %6896 = vpow2.f32 %v1902_v29  ;;  %v1039_v45 = vcombine.low %v7463_v50, %v958_v42  ;;  %v1040_v46 = vcombine.high %v7463_v50, %v958_v42  ;;  %6600 = vmatprep.mubr.msk.f32.mxu0 %vm7107_vm3, %v7105_v25  ;;  %6608 = vmatprep.subr.mxu0 %v7105_v25 }
 0x496   :  { %v6893_v3 = vpop.eup %6892  ;;  %v1063_v4 = vrot.slane %v1055_v44, %v7361_v35  ;;  %v1070_v8 = vrot.slane %v1056_v49, %v7361_v35  ;;  %6601 = vmatmul.mubr.msk.f32.vlgmr.msra.gmra.mrb[14].mxu0 %vm1243_vm4, %v6891_v51  ;;  %v1917_v36 = vsel %vm1243_vm4, %v6891_v51, 0.0  ;;  %6605 = vmatprep.mubr.msk.f32.mxu1 %vm7107_vm3, %v7105_v25  ;;  %6898 = vpow2.f32 %v1906_v39 }
 0x497   :  { %v1047_v50 = vrot.slane %v1039_v45, %v7361_v35  ;;  %v1054_v52 = vrot.slane %v1040_v46, %v7361_v35  ;;  %v1920_v53 = vsel %vm1243_vm4, %v6893_v3, 0.0  ;;  %6610 = vmatprep.mubr.msk.f32.mxu0 %vm7107_vm3, %v7105_v25 }
 0x498   :  { %1918 = vadd.xlane.f32.xlu0 %v1917_v36  ;;  %1921 = vadd.xlane.f32.xlu1 %v1920_v53 }
 0x499   :  { %v1071_v58 = vcombine.low %v1047_v50, %v1063_v4  ;;  %v1072_v59 = vcombine.high %v1047_v50, %v1063_v4  ;;  %v1087_v60 = vcombine.low %v1054_v52, %v1070_v8  ;;  %v1088_v61 = vcombine.high %v1054_v52, %v1070_v8 }
 0x49b   :  { %v6895_v62 = vpop.eup %6894  ;;  %v1079_v63 = vrot.slane %v1071_v58, %v7368_v43  ;;  %v1086_v0 = vrot.slane %v1072_v59, %v7368_v43  ;;  %v1095_v1 = vrot.slane %v1087_v60, %v7368_v43  ;;  %v1102_v2 = vrot.slane %v1088_v61, %v7368_v43 }
 0x49c   :  { %v1926_v5 = vsel %vm1243_vm4, %v6895_v62, 0.0 }
 0x49d   :  { %v1175_v6 = vcombine.low %v1079_v63, %v1086_v0  ;;  %v6292_v9 = vcombine.high %v1079_v63, %v1086_v0  ;;  %v1191_v47 = vcombine.low %v1095_v1, %v1102_v2  ;;  %v6293_v48 = vcombine.high %v1095_v1, %v1102_v2  ;;  %1927 = vadd.xlane.f32.xlu1 %v1926_v5 }
 0x49f   :  { %v6897_v10 = vpop.eup %6896  ;;  %v1182_v11 = vrot.slane %v1175_v6, %v7361_v35  ;;  %v1190_v14 = vrot.slane %v6292_v9, %v7361_v35  ;;  %v1198_v15 = vrot.slane %v1191_v47, %v7361_v35  ;;  %v1206_v54 = vrot.slane %v6293_v48, %v7361_v35 }
 0x4a0   :  { %v1923_v55 = vsel %vm1243_vm4, %v6897_v10, 0.0  ;;  %v6899_v16 = vpop.eup %6898 }
 0x4a1   :  { %1924 = vadd.xlane.f32.xlu0 %v1923_v55  ;;  %v1207_v17 = vcombine.low %v1182_v11, %v1190_v14  ;;  %v1223_v18 = vcombine.low %v1198_v15, %v1206_v54  ;;  %v1208_v19 = vcombine.high %v1182_v11, %v1190_v14  ;;  %v1224_v20 = vcombine.high %v1198_v15, %v1206_v54 }
 0x4a2   :  { %v1929_v21 = vsel %vm1243_vm4, %v6899_v16, 0.0 }
 0x4a3   :  { %v1215_v26 = vrot.slane %v1207_v17, %v7368_v43  ;;  %v1231_v23 = vrot.slane %v1223_v18, %v7368_v43  ;;  %v1222_v24 = vrot.slane %v1208_v19, %v7368_v43  ;;  %v1238_v56 = vrot.slane %v1224_v20, %v7368_v43  ;;  %v2836_v17 = vld [vmem:[#allocation7] sm:$0xff]  ;;  %v2837_v18 = vld [vmem:[#allocation7 + $0x8] sm:$0xff] }
 0x4a5   :  { %1930 = vadd.xlane.f32.xlu0 %v1929_v21  ;;  %v1239_v22 = vcombine.low %v1215_v26, %v1231_v23  ;;  %v1240_v27 = vcombine.high %v1215_v26, %v1231_v23  ;;  %v1241_v28 = vcombine.low %v1222_v24, %v1238_v56  ;;  %v1242_v30 = vcombine.high %v1222_v24, %v1238_v56 }
 0x4a6   :  { %v6799_v21 = vpack.c.bf16 %v2837_v18, %v2836_v17 }
 0x4a7   :  { %6604 = vmatpush3.msra.mxu1 %v1239_v22  ;;  %6609 = vmatpush3.msra.mxu0 %v1240_v27 }
 0x4a8   :  { %6606 = vmatmul.mubr.msk.f32.vlgmr.msra.gmra.mrb[12].mxu1 %vm1243_vm4, %v6893_v3  ;;  %6611 = vmatmul.mubr.msk.f32.vlgmr.msra.gmra.mrb[16].mxu0 %vm1243_vm4, %v6897_v10 }
 0x4a9   :  { %6613 = vmatprep.subr.mxu1 %v7105_v25  ;;  %6618 = vmatprep.subr.mxu0 %v7105_v25 }
 0x4aa   :  { %6614 = vmatpush3.msra.mxu1 %v1241_v28  ;;  %6619 = vmatpush3.msra.mxu0 %v1242_v30 }
 0x4ab   :  { %6615 = vmatprep.mubr.msk.f32.mxu1 %vm7107_vm3, %v7105_v25  ;;  %6620 = vmatprep.mubr.msk.f32.mxu0 %vm7107_vm3, %v7105_v25 }
 0x4ac   :  { %6616 = vmatmul.mubr.msk.f32.vlgmr.msra.gmra.mrb[14].mxu1 %vm1243_vm4, %v6895_v62  ;;  %6621 = vmatmul.mubr.msk.f32.vlgmr.msra.gmra.mrb[18].mxu0 %vm1243_vm4, %v6899_v16 }
 0x4ad   :  { %6800 = vmatprep.subr.bf16.mxu1 %v6799_v21 }
 0x4ae   :  { %6802 = vmatpush3.bf16.msra.mxu1 %v6799_v21 }
 0x51c   :  { %v1910_v31 = vpop.xlane.xlu0 %1909 }
 0x51d   :  { %6900 = vrcp.f32 %v1910_v31 }
 0x521   :  { %v1916_v32 = vpop.xlane.xlu0 %1915  ;;  %v1913_v33 = vpop.xlane.xlu1 %1912 }
 0x522   :  { %6902 = vrcp.f32 %v1916_v32 }
 0x523   :  { %6904 = vrcp.f32 %v1913_v33 }
 0x525   :  { %v1919_v34 = vpop.xlane.xlu0 %1918  ;;  %v1922_v46 = vpop.xlane.xlu1 %1921 }
 0x526   :  { %6906 = vrcp.f32 %v1919_v34 }
 0x527   :  { %v6901_v29 = vpop.eup %6900  ;;  %6908 = vrcp.f32 %v1922_v46 }
 0x52a   :  { %v1928_v61 = vpop.xlane.xlu1 %1927 }
 0x52b   :  { %6910 = vrcp.f32 %v1928_v61 }
 0x52c   :  { %v6903_v7 = vpop.eup %6902 }
 0x52d   :  { %v6905_v45 = vpop.eup %6904 }
 0x52e   :  { %v1925_v58 = vpop.xlane.xlu0 %1924 }
 0x52f   :  { %6912 = vrcp.f32 %v1925_v58 }
 0x530   :  { %v6907_v3 = vpop.eup %6906 }
 0x531   :  { %v6909_v28 = vpop.eup %6908 }
 0x532   :  { %v1931_v47 = vpop.xlane.xlu0 %1930 }
 0x533   :  { %6914 = vrcp.f32 %v1931_v47  ;;  %v2839_v47 = vld [vmem:[#allocation7 + $0x18] sm:$0xff] }
 0x535   :  { %v6911_v34 = vpop.eup %6910 }
 0x561   :  { %v2001_v37 = vpop.f32.mrb[8].mxu1 }
 0x562   :  { %v6587_v38 = vpop.f32.mrb[9].mxu1  ;;  %v2517_v44 = vmul.f32 %v6901_v29, %v2001_v37 }
 0x565   :  { %v2074_v39 = vpop.f32.mrb[12].mxu0 }
 0x566   :  { %v2147_v41 = vpop.f32.mrb[10].mxu1  ;;  %v6592_v42 = vpop.f32.mrb[13].mxu0  ;;  %v2519_v50 = vmul.f32 %v6905_v45, %v2074_v39 }
 0x567   :  { %v2521_v49 = vmul.f32 %v6903_v7, %v2147_v41  ;;  %v6597_v51 = vpop.f32.mrb[11].mxu1  ;;  %v6913_v42 = vpop.eup %6912 }
 0x568   :  { %v6915_v51 = vpop.eup %6914 }
 0x569   :  { %v2532_v4 = vcombine.low %v2517_v44, %v2521_v49  ;;  %v2533_v8 = vcombine.high %v2517_v44, %v2521_v49  ;;  %v2220_v36 = vpop.f32.mrb[14].mxu0 }
 0x56a   :  { %v2523_v52 = vmul.f32 %v6907_v3, %v2220_v36  ;;  %v6602_v53 = vpop.f32.mrb[15].mxu0 }
 0x56b   :  { %v2540_v62 = vrot.slane %v2532_v4, %v7361_v35  ;;  %v2547_v63 = vrot.slane %v2533_v8, %v7361_v35 }
 0x56c   :  { %v2548_v59 = vcombine.low %v2519_v50, %v2523_v52  ;;  %v2549_v60 = vcombine.high %v2519_v50, %v2523_v52 }
 0x56e   :  { %v2556_v0 = vrot.slane %v2548_v59, %v7361_v35  ;;  %v2563_v1 = vrot.slane %v2549_v60, %v7361_v35 }
 0x570   :  { %v2564_v2 = vcombine.low %v2540_v62, %v2556_v0  ;;  %v2565_v5 = vcombine.high %v2540_v62, %v2556_v0  ;;  %v2580_v6 = vcombine.low %v2547_v63, %v2563_v1  ;;  %v2581_v9 = vcombine.high %v2547_v63, %v2563_v1 }
 0x572   :  { %v2572_v48 = vrot.slane %v2564_v2, %v7368_v43  ;;  %v2579_v10 = vrot.slane %v2565_v5, %v7368_v43  ;;  %v2588_v11 = vrot.slane %v2580_v6, %v7368_v43  ;;  %v2595_v14 = vrot.slane %v2581_v9, %v7368_v43  ;;  %v2838_v9 = vld [vmem:[#allocation7 + $0x10] sm:$0xff] }
 0x574   :  { %v2668_v15 = vcombine.low %v2572_v48, %v2579_v10  ;;  %v6318_v54 = vcombine.high %v2572_v48, %v2579_v10  ;;  %v2684_v55 = vcombine.low %v2588_v11, %v2595_v14  ;;  %v6319_v16 = vcombine.high %v2588_v11, %v2595_v14 }
 0x576   :  { %v2675_v19 = vrot.slane %v2668_v15, %v7361_v35  ;;  %v2683_v20 = vrot.slane %v6318_v54, %v7361_v35  ;;  %v2691_v26 = vrot.slane %v2684_v55, %v7361_v35  ;;  %v2699_v23 = vrot.slane %v6319_v16, %v7361_v35 }
 0x577   :  { %v6803_v15 = vpack.c.bf16 %v2839_v47, %v2838_v9  ;;  %v2976_v9 = vld [vmem:[#allocation9 + $0x8] sm:$0xff] }
 0x578   :  { %v2700_v24 = vcombine.low %v2675_v19, %v2683_v20  ;;  %v2716_v56 = vcombine.low %v2691_v26, %v2699_v23  ;;  %v2701_v22 = vcombine.high %v2675_v19, %v2683_v20  ;;  %v2717_v27 = vcombine.high %v2691_v26, %v2699_v23 }
 0x579   :  { %6804 = vmatprep.subr.bf16.mxu1 %v6803_v15 }
 0x57a   :  { %v7661_v30 = vrot.slane %v2700_v24, %v7368_v43  ;;  %v7664_v31 = vrot.slane %v2716_v56, %v7368_v43  ;;  %v7667_v32 = vrot.slane %v2701_v22, %v7368_v43  ;;  %v7670_v33 = vrot.slane %v2717_v27, %v7368_v43  ;;  %6806 = vmatpush3.bf16.msra.mxu1 %v6803_v15  ;;  %v3070_v15 = vld [vmem:[#allocation10 + $0x8] sm:$0xff] }
 0x57b   :  { %v2293_v37 = vpop.f32.mrb[12].mxu1  ;;  %v2366_v38 = vpop.f32.mrb[16].mxu0 }
 0x57c   :  { %v6607_v29 = vpop.f32.mrb[13].mxu1  ;;  %v6612_v39 = vpop.f32.mrb[17].mxu0  ;;  %v2733_v7 = vcombine.high %v7661_v30, %v7664_v31  ;;  %v2732_v41 = vcombine.low %v7661_v30, %v7664_v31  ;;  %v2734_v44 = vcombine.low %v7667_v32, %v7670_v33  ;;  %v2735_v49 = vcombine.high %v7667_v32, %v7670_v33  ;;  %v6322_v30 = vld [vmem:[%s8225_s7] ss:$0 sm:$0xff] }
 0x57d   :  { %v2525_v3 = vmul.f32 %v6909_v28, %v2293_v37  ;;  %v2527_v4 = vmul.f32 %v6913_v42, %v2366_v38 }
 0x57e   :  { %2806 = vrot.lane.b32.xlu1 %v2733_v7, %s7097_s22 }
 0x57f   :  { %v2439_v45 = vpop.f32.mrb[14].mxu1  ;;  %v2512_v46 = vpop.f32.mrb[18].mxu0 }
 0x580   :  { %v2529_v8 = vmul.f32 %v6911_v34, %v2439_v45  ;;  %v2531_v36 = vmul.f32 %v6915_v51, %v2512_v46  ;;  %v6617_v50 = vpop.f32.mrb[15].mxu1  ;;  %v6622_v52 = vpop.f32.mrb[19].mxu0 }
 0x582   :  { %v2600_v53 = vcombine.low %v2525_v3, %v2529_v8  ;;  %v2601_v58 = vcombine.high %v2525_v3, %v2529_v8  ;;  %v2616_v59 = vcombine.low %v2527_v4, %v2531_v36  ;;  %v2617_v60 = vcombine.high %v2527_v4, %v2531_v36  ;;  %2814 = vrot.lane.b32.xlu1 %v2734_v44, %s7112_s2 }
 0x584   :  { %v2608_v61 = vrot.slane %v2600_v53, %v7361_v35  ;;  %v2615_v62 = vrot.slane %v2601_v58, %v7361_v35  ;;  %v2624_v63 = vrot.slane %v2616_v59, %v7361_v35  ;;  %v2631_v0 = vrot.slane %v2617_v60, %v7361_v35 }
 0x586   :  { %v2632_v1 = vcombine.low %v2608_v61, %v2624_v63  ;;  %v2633_v2 = vcombine.high %v2608_v61, %v2624_v63  ;;  %v2648_v5 = vcombine.low %v2615_v62, %v2631_v0  ;;  %v2649_v6 = vcombine.high %v2615_v62, %v2631_v0 }
 0x588   :  { %v2640_v48 = vrot.slane %v2632_v1, %v7368_v43  ;;  %v2647_v10 = vrot.slane %v2633_v2, %v7368_v43  ;;  %v2656_v11 = vrot.slane %v2648_v5, %v7368_v43  ;;  %v2663_v14 = vrot.slane %v2649_v6, %v7368_v43 }
 0x58a   :  { %v2736_v54 = vcombine.low %v2640_v48, %v2647_v10  ;;  %v6320_v55 = vcombine.high %v2640_v48, %v2647_v10  ;;  %v2752_v16 = vcombine.low %v2656_v11, %v2663_v14  ;;  %v6321_v17 = vcombine.high %v2656_v11, %v2663_v14  ;;  %v2977_v48 = vld [vmem:[#allocation9 + $0x10] sm:$0xff]  ;;  %v2978_v10 = vld [vmem:[#allocation9 + $0x18] sm:$0xff]  ;;  %v3069_v14 = vld [vmem:[#allocation10] sm:$0xff] }
 0x58b   :  { %v6811_v11 = vpack.c.bf16 %v2978_v10, %v2977_v48 }
 0x58c   :  { %v2743_v18 = vrot.slane %v2736_v54, %v7361_v35  ;;  %v2751_v19 = vrot.slane %v6320_v55, %v7361_v35  ;;  %v2759_v20 = vrot.slane %v2752_v16, %v7361_v35  ;;  %v2767_v26 = vrot.slane %v6321_v17, %v7361_v35 }
 0x58d   :  { %v6815_v54 = vpack.c.bf16 %v3070_v15, %v3069_v14 }
 0x58e   :  { %v2769_v23 = vcombine.high %v2743_v18, %v2751_v19  ;;  %v2785_v21 = vcombine.high %v2759_v20, %v2767_v26  ;;  %v2768_v24 = vcombine.low %v2743_v18, %v2751_v19  ;;  %v2784_v56 = vcombine.low %v2759_v20, %v2767_v26 }
 0x58f   :  { %6816 = vmatprep.subr.bf16.mxu1 %v6815_v54 }
 0x590   :  { %v2783_v22 = vrot.slane %v2769_v23, %v7368_v43  ;;  %v2799_v27 = vrot.slane %v2785_v21, %v7368_v43  ;;  %v2776_v28 = vrot.slane %v2768_v24, %v7368_v43  ;;  %v2792_v32 = vrot.slane %v2784_v56, %v7368_v43  ;;  %v6325_v23 = vld [vmem:[%s8226_s8] ss:$0 sm:$0xff] }
 0x591   :  { %v6326_v24 = vld [vmem:[%s8227_s9] ss:$0 sm:$0xff] }
 0x592   :  { %v2802_v33 = vcombine.low %v2783_v22, %v2799_v27  ;;  %v2801_v34 = vcombine.high %v2776_v28, %v2792_v32  ;;  %v2800_v37 = vcombine.low %v2776_v28, %v2792_v32  ;;  %v2803_v38 = vcombine.high %v2783_v22, %v2799_v27 }
 0x594   :  { %2816 = vrot.lane.b32.xlu1 %v2802_v33, %s7112_s2  ;;  %2808 = vrot.lane.b32.xlu0 %v2801_v34, %s7097_s22  ;;  %v3071_v34 = vld [vmem:[#allocation10 + $0x10] sm:$0xff] }
 0x598   :  { %2824 = vrot.lane.b32.xlu1 %v2803_v38, %s7113_s12  ;;  %2822 = vrot.lane.b32.xlu0 %v2735_v49, %s7113_s12 }
 0x5f0   :  { %v2807_v29 = vpop.permute.xlu1 %2806 }
 0x5f1   :  { %v2828_v51 = vsel %vm1243_vm4, %v2732_v41, %v2807_v29  ;;  %v6327_v29 = vld [vmem:[%s8229_s11] ss:$0 sm:$0xff] }
 0x5f4   :  { %v2815_v39 = vpop.permute.xlu1 %2814 }
 0x5f5   :  { %v2831_v45 = vsel %vm2830_vm9, %v2828_v51, %v2815_v39 }
 0x606   :  { %v2809_v7 = vpop.permute.xlu0 %2808  ;;  %v2817_v42 = vpop.permute.xlu1 %2816 }
 0x607   :  { %v2829_v44 = vsel %vm1243_vm4, %v2800_v37, %v2809_v7  ;;  %v3072_v37 = vld [vmem:[#allocation10 + $0x18] sm:$0xff] }
 0x608   :  { %v2832_v46 = vsel %vm2830_vm9, %v2829_v44, %v2817_v42  ;;  %v6819_v38 = vpack.c.bf16 %v3072_v37, %v3071_v34 }
 0x60a   :  { %v2823_v3 = vpop.permute.xlu0 %2822  ;;  %v2825_v4 = vpop.permute.xlu1 %2824 }
 0x60b   :  { %v2834_v49 = vsel %vm2833_vm10, %v2831_v45, %v2823_v3  ;;  %v2835_v8 = vsel %vm2833_vm10, %v2832_v46, %v2825_v4  ;;  %v6330_v46 = vld [vmem:[%s8253_s26] ss:$0 sm:$0xff] }
 0x60c   :  { %6631 = vmatprep.mubr.msk.f32.mxu1 %vm277_vm2, %v2834_v49 }
 0x60d   :  { %6632 = vmatmul.mubr.msk.f32.vlgmr.msra.gmra.mrb[16].mxu1 %vm277_vm2, %v2835_v8 }
 0x60e   :  { %6818 = vmatpush3.bf16.msra.mxu1 %v6815_v54  ;;  %v6333_v54 = vld [vmem:[%s8232_s14] ss:$0 sm:$0xff] }
 0x60f   :  { %6820 = vmatprep.subr.bf16.mxu1 %v6819_v38 }
 0x612   :  { %6822 = vmatpush3.bf16.msra.mxu1 %v6819_v38 }
 0x613   :  { %6667 = vmatprep.subr.mxu1 %v7105_v25 }
 0x6e0   :  { %v6633_v31 = vpop.f32.mrb[16].mxu1 }
 0x6e1   :  { %v2925_v41 = vadd.f32 %v6633_v31, %v6322_v30  ;;  %v2919_v36 = vpop.f32.mrb[17].mxu1 }
 0x6e2   :  { %v2920_v50 = vadd.f32 %v6322_v30, %v2919_v36 }
 0x6e3   :  { %v2929_v52 = vadd.f32 %v2925_v41, %v7309_v13 }
 0x6e4   :  { %v2928_v53 = vadd.f32 %v2920_v50, %v7307_v12  ;;  %v2975_v12 = vld [vmem:[#allocation9] sm:$0xff] }
 0x6e5   :  { %v2935_v58 = vsel %vm277_vm2, %v2929_v52, 0.0  ;;  %v6807_v47 = vpack.c.bf16 %v2976_v9, %v2975_v12 }
 0x6e6   :  { %2936 = vadd.xlane.f32.xlu1 %v2935_v58  ;;  %v2932_v59 = vsel %vm277_vm2, %v2928_v53, 0.0 }
 0x6e7   :  { %2933 = vadd.xlane.f32.xlu0 %v2932_v59  ;;  %6808 = vmatprep.subr.bf16.mxu0 %v6807_v47 }
 0x6e8   :  { %6810 = vmatpush3.bf16.msra.mxu0 %v6807_v47 }
 0x6e9   :  { %6812 = vmatprep.subr.bf16.mxu0 %v6811_v11 }
 0x6ec   :  { %6814 = vmatpush3.bf16.msra.mxu0 %v6811_v11 }
 0x773   :  { %v2937_v60 = vpop.xlane.xlu1 %2936 }
 0x774   :  { %v2940_v61 = vmul.f32 0.03125, %v2937_v60  ;;  %v2934_v62 = vpop.xlane.xlu0 %2933 }
 0x775   :  { %v2939_v63 = vmul.f32 0.03125, %v2934_v62 }
 0x776   :  { %v2942_v0 = vsub.f32 %v2929_v52, %v2940_v61 }
 0x777   :  { %v2941_v1 = vsub.f32 %v2928_v53, %v2939_v63 }
 0x778   :  { %v2944_v6 = vmul.f32 %v2942_v0, %v2942_v0 }
 0x779   :  { %v2943_v2 = vmul.f32 %v2941_v1, %v2941_v1 }
 0x77a   :  { %v2948_v13 = vsel %vm277_vm2, %v2944_v6, 0.0  ;;  %v6337_v6 = vld [vmem:[%s8222_s4 + $0x30] sm:$0xff] }
 0x77b   :  { %v2945_v5 = vsel %vm277_vm2, %v2943_v2, 0.0  ;;  %v6336_v2 = vld [vmem:[%s8222_s4 + $0x28] sm:$0xff] }
 0x77c   :  { %2946 = vadd.xlane.f32.xlu0 %v2945_v5 }
 0x780   :  { %2949 = vadd.xlane.f32.xlu0 %v2948_v13  ;;  %v6338_v13 = vld [vmem:[%s8222_s4 + $0x38] sm:$0xff] }
 0x781   :  { %v6827_v12 = vpack.c.bf16 %v6338_v13, %v6337_v6 }
 0x809   :  { %v2947_v55 = vpop.xlane.xlu0 %2946 }
 0x80a   :  { %v2951_v16 = vmul.f32 0.03125, %v2947_v55 }
 0x80c   :  { %v2953_v17 = vadd.f32 1e-05, %v2951_v16 }
 0x80d   :  { %v2950_v18 = vpop.xlane.xlu0 %2949 }
 0x80e   :  { %6916 = vrsqrt.f32 %v2953_v17  ;;  %v2952_v19 = vmul.f32 0.03125, %v2950_v18  ;;  %v6334_v18 = vld [vmem:[%s8233_s15] ss:$0 sm:$0xff] }
 0x810   :  { %v2954_v20 = vadd.f32 1e-05, %v2952_v19 }
 0x812   :  { %6918 = vrsqrt.f32 %v2954_v20 }
 0x818   :  { %v6917_v26 = vpop.eup %6916 }
 0x819   :  { %v2957_v21 = vmul.f32 %v6917_v26, %v2941_v1  ;;  %v6335_v1 = vld [vmem:[%s8222_s4 + $0x20] sm:$0xff] }
 0x81a   :  { %v6823_v5 = vpack.c.bf16 %v6336_v2, %v6335_v1 }
 0x81b   :  { %v2965_v56 = vmul.f32 %v6325_v23, %v2957_v21  ;;  %v6340_v21 = vld [vmem:[%s8223_s5 + $0x1] ss:$0 sm:$0xff] }
 0x81c   :  { %v6919_v22 = vpop.eup %6918  ;;  %6824 = vmatprep.subr.bf16.mxu0 %v6823_v5 }
 0x81d   :  { %v2958_v27 = vmul.f32 %v6919_v22, %v2942_v0  ;;  %v2973_v28 = vadd.f32 %v6326_v24, %v2965_v56 }
 0x81f   :  { %v2966_v32 = vmul.f32 %v6325_v23, %v2958_v27  ;;  %6642 = vmatprep.mubr.msk.f32.mxu0 %vm277_vm2, %v2973_v28 }
 0x821   :  { %v2974_v33 = vadd.f32 %v6326_v24, %v2966_v32 }
 0x823   :  { %6643 = vmatmul.mubr.msk.f32.vlgmr.msra.gmra.mrb[20].mxu0 %vm277_vm2, %v2974_v33 }
 0x824   :  { %6826 = vmatpush3.bf16.msra.mxu0 %v6823_v5 }
 0x825   :  { %6828 = vmatprep.subr.bf16.mxu0 %v6827_v12 }
 0x828   :  { %6830 = vmatpush3.bf16.msra.mxu0 %v6827_v12 }
 0x829   :  { %6672 = vmatprep.subr.mxu0 %v7105_v25 }
 0x8f6   :  { %v6644_v39 = vpop.f32.mrb[20].mxu0 }
 0x8f7   :  { %v3064_v7 = vadd.f32 %v6644_v39, %v6327_v29  ;;  %v3058_v42 = vpop.f32.mrb[21].mxu0 }
 0x8f8   :  { %v3059_v44 = vadd.f32 %v6327_v29, %v3058_v42 }
 0x8f9   :  { %v3068_v45 = vmax.f32 %v3064_v7, 0.0 }
 0x8fa   :  { %v3067_v51 = vmax.f32 %v3059_v44, 0.0 }
 0x8fc   :  { %6653 = vmatprep.mubr.msk.f32.mxu1 %vm277_vm2, %v3067_v51 }
 0x8fd   :  { %6654 = vmatmul.mubr.msk.f32.vlgmr.msra.gmra.mrb[18].mxu1 %vm277_vm2, %v3068_v45 }
 0x8fe   :  { %6669 = vmatprep.mubr.msk.f32.mxu1 %vm7107_vm3, %v7105_v25 }
 0x9d0   :  { %v6655_v3 = vpop.f32.mrb[18].mxu1 }
 0x9d1   :  { %v3158_v4 = vadd.f32 %v6655_v3, %v6330_v46  ;;  %v3152_v49 = vpop.f32.mrb[19].mxu1 }
 0x9d2   :  { %v3153_v8 = vadd.f32 %v6330_v46, %v3152_v49 }
 0x9d3   :  { %v3162_v30 = vadd.f32 %v3158_v4, %v2974_v33 }
 0x9d4   :  { %v3161_v31 = vadd.f32 %v3153_v8, %v2973_v28 }
 0x9d5   :  { %v3168_v41 = vsel %vm277_vm2, %v3162_v30, 0.0 }
 0x9d6   :  { %3169 = vadd.xlane.f32.xlu0 %v3168_v41  ;;  %v3165_v36 = vsel %vm277_vm2, %v3161_v31, 0.0 }
 0x9d7   :  { %3166 = vadd.xlane.f32.xlu1 %v3165_v36 }
 0xa63   :  { %v3170_v50 = vpop.xlane.xlu0 %3169 }
 0xa64   :  { %v3172_v52 = vmul.f32 0.03125, %v3170_v50  ;;  %v3167_v53 = vpop.xlane.xlu1 %3166 }
 0xa65   :  { %v3171_v58 = vmul.f32 0.03125, %v3167_v53 }
 0xa66   :  { %v3174_v59 = vsub.f32 %v3162_v30, %v3172_v52 }
 0xa67   :  { %v3173_v60 = vsub.f32 %v3161_v31, %v3171_v58 }
 0xa68   :  { %v3176_v61 = vmul.f32 %v3174_v59, %v3174_v59 }
 0xa69   :  { %v3175_v62 = vmul.f32 %v3173_v60, %v3173_v60 }
 0xa6a   :  { %v3180_v63 = vsel %vm277_vm2, %v3176_v61, 0.0 }
 0xa6b   :  { %3181 = vadd.xlane.f32.xlu0 %v3180_v63  ;;  %v3177_v0 = vsel %vm277_vm2, %v3175_v62, 0.0 }
 0xa6c   :  { %3178 = vadd.xlane.f32.xlu1 %v3177_v0 }
 0xaf8   :  { %v3182_v9 = vpop.xlane.xlu0 %3181 }
 0xaf9   :  { %v3184_v47 = vmul.f32 0.03125, %v3182_v9  ;;  %v3179_v48 = vpop.xlane.xlu1 %3178 }
 0xafa   :  { %v3183_v10 = vmul.f32 0.03125, %v3179_v48 }
 0xafb   :  { %v3186_v11 = vadd.f32 1e-05, %v3184_v47 }
 0xafc   :  { %v3185_v14 = vadd.f32 1e-05, %v3183_v10 }
 0xafd   :  { %6920 = vrsqrt.f32 %v3186_v11 }
 0xafe   :  { %6922 = vrsqrt.f32 %v3185_v14 }
 0xb07   :  { %v6921_v15 = vpop.eup %6920 }
 0xb08   :  { %v6923_v55 = vpop.eup %6922  ;;  %v3190_v16 = vmul.f32 %v6921_v15, %v3174_v59 }
 0xb09   :  { %v3189_v17 = vmul.f32 %v6923_v55, %v3173_v60 }
 0xb0a   :  { %v3198_v19 = vmul.f32 %v6333_v54, %v3190_v16 }
 0xb0b   :  { %v3197_v20 = vmul.f32 %v6333_v54, %v3189_v17 }
 0xb0c   :  { %v7766_v23 = vadd.f32 %v6334_v18, %v3198_v19 }
 0xb0d   :  { %v7764_v26 = vadd.f32 %v6334_v18, %v3197_v20 }
 0xb0f   :  { %6664 = vmatprep.mubr.msk.f32.mxu0 %vm277_vm2, %v7764_v26 }
 0xb10   :  { %6665 = vmatmul.mubr.msk.f32.vlgmr.msra.gmra.mrb[22].mxu0 %vm277_vm2, %v7766_v23 }
 0xb11   :  { %6674 = vmatprep.mubr.msk.f32.mxu0 %vm7107_vm3, %v7105_v25 }
 0xbe3   :  { %v6666_v24 = vpop.f32.mrb[22].mxu0 }
 0xbe4   :  { %v3292_v56 = vpop.f32.mrb[23].mxu0  ;;  %v7779_v27 = vadd.f32 %v6666_v24, %v6340_v21 }
 0xbe5   :  { %v3293_v22 = vadd.f32 %v6340_v21, %v3292_v56 }
 0xbe7   :  { %3309 = vrot.lane.b32.xlu0 %v3293_v22, %s7103_s20  ;;  %3303 = vrot.lane.b32.xlu1 %v3293_v22, %s7102_s30 }
 0xbeb   :  { %3311 = vrot.lane.b32.xlu0 %v7779_v27, %s7103_s20  ;;  %3315 = vrot.lane.b32.xlu1 %v3293_v22, %s7101_s0 }
 0xbef   :  { %3593 = vrot.lane.b32.xlu0 %v3293_v22, %s7104_s25  ;;  %3305 = vrot.lane.b32.xlu1 %v7779_v27, %s7102_s30 }
 0xbf3   :  { %3317 = vrot.lane.b32.xlu1 %v7779_v27, %s7101_s0 }
 0xc59   :  { %v3310_v28 = vpop.permute.xlu0 %3309  ;;  %v3304_v32 = vpop.permute.xlu1 %3303 }
 0xc5a   :  { %3601 = vrot.lane.b32.xlu0 %v3310_v28, %s7104_s25  ;;  %3597 = vrot.lane.b32.xlu1 %v3304_v32, %s7104_s25  ;;  %v3321_v33 = vcombine.low %v3293_v22, %v3310_v28  ;;  %v3322_v34 = vcombine.high %v3293_v22, %v3310_v28 }
 0xc5c   :  { %v3329_v39 = vrot.slane %v3321_v33, %v7361_v35  ;;  %v3336_v7 = vrot.slane %v3322_v34, %v7361_v35 }
 0xc5d   :  { %v3316_v37 = vpop.permute.xlu1 %3315  ;;  %v7798_v51 = vpop.permute.xlu0 %3311 }
 0xc5e   :  { %v3337_v38 = vcombine.low %v3304_v32, %v3316_v37  ;;  %v3338_v29 = vcombine.high %v3304_v32, %v3316_v37  ;;  %3595 = vrot.lane.b32.xlu0 %v7779_v27, %s7104_s25  ;;  %3605 = vrot.lane.b32.xlu1 %v3316_v37, %s7104_s25  ;;  %v3389_v15 = vcombine.low %v7779_v27, %v7798_v51 }
 0xc5f   :  { %v3390_v55 = vcombine.high %v7779_v27, %v7798_v51 }
 0xc60   :  { %v3345_v42 = vrot.slane %v3337_v38, %v7361_v35  ;;  %v3352_v44 = vrot.slane %v3338_v29, %v7361_v35  ;;  %v3397_v19 = vrot.slane %v3389_v15, %v7361_v35 }
 0xc61   :  { %v3306_v45 = vpop.permute.xlu1 %3305  ;;  %v3594_v14 = vpop.permute.xlu0 %3593  ;;  %v3404_v21 = vrot.slane %v3390_v55, %v7361_v35 }
 0xc62   :  { %v3353_v46 = vcombine.low %v3329_v39, %v3345_v42  ;;  %v3354_v3 = vcombine.high %v3329_v39, %v3345_v42  ;;  %v3369_v4 = vcombine.low %v3336_v7, %v3352_v44  ;;  %v3370_v49 = vcombine.high %v3336_v7, %v3352_v44  ;;  %3603 = vrot.lane.b32.xlu0 %v7798_v51, %s7104_s25 }
 0xc63   :  { %3599 = vrot.lane.b32.xlu1 %v3306_v45, %s7104_s25 }
 0xc64   :  { %v3361_v8 = vrot.slane %v3353_v46, %v7368_v43  ;;  %v3368_v30 = vrot.slane %v3354_v3, %v7368_v43  ;;  %v3377_v31 = vrot.slane %v3369_v4, %v7368_v43  ;;  %v3384_v41 = vrot.slane %v3370_v49, %v7368_v43 }
 0xc65   :  { %v7807_v36 = vpop.permute.xlu1 %3317 }
 0xc66   :  { %v3457_v50 = vcombine.low %v3361_v8, %v3368_v30  ;;  %v6343_v52 = vcombine.high %v3361_v8, %v3368_v30  ;;  %v3473_v53 = vcombine.low %v3377_v31, %v3384_v41  ;;  %v6344_v58 = vcombine.high %v3377_v31, %v3384_v41  ;;  %3891 = vrot.lane.b32.xlu0 %v7779_v27, %s7106_s29 }
 0xc67   :  { %3607 = vrot.lane.b32.xlu1 %v7807_v36, %s7104_s25  ;;  %v3405_v11 = vcombine.low %v3306_v45, %v7807_v36  ;;  %v3406_v54 = vcombine.high %v3306_v45, %v7807_v36 }
 0xc68   :  { %v3464_v59 = vrot.slane %v3457_v50, %v7361_v35  ;;  %v3472_v60 = vrot.slane %v6343_v52, %v7361_v35  ;;  %v3480_v61 = vrot.slane %v3473_v53, %v7361_v35  ;;  %v3488_v62 = vrot.slane %v6344_v58, %v7361_v35 }
 0xc69   :  { %v3413_v16 = vrot.slane %v3405_v11, %v7361_v35  ;;  %v3420_v20 = vrot.slane %v3406_v54, %v7361_v35 }
 0xc6a   :  { %3893 = vrot.lane.b32.xlu0 %v3304_v32, %s7106_s29  ;;  %v3489_v63 = vcombine.low %v3464_v59, %v3472_v60  ;;  %v3505_v0 = vcombine.low %v3480_v61, %v3488_v62  ;;  %v3490_v1 = vcombine.high %v3464_v59, %v3472_v60  ;;  %v3506_v2 = vcombine.high %v3480_v61, %v3488_v62 }
 0xc6b   :  { %3889 = vrot.lane.b32.xlu1 %v3293_v22, %s7106_s29  ;;  %v3421_v24 = vcombine.low %v3397_v19, %v3413_v16  ;;  %v3422_v56 = vcombine.high %v3397_v19, %v3413_v16  ;;  %v3437_v33 = vcombine.low %v3404_v21, %v3420_v20  ;;  %v3438_v34 = vcombine.high %v3404_v21, %v3420_v20 }
 0xc6c   :  { %v7820_v5 = vrot.slane %v3489_v63, %v7368_v43  ;;  %v7823_v6 = vrot.slane %v3505_v0, %v7368_v43  ;;  %v7826_v13 = vrot.slane %v3490_v1, %v7368_v43  ;;  %v7829_v12 = vrot.slane %v3506_v2, %v7368_v43 }
 0xc6d   :  { %v3429_v29 = vrot.slane %v3421_v24, %v7368_v43  ;;  %v3436_v39 = vrot.slane %v3422_v56, %v7368_v43  ;;  %v3445_v46 = vrot.slane %v3437_v33, %v7368_v43  ;;  %v3452_v3 = vrot.slane %v3438_v34, %v7368_v43 }
 0xc6e   :  { %v3521_v9 = vcombine.low %v7820_v5, %v7823_v6  ;;  %v3522_v47 = vcombine.high %v7820_v5, %v7823_v6  ;;  %v3523_v48 = vcombine.low %v7826_v13, %v7829_v12  ;;  %v3524_v10 = vcombine.high %v7826_v13, %v7829_v12 }
 0xc6f   :  { %3895 = vrot.lane.b32.xlu1 %v3306_v45, %s7106_s29  ;;  %v3525_v50 = vcombine.low %v3429_v29, %v3436_v39  ;;  %v6345_v52 = vcombine.high %v3429_v29, %v3436_v39  ;;  %v3541_v61 = vcombine.low %v3445_v46, %v3452_v3  ;;  %v6346_v62 = vcombine.high %v3445_v46, %v3452_v3 }
 0xc71   :  { %v7865_v54 = vrot.slane %v3525_v50, %v7361_v35  ;;  %v7868_v55 = vrot.slane %v6345_v52, %v7361_v35 }
 0xc73   :  { %3897 = vrot.lane.b32.xlu1 %v3310_v28, %s7106_s29 }
 0xc77   :  { %3901 = vrot.lane.b32.xlu1 %v3316_v37, %s7106_s29 }
 0xccc   :  { %v3602_v17 = vpop.permute.xlu0 %3601  ;;  %v3598_v18 = vpop.permute.xlu1 %3597 }
 0xccd   :  { %v3617_v22 = vcombine.low %v3594_v14, %v3602_v17  ;;  %v3618_v28 = vcombine.high %v3594_v14, %v3602_v17 }
 0xccf   :  { %v3625_v7 = vrot.slane %v3617_v22, %v7361_v35  ;;  %v3632_v42 = vrot.slane %v3618_v28, %v7361_v35 }
 0xcd0   :  { %v3596_v32 = vpop.permute.xlu0 %3595  ;;  %v3606_v37 = vpop.permute.xlu1 %3605 }
 0xcd1   :  { %v3633_v38 = vcombine.low %v3598_v18, %v3606_v37  ;;  %v3634_v27 = vcombine.high %v3598_v18, %v3606_v37 }
 0xcd3   :  { %v3641_v44 = vrot.slane %v3633_v38, %v7361_v35  ;;  %v3648_v45 = vrot.slane %v3634_v27, %v7361_v35 }
 0xcd4   :  { %v3604_v41 = vpop.permute.xlu0 %3603 }
 0xcd5   :  { %v3600_v4 = vpop.permute.xlu1 %3599  ;;  %v3649_v49 = vcombine.low %v3625_v7, %v3641_v44  ;;  %v3650_v8 = vcombine.high %v3625_v7, %v3641_v44  ;;  %v3665_v30 = vcombine.low %v3632_v42, %v3648_v45  ;;  %v3666_v31 = vcombine.high %v3632_v42, %v3648_v45 }
 0xcd6   :  { %v3685_v63 = vcombine.low %v3596_v32, %v3604_v41  ;;  %v3686_v0 = vcombine.high %v3596_v32, %v3604_v41  ;;  %v7881_v42 = vrot.slane %v3541_v61, %v7361_v35  ;;  %v7884_v44 = vrot.slane %v6346_v62, %v7361_v35 }
 0xcd7   :  { %v3657_v53 = vrot.slane %v3649_v49, %v7368_v43  ;;  %v3664_v58 = vrot.slane %v3650_v8, %v7368_v43  ;;  %v3673_v59 = vrot.slane %v3665_v30, %v7368_v43  ;;  %v3680_v60 = vrot.slane %v3666_v31, %v7368_v43 }
 0xcd8   :  { %v3693_v24 = vrot.slane %v3685_v63, %v7361_v35  ;;  %v3700_v56 = vrot.slane %v3686_v0, %v7361_v35  ;;  %v3557_v62 = vcombine.low %v7865_v54, %v7868_v55  ;;  %v3573_v63 = vcombine.low %v7881_v42, %v7884_v44 }
 0xcd9   :  { %v3608_v1 = vpop.permute.xlu1 %3607  ;;  %v3753_v2 = vcombine.low %v3657_v53, %v3664_v58  ;;  %v6347_v11 = vcombine.high %v3657_v53, %v3664_v58  ;;  %v3769_v14 = vcombine.low %v3673_v59, %v3680_v60  ;;  %v6348_v15 = vcombine.high %v3673_v59, %v3680_v60  ;;  %v7896_v53 = vpop.permute.xlu0 %3891 }
 0xcda   :  { %v3701_v16 = vcombine.low %v3600_v4, %v3608_v1  ;;  %v3702_v17 = vcombine.high %v3600_v4, %v3608_v1  ;;  %v3558_v0 = vcombine.high %v7865_v54, %v7868_v55  ;;  %v3574_v54 = vcombine.high %v7881_v42, %v7884_v44 }
 0xcdb   :  { %v3760_v18 = vrot.slane %v3753_v2, %v7361_v35  ;;  %v3768_v19 = vrot.slane %v6347_v11, %v7361_v35  ;;  %v3776_v20 = vrot.slane %v3769_v14, %v7361_v35  ;;  %v3784_v21 = vrot.slane %v6348_v15, %v7361_v35 }
 0xcdc   :  { %v3709_v22 = vrot.slane %v3701_v16, %v7361_v35  ;;  %v3716_v28 = vrot.slane %v3702_v17, %v7361_v35  ;;  %v3572_v42 = vrot.slane %v3558_v0, %v7368_v43  ;;  %v3588_v44 = vrot.slane %v3574_v54, %v7368_v43 }
 0xcdd   :  { %v7878_v32 = vpop.permute.xlu1 %3889  ;;  %v3785_v33 = vcombine.low %v3760_v18, %v3768_v19  ;;  %v3786_v34 = vcombine.high %v3760_v18, %v3768_v19  ;;  %v3801_v37 = vcombine.low %v3776_v20, %v3784_v21  ;;  %v3802_v38 = vcombine.high %v3776_v20, %v3784_v21 }
 0xcde   :  { %v3717_v27 = vcombine.low %v3693_v24, %v3709_v22  ;;  %v3718_v29 = vcombine.high %v3693_v24, %v3709_v22  ;;  %v3733_v39 = vcombine.low %v3700_v56, %v3716_v28  ;;  %v3734_v7 = vcombine.high %v3700_v56, %v3716_v28  ;;  %v3894_v28 = vpop.permute.xlu0 %3893 }
 0xcdf   :  { %v3793_v45 = vrot.slane %v3785_v33, %v7368_v43  ;;  %v3809_v46 = vrot.slane %v3801_v37, %v7368_v43  ;;  %v3800_v50 = vrot.slane %v3786_v34, %v7368_v43  ;;  %v3816_v52 = vrot.slane %v3802_v38, %v7368_v43 }
 0xce0   :  { %v3725_v3 = vrot.slane %v3717_v27, %v7368_v43  ;;  %v3732_v4 = vrot.slane %v3718_v29, %v7368_v43  ;;  %v3741_v49 = vrot.slane %v3733_v39, %v7368_v43  ;;  %v3748_v8 = vrot.slane %v3734_v7, %v7368_v43 }
 0xce1   :  { %v7892_v30 = vpop.permute.xlu1 %3895  ;;  %v3817_v31 = vcombine.low %v3793_v45, %v3809_v46  ;;  %v3818_v41 = vcombine.high %v3793_v45, %v3809_v46  ;;  %v3819_v17 = vcombine.low %v3800_v50, %v3816_v52  ;;  %v3820_v18 = vcombine.high %v3800_v50, %v3816_v52 }
 0xce2   :  { %v3821_v58 = vcombine.low %v3725_v3, %v3732_v4  ;;  %v6349_v59 = vcombine.high %v3725_v3, %v3732_v4  ;;  %v3837_v60 = vcombine.low %v3741_v49, %v3748_v8  ;;  %v6350_v61 = vcombine.high %v3741_v49, %v3748_v8 }
 0xce3   :  { %6668 = vmatpush3.xpose.msk.msra.mxu1 %vm1243_vm4, %v3817_v31  ;;  %6673 = vmatpush3.xpose.msk.msra.mxu0 %vm1243_vm4, %v3818_v41  ;;  %v3565_v56 = vrot.slane %v3557_v62, %v7368_v43  ;;  %v3581_v22 = vrot.slane %v3573_v63, %v7368_v43  ;;  %v3591_v50 = vcombine.low %v3572_v42, %v3588_v44 }
 0xce4   :  { %v3828_v1 = vrot.slane %v3821_v58, %v7361_v35  ;;  %v3836_v2 = vrot.slane %v6349_v59, %v7361_v35  ;;  %v3844_v11 = vrot.slane %v3837_v60, %v7361_v35  ;;  %v3852_v14 = vrot.slane %v6350_v61, %v7361_v35  ;;  %6677 = vmatprep.subr.mxu1 %v7105_v25 }
 0xce5   :  { %v3898_v15 = vpop.permute.xlu1 %3897  ;;  %6682 = vmatprep.subr.mxu0 %v7105_v25  ;;  %v3590_v13 = vcombine.high %v3565_v56, %v3581_v22  ;;  %v3592_v61 = vcombine.high %v3572_v42, %v3588_v44 }
 0xce6   :  { %v3913_v16 = vcombine.low %v7878_v32, %v3898_v15  ;;  %v3853_v55 = vcombine.low %v3828_v1, %v3836_v2  ;;  %v3854_v19 = vcombine.high %v3828_v1, %v3836_v2  ;;  %v3869_v20 = vcombine.low %v3844_v11, %v3852_v14  ;;  %6670 = vmatmul.mubr.msk.f32.vlgmr.msra.gmra.mrb[20].mxu1 %vm1243_vm4, %v3521_v9 }
 0xce7   :  { %v3870_v21 = vcombine.high %v3844_v11, %v3852_v14  ;;  %v3914_v24 = vcombine.high %v7878_v32, %v3898_v15  ;;  %6675 = vmatmul.mubr.msk.f32.vlgmr.msra.gmra.mrb[24].mxu0 %vm1243_vm4, %v3522_v47  ;;  %6678 = vmatpush3.xpose.msk.msra.mxu1 %vm1243_vm4, %v3819_v17 }
 0xce8   :  { %v3921_v33 = vrot.slane %v3913_v16, %v7361_v35  ;;  %6683 = vmatpush3.xpose.msk.msra.mxu0 %vm1243_vm4, %v3820_v18  ;;  %6679 = vmatprep.mubr.msk.f32.mxu1 %vm7107_vm3, %v7105_v25  ;;  %v3861_v9 = vrot.slane %v3853_v55, %v7368_v43  ;;  %v3877_v5 = vrot.slane %v3869_v20, %v7368_v43 }
 0xce9   :  { %v3902_v34 = vpop.permute.xlu1 %3901  ;;  %6684 = vmatprep.mubr.msk.f32.mxu0 %vm7107_vm3, %v7105_v25  ;;  %6687 = vmatprep.subr.mxu1 %v7105_v25  ;;  %v3868_v32 = vrot.slane %v3854_v19, %v7368_v43  ;;  %v3884_v27 = vrot.slane %v3870_v21, %v7368_v43  ;;  %v3928_v29 = vrot.slane %v3914_v24, %v7361_v35 }
 0xcea   :  { %v3929_v6 = vcombine.low %v3894_v28, %v3902_v34  ;;  %v3930_v47 = vcombine.high %v3894_v28, %v3902_v34  ;;  %6680 = vmatmul.mubr.msk.f32.vlgmr.msra.gmra.mrb[22].mxu1 %vm1243_vm4, %v3523_v48  ;;  %6692 = vmatprep.subr.mxu0 %v7105_v25  ;;  %v3885_v37 = vcombine.low %v3861_v9, %v3877_v5 }
 0xceb   :  { %v3886_v38 = vcombine.high %v3861_v9, %v3877_v5  ;;  %6685 = vmatmul.mubr.msk.f32.vlgmr.msra.gmra.mrb[26].mxu0 %vm1243_vm4, %v3524_v10  ;;  %6689 = vmatprep.mubr.msk.f32.mxu1 %vm7107_vm3, %v7105_v25  ;;  %v3589_v48 = vcombine.low %v3565_v56, %v3581_v22  ;;  %v3887_v12 = vcombine.low %v3868_v32, %v3884_v27 }
 0xcec   :  { %v3937_v39 = vrot.slane %v3929_v6, %v7361_v35  ;;  %v3944_v7 = vrot.slane %v3930_v47, %v7361_v35  ;;  %6688 = vmatpush3.xpose.msk.msra.mxu1 %vm1243_vm4, %v3885_v37  ;;  %6694 = vmatprep.mubr.msk.f32.mxu0 %vm7107_vm3, %v7105_v25  ;;  %v3888_v10 = vcombine.high %v3868_v32, %v3884_v27 }
 0xced   :  { %6693 = vmatpush3.xpose.msk.msra.mxu0 %vm1243_vm4, %v3886_v38  ;;  %6697 = vmatprep.subr.mxu1 %v7105_v25 }
 0xcee   :  { %v3945_v45 = vcombine.low %v3921_v33, %v3937_v39  ;;  %v3946_v46 = vcombine.high %v3921_v33, %v3937_v39  ;;  %v3961_v3 = vcombine.low %v3928_v29, %v3944_v7  ;;  %v3962_v4 = vcombine.high %v3928_v29, %v3944_v7  ;;  %6702 = vmatprep.subr.mxu0 %v7105_v25 }
 0xcef   :  { %6690 = vmatmul.mubr.msk.f32.vlgmr.msra.gmra.mrb[24].mxu1 %vm1243_vm4, %v3589_v48 }
 0xcf0   :  { %v3953_v49 = vrot.slane %v3945_v45, %v7368_v43  ;;  %v3960_v8 = vrot.slane %v3946_v46, %v7368_v43  ;;  %v3969_v31 = vrot.slane %v3961_v3, %v7368_v43  ;;  %v3976_v41 = vrot.slane %v3962_v4, %v7368_v43  ;;  %6695 = vmatmul.mubr.msk.f32.vlgmr.msra.gmra.mrb[28].mxu0 %vm1243_vm4, %v3590_v13 }
 0xcf1   :  { %6698 = vmatpush3.xpose.msk.msra.mxu1 %vm1243_vm4, %v3887_v12  ;;  %6703 = vmatpush3.xpose.msk.msra.mxu0 %vm1243_vm4, %v3888_v10 }
 0xcf2   :  { %v4049_v52 = vcombine.low %v3953_v49, %v3960_v8  ;;  %v6351_v58 = vcombine.high %v3953_v49, %v3960_v8  ;;  %v4065_v59 = vcombine.low %v3969_v31, %v3976_v41  ;;  %v6352_v60 = vcombine.high %v3969_v31, %v3976_v41  ;;  %6699 = vmatprep.mubr.msk.f32.mxu1 %vm7107_vm3, %v7105_v25 }
 0xcf3   :  { %6704 = vmatprep.mubr.msk.f32.mxu0 %vm7107_vm3, %v7105_v25  ;;  %6707 = vmatprep.subr.mxu1 %v7105_v25 }
 0xcf4   :  { %v4056_v62 = vrot.slane %v4049_v52, %v7361_v35  ;;  %v4064_v63 = vrot.slane %v6351_v58, %v7361_v35  ;;  %v4072_v0 = vrot.slane %v4065_v59, %v7361_v35  ;;  %v4080_v1 = vrot.slane %v6352_v60, %v7361_v35  ;;  %6700 = vmatmul.mubr.msk.f32.vlgmr.msra.gmra.mrb[26].mxu1 %vm1243_vm4, %v3591_v50 }
 0xcf5   :  { %6705 = vmatmul.mubr.msk.f32.vlgmr.msra.gmra.mrb[30].mxu0 %vm1243_vm4, %v3592_v61  ;;  %6712 = vmatprep.subr.mxu0 %v7105_v25 }
 0xcf6   :  { %v4081_v2 = vcombine.low %v4056_v62, %v4064_v63  ;;  %v4097_v11 = vcombine.low %v4072_v0, %v4080_v1  ;;  %6709 = vmatprep.mubr.msk.f32.mxu1 %vm7107_vm3, %v7105_v25  ;;  %v4082_v14 = vcombine.high %v4056_v62, %v4064_v63  ;;  %6714 = vmatprep.mubr.msk.f32.mxu0 %vm7107_vm3, %v7105_v25 }
 0xcf7   :  { %v4098_v15 = vcombine.high %v4072_v0, %v4080_v1 }
 0xcf8   :  { %v4089_v16 = vrot.slane %v4081_v2, %v7368_v43  ;;  %v4105_v17 = vrot.slane %v4097_v11, %v7368_v43  ;;  %v7987_v18 = vrot.slane %v4082_v14, %v7368_v43 }
 0xcf9   :  { %v7990_v54 = vrot.slane %v4098_v15, %v7368_v43 }
 0xcfa   :  { %v4113_v55 = vcombine.low %v4089_v16, %v4105_v17  ;;  %v4114_v19 = vcombine.high %v4089_v16, %v4105_v17 }
 0xcfb   :  { %v4115_v20 = vcombine.low %v7987_v18, %v7990_v54  ;;  %v4116_v21 = vcombine.high %v7987_v18, %v7990_v54 }
 0xcfc   :  { %6708 = vmatpush3.msra.mxu1 %v4113_v55  ;;  %6713 = vmatpush3.msra.mxu0 %v4114_v19 }
 0xcfd   :  { %6717 = vmatprep.subr.mxu1 %v7105_v25  ;;  %6722 = vmatprep.subr.mxu0 %v7105_v25 }
 0xdb9   :  { %v4257_v24 = vpop.f32.mrb[20].mxu1 }
 0xdba   :  { %v4793_v56 = vadd.f32 %v4257_v24, %v7566_v57  ;;  %v4333_v22 = vpop.f32.mrb[24].mxu0  ;;  %v6671_v28 = vpop.f32.mrb[21].mxu1 }
 0xdbb   :  { %v4794_v33 = vadd.f32 %v4333_v22, %v7566_v57  ;;  %v6676_v34 = vpop.f32.mrb[25].mxu0 }
 0xdbc   :  { %v4801_v9 = vsel %vm1243_vm4, %v4793_v56, -inf }
 0xdbd   :  { %v4804_v5 = vsel %vm1243_vm4, %v4794_v33, -inf  ;;  %4802 = vmax.xlane.f32.xlu0 %v4801_v9  ;;  %v4409_v6 = vpop.f32.mrb[22].mxu1 }
 0xdbe   :  { %4805 = vmax.xlane.f32.xlu1 %v4804_v5  ;;  %v4485_v47 = vpop.f32.mrb[26].mxu0  ;;  %v4795_v32 = vadd.f32 %v4409_v6, %v7566_v57  ;;  %v6681_v37 = vpop.f32.mrb[23].mxu1 }
 0xdbf   :  { %v6686_v38 = vpop.f32.mrb[27].mxu0  ;;  %v4796_v27 = vadd.f32 %v4485_v47, %v7566_v57 }
 0xdc0   :  { %v4807_v29 = vsel %vm1243_vm4, %v4795_v32, -inf }
 0xdc1   :  { %4808 = vmax.xlane.f32.xlu0 %v4807_v29  ;;  %v4810_v46 = vsel %vm1243_vm4, %v4796_v27, -inf }
 0xdc2   :  { %v4561_v39 = vpop.f32.mrb[24].mxu1 }
 0xdc3   :  { %v4797_v7 = vadd.f32 %v4561_v39, %v7572_v40  ;;  %v4637_v48 = vpop.f32.mrb[28].mxu0  ;;  %v6691_v42 = vpop.f32.mrb[25].mxu1 }
 0xdc4   :  { %v4798_v44 = vadd.f32 %v4637_v48, %v7572_v40  ;;  %v6696_v45 = vpop.f32.mrb[29].mxu0 }
 0xdc5   :  { %4811 = vmax.xlane.f32.xlu0 %v4810_v46  ;;  %v4813_v3 = vsel %vm1243_vm4, %v4797_v7, -inf }
 0xdc6   :  { %4814 = vmax.xlane.f32.xlu1 %v4813_v3  ;;  %v4816_v8 = vsel %vm1243_vm4, %v4798_v44, -inf }
 0xdc7   :  { %v4713_v4 = vpop.f32.mrb[26].mxu1 }
 0xdc8   :  { %v4789_v13 = vpop.f32.mrb[30].mxu0  ;;  %v6701_v57 = vpop.f32.mrb[27].mxu1  ;;  %v4799_v10 = vadd.f32 %v4713_v4, %v7572_v40 }
 0xdc9   :  { %v4800_v12 = vadd.f32 %v4789_v13, %v7572_v40  ;;  %v6706_v49 = vpop.f32.mrb[31].mxu0  ;;  %4817 = vmax.xlane.f32.xlu0 %v4816_v8 }
 0xdca   :  { %v4819_v41 = vsel %vm1243_vm4, %v4799_v10, -inf }
 0xdcb   :  { %v4822_v31 = vsel %vm1243_vm4, %v4800_v12, -inf }
 0xdcc   :  { %4823 = vmax.xlane.f32.xlu1 %v4822_v31 }
 0xdcd   :  { %4820 = vmax.xlane.f32.xlu0 %v4819_v41 }
 0xddd   :  { %3903 = vrot.lane.b32.xlu1 %v7807_v36, %s7106_s29 }
 0xde3   :  { %3899 = vrot.lane.b32.xlu0 %v7798_v51, %s7106_s29 }
 0xe4a   :  { %v4803_v50 = vpop.xlane.xlu0 %4802 }
 0xe4b   :  { %v4825_v52 = vsub.f32 %v4793_v56, %v4803_v50  ;;  %v4806_v58 = vpop.xlane.xlu1 %4805 }
 0xe4c   :  { %v4826_v40 = vsub.f32 %v4794_v33, %v4806_v58 }
 0xe4d   :  { %v4833_v59 = vmul.f32 1.442695, %v4825_v52 }
 0xe4e   :  { %v4835_v60 = vmul.f32 1.442695, %v4826_v40  ;;  %v4809_v61 = vpop.xlane.xlu0 %4808 }
 0xe4f   :  { %6924 = vpow2.f32 %v4833_v59  ;;  %v4827_v62 = vsub.f32 %v4795_v32, %v4809_v61 }
 0xe50   :  { %6926 = vpow2.f32 %v4835_v60 }
 0xe51   :  { %v4837_v63 = vmul.f32 1.442695, %v4827_v62 }
 0xe52   :  { %v4812_v0 = vpop.xlane.xlu0 %4811 }
 0xe53   :  { %6928 = vpow2.f32 %v4837_v63  ;;  %v4828_v1 = vsub.f32 %v4796_v27, %v4812_v0  ;;  %v4815_v2 = vpop.xlane.xlu1 %4814 }
 0xe54   :  { %v4829_v11 = vsub.f32 %v4797_v7, %v4815_v2 }
 0xe55   :  { %v4839_v36 = vmul.f32 1.442695, %v4828_v1 }
 0xe56   :  { %v4841_v14 = vmul.f32 1.442695, %v4829_v11  ;;  %v4818_v15 = vpop.xlane.xlu0 %4817 }
 0xe57   :  { %6930 = vpow2.f32 %v4839_v36  ;;  %v4830_v51 = vsub.f32 %v4798_v44, %v4818_v15 }
 0xe58   :  { %6932 = vpow2.f32 %v4841_v14 }
 0xe59   :  { %v4824_v16 = vpop.xlane.xlu1 %4823  ;;  %v6925_v17 = vpop.eup %6924  ;;  %v4843_v55 = vmul.f32 1.442695, %v4830_v51 }
 0xe5a   :  { %v4832_v19 = vsub.f32 %v4800_v12, %v4824_v16  ;;  %v6927_v24 = vpop.eup %6926  ;;  %v4821_v56 = vpop.xlane.xlu0 %4820  ;;  %6710 = vmatmul.mubr.msk.f32.vlgmr.msra.gmra.mrb[28].mxu1 %vm1243_vm4, %v6925_v17  ;;  %v4849_v22 = vsel %vm1243_vm4, %v6925_v17, 0.0 }
 0xe5b   :  { %6934 = vpow2.f32 %v4843_v55  ;;  %v4831_v33 = vsub.f32 %v4799_v10, %v4821_v56  ;;  %6715 = vmatmul.mubr.msk.f32.vlgmr.msra.gmra.mrb[32].mxu0 %vm1243_vm4, %v6927_v24  ;;  %6718 = vmatpush3.msra.mxu1 %v4115_v20  ;;  %v4852_v34 = vsel %vm1243_vm4, %v6927_v24, 0.0 }
 0xe5c   :  { %v4847_v28 = vmul.f32 1.442695, %v4832_v19  ;;  %6723 = vmatpush3.msra.mxu0 %v4116_v21  ;;  %4850 = vadd.xlane.f32.xlu0 %v4849_v22 }
 0xe5d   :  { %v3904_v9 = vpop.permute.xlu1 %3903  ;;  %v6929_v5 = vpop.eup %6928  ;;  %v4845_v6 = vmul.f32 1.442695, %v4831_v33  ;;  %4853 = vadd.xlane.f32.xlu1 %v4852_v34  ;;  %6719 = vmatprep.mubr.msk.f32.mxu1 %vm7107_vm3, %v7105_v25 }
 0xe5e   :  { %v3997_v47 = vcombine.low %v7892_v30, %v3904_v9  ;;  %6936 = vpow2.f32 %v4847_v28  ;;  %v3998_v32 = vcombine.high %v7892_v30, %v3904_v9  ;;  %v3900_v20 = vpop.permute.xlu0 %3899  ;;  %6720 = vmatmul.mubr.msk.f32.vlgmr.msra.gmra.mrb[30].mxu1 %vm1243_vm4, %v6929_v5  ;;  %v4855_v37 = vsel %vm1243_vm4, %v6929_v5, 0.0  ;;  %6724 = vmatprep.mubr.msk.f32.mxu0 %vm7107_vm3, %v7105_v25 }
 0xe5f   :  { %6938 = vpow2.f32 %v4845_v6  ;;  %v3981_v18 = vcombine.low %v7896_v53, %v3900_v20  ;;  %6727 = vmatprep.subr.mxu1 %v7105_v25  ;;  %6732 = vmatprep.subr.mxu0 %v7105_v25  ;;  %v3982_v54 = vcombine.high %v7896_v53, %v3900_v20 }
 0xe60   :  { %4856 = vadd.xlane.f32.xlu0 %v4855_v37  ;;  %6729 = vmatprep.mubr.msk.f32.mxu1 %vm7107_vm3, %v7105_v25  ;;  %v4005_v21 = vrot.slane %v3997_v47, %v7361_v35  ;;  %v4012_v29 = vrot.slane %v3998_v32, %v7361_v35 }
 0xe61   :  { %v6931_v30 = vpop.eup %6930  ;;  %v3989_v38 = vrot.slane %v3981_v18, %v7361_v35  ;;  %v3996_v39 = vrot.slane %v3982_v54, %v7361_v35 }
 0xe62   :  { %v6933_v27 = vpop.eup %6932  ;;  %6725 = vmatmul.mubr.msk.f32.vlgmr.msra.gmra.mrb[34].mxu0 %vm1243_vm4, %v6931_v30  ;;  %v4858_v7 = vsel %vm1243_vm4, %v6931_v30, 0.0 }
 0xe63   :  { %v4013_v48 = vcombine.low %v3989_v38, %v4005_v21  ;;  %v4014_v53 = vcombine.high %v3989_v38, %v4005_v21  ;;  %v4861_v42 = vsel %vm1243_vm4, %v6933_v27, 0.0  ;;  %6734 = vmatprep.mubr.msk.f32.mxu0 %vm7107_vm3, %v7105_v25  ;;  %v4029_v44 = vcombine.low %v3996_v39, %v4012_v29 }
 0xe64   :  { %v4030_v45 = vcombine.high %v3996_v39, %v4012_v29  ;;  %4859 = vadd.xlane.f32.xlu0 %v4858_v7  ;;  %4862 = vadd.xlane.f32.xlu1 %v4861_v42 }
 0xe65   :  { %v6935_v46 = vpop.eup %6934  ;;  %v4021_v3 = vrot.slane %v4013_v48, %v7368_v43  ;;  %v4028_v4 = vrot.slane %v4014_v53, %v7368_v43  ;;  %v4037_v13 = vrot.slane %v4029_v44, %v7368_v43 }
 0xe66   :  { %v4044_v57 = vrot.slane %v4030_v45, %v7368_v43  ;;  %v4864_v12 = vsel %vm1243_vm4, %v6935_v46, 0.0 }
 0xe67   :  { %v4117_v10 = vcombine.low %v4021_v3, %v4028_v4  ;;  %v6353_v49 = vcombine.high %v4021_v3, %v4028_v4 }
 0xe68   :  { %v6937_v8 = vpop.eup %6936  ;;  %v4133_v31 = vcombine.low %v4037_v13, %v4044_v57  ;;  %v6354_v41 = vcombine.high %v4037_v13, %v4044_v57  ;;  %4865 = vadd.xlane.f32.xlu0 %v4864_v12 }
 0xe69   :  { %v6939_v50 = vpop.eup %6938  ;;  %v4124_v52 = vrot.slane %v4117_v10, %v7361_v35  ;;  %v4132_v58 = vrot.slane %v6353_v49, %v7361_v35  ;;  %v4870_v61 = vsel %vm1243_vm4, %v6937_v8, 0.0 }
 0xe6a   :  { %v4140_v40 = vrot.slane %v4133_v31, %v7361_v35  ;;  %v4148_v59 = vrot.slane %v6354_v41, %v7361_v35  ;;  %v4867_v60 = vsel %vm1243_vm4, %v6939_v50, 0.0 }
 0xe6b   :  { %4868 = vadd.xlane.f32.xlu1 %v4867_v60  ;;  %v4149_v62 = vcombine.low %v4124_v52, %v4132_v58  ;;  %v4150_v63 = vcombine.high %v4124_v52, %v4132_v58 }
 0xe6c   :  { %4871 = vadd.xlane.f32.xlu0 %v4870_v61  ;;  %v4165_v0 = vcombine.low %v4140_v40, %v4148_v59  ;;  %v4166_v1 = vcombine.high %v4140_v40, %v4148_v59  ;;  %v5776_v40 = vld [vmem:[#allocation7 + $0x20] sm:$0xff]  ;;  %v5777_v59 = vld [vmem:[#allocation7 + $0x28] sm:$0xff] }
 0xe6d   :  { %v4157_v2 = vrot.slane %v4149_v62, %v7368_v43  ;;  %v4164_v36 = vrot.slane %v4150_v63, %v7368_v43 }
 0xe6e   :  { %v4173_v11 = vrot.slane %v4165_v0, %v7368_v43  ;;  %v4180_v14 = vrot.slane %v4166_v1, %v7368_v43  ;;  %v6831_v1 = vpack.c.bf16 %v5777_v59, %v5776_v40 }
 0xe70   :  { %v4181_v15 = vcombine.low %v4157_v2, %v4173_v11  ;;  %v4182_v51 = vcombine.high %v4157_v2, %v4173_v11  ;;  %v4183_v16 = vcombine.low %v4164_v36, %v4180_v14  ;;  %v4184_v17 = vcombine.high %v4164_v36, %v4180_v14 }
 0xe72   :  { %6728 = vmatpush3.msra.mxu1 %v4181_v15  ;;  %6733 = vmatpush3.msra.mxu0 %v4182_v51 }
 0xe73   :  { %6730 = vmatmul.mubr.msk.f32.vlgmr.msra.gmra.mrb[32].mxu1 %vm1243_vm4, %v6933_v27  ;;  %6735 = vmatmul.mubr.msk.f32.vlgmr.msra.gmra.mrb[36].mxu0 %vm1243_vm4, %v6935_v46 }
 0xe74   :  { %6737 = vmatprep.subr.mxu1 %v7105_v25  ;;  %6742 = vmatprep.subr.mxu0 %v7105_v25 }
 0xe75   :  { %6738 = vmatpush3.msra.mxu1 %v4183_v16  ;;  %6743 = vmatpush3.msra.mxu0 %v4184_v17 }
 0xe76   :  { %6739 = vmatprep.mubr.msk.f32.mxu1 %vm7107_vm3, %v7105_v25  ;;  %6744 = vmatprep.mubr.msk.f32.mxu0 %vm7107_vm3, %v7105_v25 }
 0xe77   :  { %6740 = vmatmul.mubr.msk.f32.vlgmr.msra.gmra.mrb[34].mxu1 %vm1243_vm4, %v6939_v50  ;;  %6745 = vmatmul.mubr.msk.f32.vlgmr.msra.gmra.mrb[38].mxu0 %vm1243_vm4, %v6937_v8 }
 0xe78   :  { %6832 = vmatprep.subr.bf16.mxu1 %v6831_v1 }
 0xe79   :  { %6834 = vmatpush3.bf16.msra.mxu1 %v6831_v1 }
 0xee9   :  { %v4851_v55 = vpop.xlane.xlu0 %4850 }
 0xeea   :  { %6940 = vrcp.f32 %v4851_v55  ;;  %v4854_v24 = vpop.xlane.xlu1 %4853 }
 0xeed   :  { %v4857_v19 = vpop.xlane.xlu0 %4856 }
 0xeee   :  { %6942 = vrcp.f32 %v4857_v19 }
 0xeef   :  { %6944 = vrcp.f32 %v4854_v24 }
 0xef1   :  { %v4860_v56 = vpop.xlane.xlu0 %4859  ;;  %v4863_v30 = vpop.xlane.xlu1 %4862 }
 0xef2   :  { %6946 = vrcp.f32 %v4860_v56 }
 0xef3   :  { %6948 = vrcp.f32 %v4863_v30 }
 0xef4   :  { %v6941_v9 = vpop.eup %6940 }
 0xef5   :  { %v4866_v38 = vpop.xlane.xlu0 %4865 }
 0xef6   :  { %6950 = vrcp.f32 %v4866_v38 }
 0xef8   :  { %v6943_v5 = vpop.eup %6942  ;;  %v4869_v53 = vpop.xlane.xlu1 %4868 }
 0xef9   :  { %v6945_v20 = vpop.eup %6944  ;;  %v4872_v3 = vpop.xlane.xlu0 %4871  ;;  %6952 = vrcp.f32 %v4869_v53 }
 0xefa   :  { %6954 = vrcp.f32 %v4872_v3 }
 0xefc   :  { %v6947_v54 = vpop.eup %6946 }
 0xefd   :  { %v6949_v0 = vpop.eup %6948 }
 0xf00   :  { %v6951_v15 = vpop.eup %6950 }
 0xf03   :  { %v6953_v56 = vpop.eup %6952 }
 0xf2d   :  { %v4942_v22 = vpop.f32.mrb[28].mxu1 }
 0xf2e   :  { %v5015_v28 = vpop.f32.mrb[32].mxu0  ;;  %v6711_v33 = vpop.f32.mrb[29].mxu1  ;;  %v5458_v25 = vmul.f32 %v6941_v9, %v4942_v22 }
 0xf2f   :  { %v6716_v34 = vpop.f32.mrb[33].mxu0  ;;  %v5460_v27 = vmul.f32 %v6945_v20, %v5015_v28 }
 0xf31   :  { %v5088_v6 = vpop.f32.mrb[30].mxu1 }
 0xf32   :  { %v5462_v47 = vmul.f32 %v6943_v5, %v5088_v6  ;;  %v6721_v32 = vpop.f32.mrb[31].mxu1  ;;  %v6955_v6 = vpop.eup %6954 }
 0xf34   :  { %v5473_v37 = vcombine.low %v5458_v25, %v5462_v47  ;;  %v5474_v18 = vcombine.high %v5458_v25, %v5462_v47 }
 0xf35   :  { %v5161_v21 = vpop.f32.mrb[34].mxu0 }
 0xf36   :  { %v5464_v29 = vmul.f32 %v6947_v54, %v5161_v21  ;;  %v6726_v39 = vpop.f32.mrb[35].mxu0  ;;  %v5481_v42 = vrot.slane %v5473_v37, %v7361_v35  ;;  %v5488_v44 = vrot.slane %v5474_v18, %v7361_v35 }
 0xf38   :  { %v5489_v7 = vcombine.low %v5460_v27, %v5464_v29  ;;  %v5490_v48 = vcombine.high %v5460_v27, %v5464_v29 }
 0xf3a   :  { %v5497_v45 = vrot.slane %v5489_v7, %v7361_v35  ;;  %v5504_v46 = vrot.slane %v5490_v48, %v7361_v35 }
 0xf3c   :  { %v5505_v4 = vcombine.low %v5481_v42, %v5497_v45  ;;  %v5506_v13 = vcombine.high %v5481_v42, %v5497_v45  ;;  %v5521_v57 = vcombine.low %v5488_v44, %v5504_v46  ;;  %v5522_v12 = vcombine.high %v5488_v44, %v5504_v46 }
 0xf3e   :  { %v5513_v10 = vrot.slane %v5505_v4, %v7368_v43  ;;  %v5520_v49 = vrot.slane %v5506_v13, %v7368_v43  ;;  %v5529_v8 = vrot.slane %v5521_v57, %v7368_v43  ;;  %v5536_v31 = vrot.slane %v5522_v12, %v7368_v43  ;;  %v5778_v12 = vld [vmem:[#allocation7 + $0x30] sm:$0xff] }
 0xf40   :  { %v5609_v41 = vcombine.low %v5513_v10, %v5520_v49  ;;  %v6379_v50 = vcombine.high %v5513_v10, %v5520_v49  ;;  %v5625_v52 = vcombine.low %v5529_v8, %v5536_v31  ;;  %v6380_v58 = vcombine.high %v5529_v8, %v5536_v31  ;;  %v5779_v10 = vld [vmem:[#allocation7 + $0x38] sm:$0xff] }
 0xf41   :  { %v6835_v49 = vpack.c.bf16 %v5779_v10, %v5778_v12 }
 0xf42   :  { %v5616_v60 = vrot.slane %v5609_v41, %v7361_v35  ;;  %v5624_v61 = vrot.slane %v6379_v50, %v7361_v35  ;;  %v5632_v62 = vrot.slane %v5625_v52, %v7361_v35  ;;  %v5640_v63 = vrot.slane %v6380_v58, %v7361_v35 }
 0xf43   :  { %6836 = vmatprep.subr.bf16.mxu1 %v6835_v49 }
 0xf44   :  { %v5641_v2 = vcombine.low %v5616_v60, %v5624_v61  ;;  %v5657_v11 = vcombine.low %v5632_v62, %v5640_v63  ;;  %v5642_v36 = vcombine.high %v5616_v60, %v5624_v61  ;;  %v5658_v14 = vcombine.high %v5632_v62, %v5640_v63  ;;  %6838 = vmatpush3.bf16.msra.mxu1 %v6835_v49 }
 0xf46   :  { %v5234_v51 = vpop.f32.mrb[32].mxu1  ;;  %v5307_v16 = vpop.f32.mrb[36].mxu0  ;;  %v8089_v17 = vrot.slane %v5641_v2, %v7368_v43  ;;  %v8092_v55 = vrot.slane %v5657_v11, %v7368_v43  ;;  %v8095_v19 = vrot.slane %v5642_v36, %v7368_v43  ;;  %v8098_v24 = vrot.slane %v5658_v14, %v7368_v43 }
 0xf47   :  { %v6731_v22 = vpop.f32.mrb[33].mxu1  ;;  %v6736_v28 = vpop.f32.mrb[37].mxu0  ;;  %v5466_v32 = vmul.f32 %v6949_v0, %v5234_v51  ;;  %v5468_v20 = vmul.f32 %v6951_v15, %v5307_v16 }
 0xf48   :  { %v5674_v33 = vcombine.high %v8089_v17, %v8092_v55  ;;  %v5673_v34 = vcombine.low %v8089_v17, %v8092_v55  ;;  %v5675_v9 = vcombine.low %v8095_v19, %v8098_v24  ;;  %v5676_v5 = vcombine.high %v8095_v19, %v8098_v24  ;;  %v6384_v17 = vld [vmem:[%s8225_s7 + $0x1] ss:$0 sm:$0xff] }
 0xf4a   :  { %v5380_v25 = vpop.f32.mrb[34].mxu1  ;;  %v5453_v47 = vpop.f32.mrb[38].mxu0  ;;  %5747 = vrot.lane.b32.xlu1 %v5674_v33, %s7097_s22 }
 0xf4b   :  { %v5470_v37 = vmul.f32 %v6953_v56, %v5380_v25  ;;  %v5472_v18 = vmul.f32 %v6955_v6, %v5453_v47  ;;  %v6741_v54 = vpop.f32.mrb[35].mxu1  ;;  %v6746_v30 = vpop.f32.mrb[39].mxu0 }
 0xf4d   :  { %v5541_v21 = vcombine.low %v5466_v32, %v5470_v37  ;;  %v5542_v38 = vcombine.high %v5466_v32, %v5470_v37  ;;  %v5557_v27 = vcombine.low %v5468_v20, %v5472_v18  ;;  %v5558_v29 = vcombine.high %v5468_v20, %v5472_v18 }
 0xf4e   :  { %5755 = vrot.lane.b32.xlu1 %v5675_v9, %s7112_s2 }
 0xf4f   :  { %v5549_v39 = vrot.slane %v5541_v21, %v7361_v35  ;;  %v5556_v7 = vrot.slane %v5542_v38, %v7361_v35  ;;  %v5565_v48 = vrot.slane %v5557_v27, %v7361_v35  ;;  %v5572_v53 = vrot.slane %v5558_v29, %v7361_v35 }
 0xf51   :  { %v5573_v42 = vcombine.low %v5549_v39, %v5565_v48  ;;  %v5574_v44 = vcombine.high %v5549_v39, %v5565_v48  ;;  %v5589_v45 = vcombine.low %v5556_v7, %v5572_v53  ;;  %v5590_v46 = vcombine.high %v5556_v7, %v5572_v53  ;;  %v5919_v53 = vld [vmem:[#allocation9 + $0x28] sm:$0xff] }
 0xf53   :  { %v5581_v3 = vrot.slane %v5573_v42, %v7368_v43  ;;  %v5588_v4 = vrot.slane %v5574_v44, %v7368_v43  ;;  %v5597_v13 = vrot.slane %v5589_v45, %v7368_v43  ;;  %v5604_v57 = vrot.slane %v5590_v46, %v7368_v43  ;;  %v5920_v44 = vld [vmem:[#allocation9 + $0x30] sm:$0xff]  ;;  %v5921_v45 = vld [vmem:[#allocation9 + $0x38] sm:$0xff] }
 0xf54   :  { %v6843_v46 = vpack.c.bf16 %v5921_v45, %v5920_v44  ;;  %v6401_v44 = vld [vmem:[%s8232_s14 + $0x1] ss:$0 sm:$0xff]  ;;  %s7114_s14 = smov [#allocation12]  }
 0xf55   :  { %v5677_v8 = vcombine.low %v5581_v3, %v5588_v4  ;;  %v6381_v31 = vcombine.high %v5581_v3, %v5588_v4  ;;  %v5693_v41 = vcombine.low %v5597_v13, %v5604_v57  ;;  %v6382_v50 = vcombine.high %v5597_v13, %v5604_v57  ;;  %v6014_v3 = vld [vmem:[#allocation10 + $0x20] sm:$0xff]  ;;  %v6015_v4 = vld [vmem:[#allocation10 + $0x28] sm:$0xff]  ;;  %s6258_s6 = sshll.u32 %s7114_s14, 4  ;;  %s6259_s6 = int_to_ptr.vmem [resolvable:$true] %s6258_s6 }
 0xf56   :  { %v6847_v13 = vpack.c.bf16 %v6015_v4, %v6014_v3  ;;  %v6402_v3 = vld [vmem:[%s8233_s15 + $0x1] ss:$0 sm:$0xff]  ;;  %s7062_s23 = scalar_lea.vmem %s6259_s6, 256  ;;  %p7067_p8 = scmp.lt.s32.totalorder %s6259_s6, %s6259_s6 }
 0xf57   :  { %v5684_v52 = vrot.slane %v5677_v8, %v7361_v35  ;;  %v5692_v58 = vrot.slane %v6381_v31, %v7361_v35  ;;  %v5700_v40 = vrot.slane %v5693_v41, %v7361_v35  ;;  %v5708_v59 = vrot.slane %v6382_v50, %v7361_v35  ;;  %v6389_v50 = vld [vmem:[%s8226_s8 + $0x1] ss:$0 sm:$0xff]  ;;  %p7063_p7 = scmp.ne.s32.totalorder %s6259_s6, %s7062_s23  ;;  %p7068_p9 = scmp.lt.s32.totalorder %s7062_s23, %s7062_s23 }
 0xf58   :  { %6848 = vmatprep.subr.bf16.mxu1 %v6847_v13 }
 0xf59   :  { %v5710_v60 = vcombine.high %v5684_v52, %v5692_v58  ;;  %v5726_v61 = vcombine.high %v5700_v40, %v5708_v59  ;;  %v5709_v62 = vcombine.low %v5684_v52, %v5692_v58  ;;  %v5725_v63 = vcombine.low %v5700_v40, %v5708_v59  ;;  %v6390_v58 = vld [vmem:[%s8227_s9 + $0x1] ss:$0 sm:$0xff]  ;;  %p7069_p10 = por %p7068_p9, %p7067_p8 }
 0xf5b   :  { %v5724_v0 = vrot.slane %v5710_v60, %v7368_v43  ;;  %v5740_v1 = vrot.slane %v5726_v61, %v7368_v43  ;;  %v5717_v2 = vrot.slane %v5709_v62, %v7368_v43  ;;  %v5733_v11 = vrot.slane %v5725_v63, %v7368_v43  ;;  %p7070_p11 = pnand %p7069_p10, %p7063_p7 }
 0xf5d   :  { %v5743_v36 = vcombine.low %v5724_v0, %v5740_v1  ;;  %v5742_v14 = vcombine.high %v5717_v2, %v5733_v11  ;;  %v5741_v15 = vcombine.low %v5717_v2, %v5733_v11  ;;  %v5744_v51 = vcombine.high %v5724_v0, %v5740_v1  ;;  %v6016_v0 = vld [vmem:[#allocation10 + $0x30] sm:$0xff]  ;;  %v6017_v1 = vld [vmem:[#allocation10 + $0x38] sm:$0xff] }
 0xf5e   :  { %v6851_v2 = vpack.c.bf16 %v6017_v1, %v6016_v0  ;;  %v6392_v11 = vld [vmem:[%s8229_s11 + $0x1] ss:$0 sm:$0xff] }
 0xf5f   :  { %5757 = vrot.lane.b32.xlu1 %v5743_v36, %s7112_s2  ;;  %5749 = vrot.lane.b32.xlu0 %v5742_v14, %s7097_s22 }
 0xf63   :  { %5765 = vrot.lane.b32.xlu1 %v5744_v51, %s7113_s12  ;;  %5763 = vrot.lane.b32.xlu0 %v5676_v5, %s7113_s12 }
 0xfbc   :  { %v5748_v35 = vpop.permute.xlu1 %5747 }
 0xfbd   :  { %v5769_v43 = vsel %vm1243_vm4, %v5673_v34, %v5748_v35 }
 0xfc0   :  { %v5756_v16 = vpop.permute.xlu1 %5755 }
 0xfc1   :  { %v5771_v22 = vsel %vm2830_vm9, %v5769_v43, %v5756_v16 }
 0xfd1   :  { %v5750_v19 = vpop.permute.xlu0 %5749  ;;  %v5758_v24 = vpop.permute.xlu1 %5757 }
 0xfd2   :  { %v5770_v56 = vsel %vm1243_vm4, %v5741_v15, %v5750_v19  ;;  %v6396_v19 = vld [vmem:[%s8253_s26 + $0x1] ss:$0 sm:$0xff] }
 0xfd3   :  { %v5772_v28 = vsel %vm2830_vm9, %v5770_v56, %v5758_v24 }
 0xfd5   :  { %v5764_v33 = vpop.permute.xlu0 %5763  ;;  %v5766_v9 = vpop.permute.xlu1 %5765 }
 0xfd6   :  { %v5773_v6 = vsel %vm2833_vm10, %v5771_v22, %v5764_v33  ;;  %v5774_v5 = vsel %vm2833_vm10, %v5772_v28, %v5766_v9 }
 0xfd7   :  { %6755 = vmatprep.mubr.msk.f32.mxu1 %vm277_vm2, %v5773_v6 }
 0xfd8   :  { %6756 = vmatmul.mubr.msk.f32.vlgmr.msra.gmra.mrb[36].mxu1 %vm277_vm2, %v5774_v5 }
 0xfd9   :  { %6850 = vmatpush3.bf16.msra.mxu1 %v6847_v13 }
 0xfda   :  { %6852 = vmatprep.subr.bf16.mxu1 %v6851_v2 }
 0xfdd   :  { %6854 = vmatpush3.bf16.msra.mxu1 %v6851_v2 }
0x10ab   :  { %v6757_v55 = vpop.f32.mrb[36].mxu1 }
0x10ac   :  { %v5866_v34 = vadd.f32 %v6757_v55, %v6384_v17  ;;  %v5860_v25 = vpop.f32.mrb[37].mxu1 }
0x10ad   :  { %v5861_v47 = vadd.f32 %v6384_v17, %v5860_v25 }
0x10ae   :  { %v5870_v32 = vadd.f32 %v5866_v34, %v7766_v23 }
0x10af   :  { %v5869_v20 = vadd.f32 %v5861_v47, %v7764_v26  ;;  %v5918_v26 = vld [vmem:[#allocation9 + $0x20] sm:$0xff] }
0x10b0   :  { %v5878_v37 = vsel %vm277_vm2, %v5870_v32, 0.0  ;;  %v6839_v42 = vpack.c.bf16 %v5919_v53, %v5918_v26 }
0x10b1   :  { %5879 = vadd.xlane.f32.xlu1 %v5878_v37  ;;  %v5875_v18 = vsel %vm277_vm2, %v5869_v20, 0.0 }
0x10b2   :  { %5876 = vadd.xlane.f32.xlu0 %v5875_v18  ;;  %6840 = vmatprep.subr.bf16.mxu0 %v6839_v42 }
0x10b3   :  { %6842 = vmatpush3.bf16.msra.mxu0 %v6839_v42 }
0x10b4   :  { %6844 = vmatprep.subr.bf16.mxu0 %v6843_v46 }
0x10b7   :  { %6846 = vmatpush3.bf16.msra.mxu0 %v6843_v46 }
0x113e   :  { %v5880_v54 = vpop.xlane.xlu1 %5879 }
0x113f   :  { %v5882_v30 = vmul.f32 0.03125, %v5880_v54  ;;  %v5877_v21 = vpop.xlane.xlu0 %5876  ;;  %v6157_v54 = vld [vmem:[%s8234_s16] sm:$0xff] }
0x1140   :  { %v5881_v38 = vmul.f32 0.03125, %v5877_v21 }
0x1141   :  { %v5884_v27 = vsub.f32 %v5870_v32, %v5882_v30  ;;  %v6158_v30 = vld [vmem:[%s8234_s16 + $0x8] sm:$0xff] }
0x1142   :  { %v5883_v29 = vsub.f32 %v5869_v20, %v5881_v38  ;;  %v6855_v21 = vpack.c.bf16 %v6158_v30, %v6157_v54  ;;  %v6159_v38 = vld [vmem:[%s8234_s16 + $0x10] sm:$0xff] }
0x1143   :  { %v5886_v48 = vmul.f32 %v5884_v27, %v5884_v27 }
0x1144   :  { %v5885_v39 = vmul.f32 %v5883_v29, %v5883_v29  ;;  %6856 = vmatprep.subr.bf16.mxu0 %v6855_v21 }
0x1145   :  { %v5890_v23 = vsel %vm277_vm2, %v5886_v48, 0.0 }
0x1146   :  { %v5887_v7 = vsel %vm277_vm2, %v5885_v39, 0.0 }
0x1147   :  { %5888 = vadd.xlane.f32.xlu0 %v5887_v7 }
0x114b   :  { %5891 = vadd.xlane.f32.xlu0 %v5890_v23 }
0x11d4   :  { %v5889_v57 = vpop.xlane.xlu0 %5888 }
0x11d5   :  { %v5893_v12 = vmul.f32 0.03125, %v5889_v57 }
0x11d7   :  { %v5895_v10 = vadd.f32 1e-05, %v5893_v12 }
0x11d8   :  { %v5892_v49 = vpop.xlane.xlu0 %5891 }
0x11d9   :  { %6956 = vrsqrt.f32 %v5895_v10  ;;  %v5894_v8 = vmul.f32 0.03125, %v5892_v49 }
0x11db   :  { %v5896_v31 = vadd.f32 1e-05, %v5894_v8 }
0x11dd   :  { %6958 = vrsqrt.f32 %v5896_v31 }
0x11e3   :  { %v6957_v41 = vpop.eup %6956 }
0x11e4   :  { %v5899_v52 = vmul.f32 %v6957_v41, %v5883_v29 }
0x11e6   :  { %v5907_v40 = vmul.f32 %v6389_v50, %v5899_v52 }
0x11e7   :  { %v6959_v59 = vpop.eup %6958 }
0x11e8   :  { %v5900_v60 = vmul.f32 %v6959_v59, %v5884_v27  ;;  %v5915_v61 = vadd.f32 %v6390_v58, %v5907_v40  ;;  %v6160_v27 = vld [vmem:[%s8234_s16 + $0x18] sm:$0xff] }
0x11e9   :  { %v6859_v29 = vpack.c.bf16 %v6160_v27, %v6159_v38 }
0x11ea   :  { %v5908_v62 = vmul.f32 %v6389_v50, %v5900_v60  ;;  %6766 = vmatprep.mubr.msk.f32.mxu0 %vm277_vm2, %v5915_v61 }
0x11ec   :  { %v5916_v63 = vadd.f32 %v6390_v58, %v5908_v62 }
0x11ee   :  { %6767 = vmatmul.mubr.msk.f32.vlgmr.msra.gmra.mrb[40].mxu0 %vm277_vm2, %v5916_v63 }
0x11ef   :  { %6858 = vmatpush3.bf16.msra.mxu0 %v6855_v21 }
0x11f0   :  { %6860 = vmatprep.subr.bf16.mxu0 %v6859_v29 }
0x11f3   :  { %6862 = vmatpush3.bf16.msra.mxu0 %v6859_v29 }
0x12c1   :  { %v6768_v36 = vpop.f32.mrb[40].mxu0 }
0x12c2   :  { %v6008_v14 = vadd.f32 %v6768_v36, %v6392_v11  ;;  %v6002_v15 = vpop.f32.mrb[41].mxu0 }
0x12c3   :  { %v6003_v51 = vadd.f32 %v6392_v11, %v6002_v15 }
0x12c4   :  { %v6012_v16 = vmax.f32 %v6008_v14, 0.0 }
0x12c5   :  { %v6011_v35 = vmax.f32 %v6003_v51, 0.0 }
0x12c7   :  { %6777 = vmatprep.mubr.msk.f32.mxu1 %vm277_vm2, %v6011_v35 }
0x12c8   :  { %6778 = vmatmul.mubr.msk.f32.vlgmr.msra.gmra.mrb[38].mxu1 %vm277_vm2, %v6012_v16 }
0x139b   :  { %v6779_v24 = vpop.f32.mrb[38].mxu1 }
0x139c   :  { %v6104_v56 = vadd.f32 %v6779_v24, %v6396_v19  ;;  %v6098_v43 = vpop.f32.mrb[39].mxu1 }
0x139d   :  { %v6099_v22 = vadd.f32 %v6396_v19, %v6098_v43 }
0x139e   :  { %v6108_v28 = vadd.f32 %v6104_v56, %v5916_v63 }
0x139f   :  { %v6107_v33 = vadd.f32 %v6099_v22, %v5915_v61 }
0x13a0   :  { %v6116_v9 = vsel %vm277_vm2, %v6108_v28, 0.0 }
0x13a1   :  { %6117 = vadd.xlane.f32.xlu0 %v6116_v9  ;;  %v6113_v6 = vsel %vm277_vm2, %v6107_v33, 0.0 }
0x13a2   :  { %6114 = vadd.xlane.f32.xlu1 %v6113_v6 }
0x142e   :  { %v6118_v5 = vpop.xlane.xlu0 %6117 }
0x142f   :  { %v6120_v17 = vmul.f32 0.03125, %v6118_v5  ;;  %v6115_v55 = vpop.xlane.xlu1 %6114 }
0x1430   :  { %v6119_v34 = vmul.f32 0.03125, %v6115_v55 }
0x1431   :  { %v6122_v25 = vsub.f32 %v6108_v28, %v6120_v17 }
0x1432   :  { %v6121_v47 = vsub.f32 %v6107_v33, %v6119_v34 }
0x1433   :  { %v6124_v32 = vmul.f32 %v6122_v25, %v6122_v25 }
0x1434   :  { %v6123_v20 = vmul.f32 %v6121_v47, %v6121_v47 }
0x1435   :  { %v6128_v37 = vsel %vm277_vm2, %v6124_v32, 0.0 }
0x1436   :  { %6129 = vadd.xlane.f32.xlu0 %v6128_v37  ;;  %v6125_v18 = vsel %vm277_vm2, %v6123_v20, 0.0 }
0x1437   :  { %6126 = vadd.xlane.f32.xlu1 %v6125_v18 }
0x14c3   :  { %v6130_v39 = vpop.xlane.xlu0 %6129 }
0x14c4   :  { %v6132_v7 = vmul.f32 0.03125, %v6130_v39  ;;  %v6127_v48 = vpop.xlane.xlu1 %6126 }
0x14c5   :  { %v6131_v23 = vmul.f32 0.03125, %v6127_v48 }
0x14c6   :  { %v6134_v26 = vadd.f32 1e-05, %v6132_v7 }
0x14c7   :  { %v6133_v53 = vadd.f32 1e-05, %v6131_v23 }
0x14c8   :  { %6960 = vrsqrt.f32 %v6134_v26 }
0x14c9   :  { %6962 = vrsqrt.f32 %v6133_v53 }
0x14d2   :  { %v6961_v42 = vpop.eup %6960 }
0x14d3   :  { %v6963_v45 = vpop.eup %6962  ;;  %v6138_v46 = vmul.f32 %v6961_v42, %v6122_v25 }
0x14d4   :  { %v6137_v4 = vmul.f32 %v6963_v45, %v6121_v47 }
0x14d5   :  { %v6146_v13 = vmul.f32 %v6401_v44, %v6138_v46 }
0x14d6   :  { %v6145_v57 = vmul.f32 %v6401_v44, %v6137_v4 }
0x14d7   :  { %v6154_v12 = vadd.f32 %v6402_v3, %v6146_v13 }
0x14d8   :  { %v6153_v10 = vadd.f32 %v6402_v3, %v6145_v57 }
0x14d9   :  { %6156 = vst.msk [vmem:[#allocation12 + $0x8] sm:$0xff] %vm277_vm2, %v6154_v12 }
0x14da   :  { %6788 = vmatprep.mubr.msk.f32.mxu0 %vm277_vm2, %v6153_v10  ;;  %6155 = vst.msk [vmem:[#allocation12] sm:$0xff] %vm277_vm2, %v6153_v10 }
0x14db   :  { %6789 = vmatmul.mubr.msk.f32.vlgmr.msra.gmra.mrb[42].mxu0 %vm277_vm2, %v6154_v12 }
0x14dc   :  { %7073 = shalt.err (!%p7070_p11)
}
0x14dd   :  { %s7074_s5 = scalar_lea.hbm %s8237_s19, 256 }
0x14de   :  { %p7075_p12 = scmp.ne.s32.totalorder %s8237_s19, %s7074_s5  ;;  %p7078_p13 = scmp.lt.u32.totalorder %s7074_s5, %s8237_s19 }
0x14e0   :  { %p7080_p0 = pnand %p7078_p13, %p7075_p12 }
0x14e2   :  { %7083 = shalt.err (!%p7080_p0)
}
0x14e3   :  { %6264 = dma.vmem_to_hbm [thread:$0]  %s6259_s6, 256, %s8237_s19, [#allocation6], %s7096_s1, %s7096_s1, %s7097_s22  }
0x14e4   :  { %v6403_v49 = vld [vmem:[%s8235_s17] ss:$0 sm:$0xff]  ;;  %s8254_s12 = sld [smem:[#allocation23_spill]] }
0x15ae   :  { %v6790_v8 = vpop.f32.mrb[42].mxu0 }
0x15af   :  { %v6246_v31 = vadd.f32 %v6790_v8, %v6403_v49  ;;  %v6240_v41 = vpop.f32.mrb[43].mxu0 }
0x15b0   :  { %v6241_v50 = vadd.f32 %v6403_v49, %v6240_v41 }
0x15b1   :  { %6250 = vst.msk [vmem:[%s8254_s12 + $0x8] sm:$0xff] %vm180_vm1, %v6246_v31 }
0x15b2   :  { %6249 = vst.msk [vmem:[%s8254_s12] sm:$0xff] %vm180_vm1, %v6241_v50 }
0x15b3   :  { %7092 = dma.done.wait [#allocation6], 256  }
0x15b4   :  { %7093 = vsyncadd [#allocation6], 4294967040 }
0x15b5   :  { %6270 = vsyncpa [#allocation5], 1 }
0x15b6   :  { %6271 = vsyncpa [#allocation8], 1 }
0x15b7   :  { %6272 = vsyncpa [#allocation11], 1 }
0x15b8   :  { %6273 = vsyncpa [#allocation6], 1 }

</bundles_post_ra>
